<compile_context>
chip_gen: v7x
topology: tpu7x:2x2x1
jax: 0.10.0
libtpu: 0.0.40
codegen_flags: <defaults>
</compile_context>

<pallas_src>
import functools

import numpy as np

import jax
import jax.numpy as jnp
from jax.experimental import pallas as pl
from jax.experimental.pallas import tpu as pltpu


# ------------------------------ Pallas kernel -------------------------------

def _focal_loss_kernel(nb_ref, cls_ref, reg_ref, anc_ref, boxt_ref, lab_ref,
                       cls_out_ref, reg_out_ref,
                       cls_acc, reg_acc, npos_acc,
                       *, alpha, gamma, num_anchors, a_tile):
    """Grid = (batch, anchor_tiles).  Native layout: anchors on sublanes.

    nb_ref   : SMEM (B,) int32       -- valid GT boxes per image (scalar prefetch)
    cls_ref  : VMEM (1, A_TILE, C)   -- classification probabilities (native layout)
    reg_ref  : VMEM (1, A_TILE, 4)   -- box regression predictions   (native layout)
    anc_ref  : VMEM (A_TILE, 8)      -- anchors: x1,y1,x2,y2,w,h,cx,cy
    boxt_ref : VMEM (1, 4, G)        -- padded GT boxes, rows = x1,y1,x2,y2 (G on lanes)
    lab_ref  : VMEM (1, 1, G)        -- padded GT class labels (float)
    outputs  : VMEM (1, 1, 1) f32    -- per-image cls / reg loss
    scratch  : VMEM (1, 1) f32 x 3   -- cls_sum / reg_sum / num_pos accumulators
    """
    b = pl.program_id(0)
    a = pl.program_id(1)
    last_a = pl.num_programs(1) - 1
    nb = nb_ref[b]                                     # int32 scalar (SMEM)

    @pl.when(a == 0)
    def _():
        cls_acc[...] = jnp.zeros_like(cls_acc)
        reg_acc[...] = jnp.zeros_like(reg_acc)
        npos_acc[...] = jnp.zeros_like(npos_acc)

    cls_t = cls_ref[0]                                 # (AT, C)
    reg_t = reg_ref[0]                                 # (AT, 4)
    anc = anc_ref[...]                                 # (AT, 8)
    boxt = boxt_ref[0]                                 # (4, G)
    lab = lab_ref[0]                                   # (1, G)

    AT, C = cls_t.shape
    G = boxt.shape[1]

    ax1 = anc[:, 0:1]; ay1 = anc[:, 1:2]; ax2 = anc[:, 2:3]; ay2 = anc[:, 3:4]
    aw = anc[:, 4:5]; ah = anc[:, 5:6]; acx = anc[:, 6:7]; acy = anc[:, 7:8]
    area_a = aw * ah                                   # (AT, 1)

    bx1 = boxt[0:1, :]; by1 = boxt[1:2, :]; bx2 = boxt[2:3, :]; by2 = boxt[3:4, :]
    area_b = (bx2 - bx1) * (by2 - by1)                 # (1, G)

    # ---------------- IoU (AT, G): anchors on sublanes, GT boxes on lanes ----------
    iw = jnp.maximum(jnp.minimum(ax2, bx2) - jnp.maximum(ax1, bx1), 0.0)
    ih = jnp.maximum(jnp.minimum(ay2, by2) - jnp.maximum(ay1, by1), 0.0)
    inter = iw * ih
    iou = inter / (area_a + area_b - inter)            # (AT, G)

    gi = jax.lax.broadcasted_iota(jnp.int32, (AT, G), 1)
    gi_f = gi.astype(jnp.float32)
    valid_gt = gi < nb                                 # mask padded GT boxes
    iou = jnp.where(valid_gt, iou, -1.0)

    iou_max = jnp.max(iou, axis=1, keepdims=True)      # (AT, 1)
    # First GT index attaining the max (matches numpy argmax tie-break).
    arg = jnp.min(jnp.where((iou == iou_max) & valid_gt, gi_f, float(G)),
                  axis=1, keepdims=True)               # (AT, 1)
    one_hot = (gi_f == arg).astype(jnp.float32)        # (AT, G)

    def take(row):                                     # (1,G) -> (AT,1)
        return jnp.sum(one_hot * row, axis=1, keepdims=True)

    gx1, gy1, gx2, gy2 = take(bx1), take(by1), take(bx2), take(by2)
    g_lab = take(lab)                                  # (AT, 1)

    # Mask anchors that are pure A-axis padding (global index >= num_anchors).
    a_idx = jax.lax.broadcasted_iota(jnp.int32, (AT, 1), 0) + a * a_tile
    anchor_valid = a_idx < num_anchors

    pos = (iou_max >= 0.5) & anchor_valid              # (AT, 1)
    neg = (iou_max < 0.4) & anchor_valid               # (AT, 1)
    npos_part = jnp.sum(pos.astype(jnp.float32), axis=0, keepdims=True)   # (1, 1)

    # ---------------- focal classification loss (AT, C), classes on lanes ----------
    c_iota = jax.lax.broadcasted_iota(jnp.int32, (AT, C), 1).astype(jnp.float32)
    is_one = pos & (c_iota == g_lab)                   # target == 1
    is_valid = pos | neg                               # target != -1
    pt = jnp.where(is_one, cls_t, 1.0 - cls_t)         # prob of the "correct" outcome
    fw = 1.0 - pt                                      # focal-weight base, in [0, 1]
    if gamma == 2.0:                                   # static specialization (VPU only)
        fw_pow = fw * fw
    elif gamma == 1.5:
        fw_pow = fw * jnp.sqrt(fw)
    elif gamma == 1.0:
        fw_pow = fw
    elif gamma == 0.5:
        fw_pow = jnp.sqrt(fw)
    else:
        fw_pow = jnp.exp(gamma * jnp.log(jnp.maximum(fw, 1e-30)))
    alpha_factor = jnp.where(is_one, alpha, 1.0 - alpha)
    bce = -jnp.log(jnp.clip(pt, 1e-6, 1.0))            # single log per element
    cls_loss = jnp.where(is_valid, alpha_factor * fw_pow * bce, 0.0)
    cls_part = jnp.sum(jnp.sum(cls_loss, axis=1, keepdims=True),
                       axis=0, keepdims=True)          # (1, 1)

    # ---------------- box regression targets + smooth-L1, per coordinate ----------
    gw = gx2 - gx1; gh = gy2 - gy1
    gcx = gx1 + 0.5 * gw; gcy = gy1 + 0.5 * gh         # centers use unclamped w/h
    gw = jnp.maximum(gw, 1.0); gh = jnp.maximum(gh, 1.0)

    tdx = (gcx - acx) / aw
    tdy = (gcy - acy) / ah
    tdw = jnp.log(gw / aw)
    tdh = jnp.log(gh / ah)

    def sl1(t, r):
        d = jnp.abs(t - r)
        return jnp.where(d <= (1.0 / 9.0), 4.5 * d * d, d - (0.5 / 9.0))

    sl1_total = (sl1(tdx, reg_t[:, 0:1]) + sl1(tdy, reg_t[:, 1:2]) +
                 sl1(tdw, reg_t[:, 2:3]) + sl1(tdh, reg_t[:, 3:4]))        # (AT, 1)
    reg_part = jnp.sum(jnp.where(pos, sl1_total, 0.0), axis=0, keepdims=True)  # (1, 1)

    cls_acc[...] = cls_acc[...] + cls_part
    reg_acc[...] = reg_acc[...] + reg_part
    npos_acc[...] = npos_acc[...] + npos_part

    @pl.when(a == last_a)
    def _():
        npos = npos_acc[...]                           # (1, 1)
        cls_val = jnp.where(nb > 0,
                            cls_acc[...] / jnp.maximum(npos, 1.0), 0.0)
        reg_val = jnp.where(npos > 0.0,
                            reg_acc[...] / (npos * 4.0), 0.0)
        cls_out_ref[...] = cls_val.reshape(1, 1, 1)
        reg_out_ref[...] = reg_val.reshape(1, 1, 1)


# --------------------------------- wrapper ----------------------------------

def focal_loss_pallas(classifications, regressions, anchors, boxes, labels, num_boxes,
                      alpha=0.25, gamma=1.5, a_tile=4096, vmem_limit_bytes=None):
    """classifications (B,A,C), regressions (B,A,4), anchors (1,A,4),
    boxes (B,G,4), labels (B,G), num_boxes (B,) -> ((1,), (1,)) like the torch module."""
    B, A, C = classifications.shape
    G = boxes.shape[1]

    # Anchor tile: multiple of 8 sublanes, no larger than A.
    a_tile = max(8, min(int(a_tile), A))
    a_tile = (a_tile // 8) * 8
    num_a_tiles = -(-A // a_tile)
    A_pad = num_a_tiles * a_tile

    cls = classifications.astype(jnp.float32)          # native (B, A, C) — no transpose
    reg = regressions.astype(jnp.float32)               # native (B, A, 4)
    anc = anchors[0].astype(jnp.float32)                 # (A, 4)

    if A_pad != A:
        pad = A_pad - A
        cls = jnp.pad(cls, ((0, 0), (0, pad), (0, 0)))
        reg = jnp.pad(reg, ((0, 0), (0, pad), (0, 0)))
        anc = jnp.pad(anc, ((0, pad), (0, 0)))

    # Precompute anchor-derived constants once (shared across batch / tiles).
    aw = anc[:, 2:3] - anc[:, 0:1]
    ah = anc[:, 3:4] - anc[:, 1:2]
    acx = anc[:, 0:1] + 0.5 * aw
    acy = anc[:, 1:2] + 0.5 * ah
    anc_ext = jnp.concatenate([anc, aw, ah, acx, acy], axis=1)   # (A_pad, 8)

    boxes_t = jnp.transpose(boxes.astype(jnp.float32), (0, 2, 1))  # (B, 4, G) — tiny
    labels_f = labels.astype(jnp.float32).reshape(B, 1, G)          # (B, 1, G)
    nb = num_boxes.astype(jnp.int32)                                # (B,)

    kern = functools.partial(_focal_loss_kernel, alpha=float(alpha), gamma=float(gamma),
                             num_anchors=A, a_tile=a_tile)

    cp_kwargs = dict(dimension_semantics=("parallel", "arbitrary"))
    if vmem_limit_bytes is not None:
        cp_kwargs["vmem_limit_bytes"] = int(vmem_limit_bytes)

    out_cls, out_reg = pl.pallas_call(
        kern,
        out_shape=(jax.ShapeDtypeStruct((B, 1, 1), jnp.float32),
                   jax.ShapeDtypeStruct((B, 1, 1), jnp.float32)),
        grid_spec=pltpu.PrefetchScalarGridSpec(
            num_scalar_prefetch=1,
            grid=(B, num_a_tiles),
            in_specs=[
                pl.BlockSpec((1, a_tile, C), lambda b, a, nb_ref: (b, a, 0)),
                pl.BlockSpec((1, a_tile, 4), lambda b, a, nb_ref: (b, a, 0)),
                pl.BlockSpec((a_tile, 8), lambda b, a, nb_ref: (a, 0)),
                pl.BlockSpec((1, 4, G), lambda b, a, nb_ref: (b, 0, 0)),
                pl.BlockSpec((1, 1, G), lambda b, a, nb_ref: (b, 0, 0)),
            ],
            out_specs=[
                pl.BlockSpec((1, 1, 1), lambda b, a, nb_ref: (b, 0, 0)),
                pl.BlockSpec((1, 1, 1), lambda b, a, nb_ref: (b, 0, 0)),
            ],
            scratch_shapes=[
                pltpu.VMEM((1, 1), jnp.float32),   # cls_sum
                pltpu.VMEM((1, 1), jnp.float32),   # reg_sum
                pltpu.VMEM((1, 1), jnp.float32),   # num_pos
            ],
        ),
        compiler_params=pltpu.CompilerParams(**cp_kwargs),
    )(nb, cls, reg, anc_ext, boxes_t, labels_f)

    cls_losses = out_cls[:, 0, 0]                                   # (B,)
    reg_losses = out_reg[:, 0, 0]                                   # (B,)
    return (jnp.mean(cls_losses, keepdims=True),
            jnp.mean(reg_losses, keepdims=True))


# --------------------------- pure numpy reference ----------------------------

def focal_loss_ref(classifications, regressions, anchors, boxes, labels, num_boxes,
                   alpha=0.25, gamma=1.5):
    cls = np.asarray(classifications, np.float64)
    reg = np.asarray(regressions, np.float64)
    anchor = np.asarray(anchors, np.float64)[0]
    boxes = np.asarray(boxes, np.float64)
    labels = np.asarray(labels)
    num_boxes = np.asarray(num_boxes)
    B = cls.shape[0]
    cls_losses, reg_losses = [], []
    for j in range(B):
        n = int(num_boxes[j])
        classification = cls[j]
        regression = reg[j]
        if n == 0:
            cls_losses.append(0.0); reg_losses.append(0.0); continue
        bb = boxes[j, :n]; lab = labels[j, :n]
        area_a = (anchor[:, 2] - anchor[:, 0]) * (anchor[:, 3] - anchor[:, 1])
        area_b = (bb[:, 2] - bb[:, 0]) * (bb[:, 3] - bb[:, 1])
        iw = np.clip(np.minimum(anchor[:, None, 2], bb[None, :, 2])
                     - np.maximum(anchor[:, None, 0], bb[None, :, 0]), 0, None)
        ih = np.clip(np.minimum(anchor[:, None, 3], bb[None, :, 3])
                     - np.maximum(anchor[:, None, 1], bb[None, :, 1]), 0, None)
        inter = iw * ih
        iou = inter / (area_a[:, None] + area_b[None, :] - inter)
        iou_max = iou.max(axis=1); iou_arg = iou.argmax(axis=1)
        targets = -np.ones_like(classification)
        targets[iou_max < 0.4, :] = 0.0
        pos = iou_max >= 0.5
        num_pos = int(pos.sum())
        assigned = bb[iou_arg]
        targets[pos, :] = 0.0
        targets[pos, lab[iou_arg[pos]].astype(int)] = 1.0
        alpha_factor = np.where(targets == 1.0, alpha, 1.0 - alpha)
        fw = np.where(targets == 1.0, 1.0 - classification, classification)
        fw = alpha_factor * np.power(fw, gamma)
        bce = -(targets * np.log(np.clip(classification, 1e-6, 1.0)) +
                (1.0 - targets) * np.log(np.clip(1.0 - classification, 1e-6, 1.0)))
        cls_loss = np.where(targets != -1.0, fw * bce, 0.0)
        cls_losses.append(cls_loss.sum() / max(float(num_pos), 1.0))
        if num_pos > 0:
            aw = anchor[:, 2] - anchor[:, 0]; ah = anchor[:, 3] - anchor[:, 1]
            acx = anchor[:, 0] + 0.5 * aw; acy = anchor[:, 1] + 0.5 * ah
            ass = assigned[pos]
            gw = ass[:, 2] - ass[:, 0]; gh = ass[:, 3] - ass[:, 1]
            gcx = ass[:, 0] + 0.5 * gw; gcy = ass[:, 1] + 0.5 * gh
            gw = np.clip(gw, 1.0, None); gh = np.clip(gh, 1.0, None)
            tdx = (gcx - acx[pos]) / aw[pos]; tdy = (gcy - acy[pos]) / ah[pos]
            tdw = np.log(gw / aw[pos]); tdh = np.log(gh / ah[pos])
            t = np.stack([tdx, tdy, tdw, tdh], axis=1)
            diff = np.abs(t - regression[pos])
            sl1 = np.where(diff <= 1.0 / 9.0, 0.5 * 9.0 * diff * diff, diff - 0.5 / 9.0)
            reg_losses.append(sl1.mean())
        else:
            reg_losses.append(0.0)
    return float(np.mean(cls_losses)), float(np.mean(reg_losses))


# ----------------------------------- main ------------------------------------

if __name__ == "__main__":
    B, A, C, G = 2, 256, 8, 8     # batch, anchors, classes, max GT boxes / image

    key = jax.random.PRNGKey(0)
    k1, k2, k3, k4, k5 = jax.random.split(key, 5)

    # Anchors: 16x16 grid, stride 8, 12x12 boxes (xyxy).
    gs = 16
    ctr = (jnp.arange(gs, dtype=jnp.float32) + 0.5) * 8.0
    cxx, cyy = jnp.meshgrid(ctr, ctr, indexing="xy")
    cxx = cxx.reshape(-1); cyy = cyy.reshape(-1)
    half = 6.0
    anchors = jnp.stack([cxx - half, cyy - half, cxx + half, cyy + half], axis=1)[None]  # (1,A,4)

    # Predictions: classification in (0,1) (post-sigmoid), regressions ~ N(0, 0.1).
    classifications = jax.nn.sigmoid(jax.random.normal(k1, (B, A, C), jnp.float32))
    regressions = 0.1 * jax.random.normal(k2, (B, A, 4), jnp.float32)

    # Padded GT annotations: boxes jittered from random anchors (guarantees IoU>0.5 positives).
    num_boxes = jnp.array([3, 5], dtype=jnp.int32)
    base_idx = jax.random.randint(k3, (B, G), 0, A)
    gt_boxes = anchors[0][base_idx] + jax.random.uniform(k4, (B, G, 4), minval=-1.5, maxval=1.5)
    gt_labels = jax.random.randint(k5, (B, G), 0, C)

    # a_tile=96 -> 3 anchor tiles with A-padding, exercising the tiled accumulation
    # path and the padded-anchor masking.
    fwd = jax.jit(functools.partial(focal_loss_pallas, alpha=0.25, gamma=1.5, a_tile=96))
    cls_out, reg_out = fwd(classifications, regressions, anchors, gt_boxes, gt_labels, num_boxes)
    jax.block_until_ready((cls_out, reg_out))

    assert cls_out.shape == (1,) and reg_out.shape == (1,), (cls_out.shape, reg_out.shape)
    assert bool(jnp.isfinite(cls_out[0])) and bool(jnp.isfinite(reg_out[0]))

    ref_cls, ref_reg = focal_loss_ref(classifications, regressions, anchors,
                                      gt_boxes, gt_labels, num_boxes, alpha=0.25, gamma=1.5)
    np.testing.assert_allclose(float(cls_out[0]), ref_cls, rtol=5e-4, atol=1e-5)
    np.testing.assert_allclose(float(reg_out[0]), ref_reg, rtol=5e-4, atol=1e-5)

    print("KERNEL_OK")
</pallas_src>

<mosaic_0001>
module attributes {stable_mosaic.version = 11 : i64} {
  func.func @_focal_loss_kernel(%arg0: i32, %arg1: i32, %arg2: memref<2xi32, #tpu.memory_space<smem>>, %arg3: memref<1x96x8xf32, #tpu.memory_space<vmem>>, %arg4: memref<1x96x4xf32, #tpu.memory_space<vmem>>, %arg5: memref<96x8xf32, #tpu.memory_space<vmem>>, %arg6: memref<1x4x8xf32, #tpu.memory_space<vmem>>, %arg7: memref<1x1x8xf32, #tpu.memory_space<vmem>>, %arg8: memref<1x1x1xf32, #tpu.memory_space<vmem>>, %arg9: memref<1x1x1xf32, #tpu.memory_space<vmem>>, %arg10: memref<1x1xf32, #tpu.memory_space<vmem>>, %arg11: memref<1x1xf32, #tpu.memory_space<vmem>>, %arg12: memref<1x1xf32, #tpu.memory_space<vmem>>) attributes {dimension_semantics = [#tpu.dimension_semantics<parallel>, #tpu.dimension_semantics<arbitrary>], iteration_bounds = array<i64: 2, 3>, scalar_prefetch = 1 : i64, scratch_operands = 3 : i64, tpu.core_type = #tpu.core_type<tc>, window_params = [{transform_indices = @transform_0, window_bounds = array<i64: 1, 96, 8>}, {transform_indices = @transform_1, window_bounds = array<i64: 1, 96, 4>}, {transform_indices = @transform_2, window_bounds = array<i64: 96, 8>}, {transform_indices = @transform_3, window_bounds = array<i64: 1, 4, 8>}, {transform_indices = @transform_4, window_bounds = array<i64: 1, 1, 8>}, {transform_indices = @transform_5, window_bounds = array<i64: 1, 1, 1>}, {transform_indices = @transform_6, window_bounds = array<i64: 1, 1, 1>}]} {
    %0 = arith.index_cast %arg0 : i32 to index
    %1 = memref.load %arg2[%0] : memref<2xi32, #tpu.memory_space<smem>>
    %c0_i32 = arith.constant 0 : i32
    %2 = arith.cmpi eq, %arg1, %c0_i32 : i32
    %3 = arith.extui %2 : i1 to i32
    %c0_i32_0 = arith.constant 0 : i32
    %4 = arith.cmpi ne, %3, %c0_i32_0 : i32
    scf.if %4 {
      %cst_68 = arith.constant 0.000000e+00 : f32
      %226 = vector.broadcast %cst_68 : f32 to vector<1x1xf32>
      %c0_69 = arith.constant 0 : index
      %c0_70 = arith.constant 0 : index
      %227 = vector.load %arg10[%c0_69, %c0_70] : memref<1x1xf32, #tpu.memory_space<vmem>>, vector<1x1xf32>
      tpu.vector_store %arg10[%c0_69, %c0_70], %226 {strides = array<i32>} : memref<1x1xf32, #tpu.memory_space<vmem>>, vector<1x1xf32>,
      %cst_71 = arith.constant 0.000000e+00 : f32
      %228 = vector.broadcast %cst_71 : f32 to vector<1x1xf32>
      %c0_72 = arith.constant 0 : index
      %c0_73 = arith.constant 0 : index
      %229 = vector.load %arg11[%c0_72, %c0_73] : memref<1x1xf32, #tpu.memory_space<vmem>>, vector<1x1xf32>
      tpu.vector_store %arg11[%c0_72, %c0_73], %228 {strides = array<i32>} : memref<1x1xf32, #tpu.memory_space<vmem>>, vector<1x1xf32>,
      %cst_74 = arith.constant 0.000000e+00 : f32
      %230 = vector.broadcast %cst_74 : f32 to vector<1x1xf32>
      %c0_75 = arith.constant 0 : index
      %c0_76 = arith.constant 0 : index
      %231 = vector.load %arg12[%c0_75, %c0_76] : memref<1x1xf32, #tpu.memory_space<vmem>>, vector<1x1xf32>
      tpu.vector_store %arg12[%c0_75, %c0_76], %230 {strides = array<i32>} : memref<1x1xf32, #tpu.memory_space<vmem>>, vector<1x1xf32>,
    } else {
    }
    %c0 = arith.constant 0 : index
    %c0_1 = arith.constant 0 : index
    %c0_2 = arith.constant 0 : index
    %5 = vector.load %arg3[%c0, %c0_1, %c0_2] : memref<1x96x8xf32, #tpu.memory_space<vmem>>, vector<1x96x8xf32>
    %6 = vector.shape_cast %5 : vector<1x96x8xf32> to vector<96x8xf32>
    %c0_3 = arith.constant 0 : index
    %c0_4 = arith.constant 0 : index
    %c0_5 = arith.constant 0 : index
    %7 = vector.load %arg4[%c0_3, %c0_4, %c0_5] : memref<1x96x4xf32, #tpu.memory_space<vmem>>, vector<1x96x4xf32>
    %8 = vector.shape_cast %7 : vector<1x96x4xf32> to vector<96x4xf32>
    %c0_6 = arith.constant 0 : index
    %c0_7 = arith.constant 0 : index
    %9 = vector.load %arg5[%c0_6, %c0_7] : memref<96x8xf32, #tpu.memory_space<vmem>>, vector<96x8xf32>
    %c0_8 = arith.constant 0 : index
    %c0_9 = arith.constant 0 : index
    %c0_10 = arith.constant 0 : index
    %10 = vector.load %arg6[%c0_8, %c0_9, %c0_10] : memref<1x4x8xf32, #tpu.memory_space<vmem>>, vector<1x4x8xf32>
    %11 = vector.shape_cast %10 : vector<1x4x8xf32> to vector<4x8xf32>
    %c0_11 = arith.constant 0 : index
    %c0_12 = arith.constant 0 : index
    %c0_13 = arith.constant 0 : index
    %12 = vector.load %arg7[%c0_11, %c0_12, %c0_13] : memref<1x1x8xf32, #tpu.memory_space<vmem>>, vector<1x1x8xf32>
    %13 = vector.shape_cast %12 : vector<1x1x8xf32> to vector<1x8xf32>
    %14 = vector.extract_strided_slice %9 {offsets = [0, 0], sizes = [96, 1], strides = [1, 1]} : vector<96x8xf32> to vector<96x1xf32>
    %15 = vector.extract_strided_slice %9 {offsets = [0, 1], sizes = [96, 1], strides = [1, 1]} : vector<96x8xf32> to vector<96x1xf32>
    %16 = vector.extract_strided_slice %9 {offsets = [0, 2], sizes = [96, 1], strides = [1, 1]} : vector<96x8xf32> to vector<96x1xf32>
    %17 = vector.extract_strided_slice %9 {offsets = [0, 3], sizes = [96, 1], strides = [1, 1]} : vector<96x8xf32> to vector<96x1xf32>
    %18 = vector.extract_strided_slice %9 {offsets = [0, 4], sizes = [96, 1], strides = [1, 1]} : vector<96x8xf32> to vector<96x1xf32>
    %19 = vector.extract_strided_slice %9 {offsets = [0, 5], sizes = [96, 1], strides = [1, 1]} : vector<96x8xf32> to vector<96x1xf32>
    %20 = vector.extract_strided_slice %9 {offsets = [0, 6], sizes = [96, 1], strides = [1, 1]} : vector<96x8xf32> to vector<96x1xf32>
    %21 = vector.extract_strided_slice %9 {offsets = [0, 7], sizes = [96, 1], strides = [1, 1]} : vector<96x8xf32> to vector<96x1xf32>
    %22 = arith.mulf %18, %19 : vector<96x1xf32>
    %23 = vector.extract_strided_slice %11 {offsets = [0, 0], sizes = [1, 8], strides = [1, 1]} : vector<4x8xf32> to vector<1x8xf32>
    %24 = vector.extract_strided_slice %11 {offsets = [1, 0], sizes = [1, 8], strides = [1, 1]} : vector<4x8xf32> to vector<1x8xf32>
    %25 = vector.extract_strided_slice %11 {offsets = [2, 0], sizes = [1, 8], strides = [1, 1]} : vector<4x8xf32> to vector<1x8xf32>
    %26 = vector.extract_strided_slice %11 {offsets = [3, 0], sizes = [1, 8], strides = [1, 1]} : vector<4x8xf32> to vector<1x8xf32>
    %27 = arith.subf %25, %23 : vector<1x8xf32>
    %28 = arith.subf %26, %24 : vector<1x8xf32>
    %29 = arith.mulf %27, %28 : vector<1x8xf32>
    %30 = vector.broadcast %16 : vector<96x1xf32> to vector<96x8xf32>
    %31 = vector.broadcast %25 : vector<1x8xf32> to vector<96x8xf32>
    %32 = arith.minimumf %30, %31 : vector<96x8xf32>
    %33 = vector.broadcast %14 : vector<96x1xf32> to vector<96x8xf32>
    %34 = vector.broadcast %23 : vector<1x8xf32> to vector<96x8xf32>
    %35 = arith.maximumf %33, %34 : vector<96x8xf32>
    %36 = arith.subf %32, %35 : vector<96x8xf32>
    %cst = arith.constant 0.000000e+00 : f32
    %37 = vector.broadcast %cst : f32 to vector<96x8xf32>
    %38 = arith.maximumf %36, %37 : vector<96x8xf32>
    %39 = vector.broadcast %17 : vector<96x1xf32> to vector<96x8xf32>
    %40 = vector.broadcast %26 : vector<1x8xf32> to vector<96x8xf32>
    %41 = arith.minimumf %39, %40 : vector<96x8xf32>
    %42 = vector.broadcast %15 : vector<96x1xf32> to vector<96x8xf32>
    %43 = vector.broadcast %24 : vector<1x8xf32> to vector<96x8xf32>
    %44 = arith.maximumf %42, %43 : vector<96x8xf32>
    %45 = arith.subf %41, %44 : vector<96x8xf32>
    %cst_14 = arith.constant 0.000000e+00 : f32
    %46 = vector.broadcast %cst_14 : f32 to vector<96x8xf32>
    %47 = arith.maximumf %45, %46 : vector<96x8xf32>
    %48 = arith.mulf %38, %47 : vector<96x8xf32>
    %49 = vector.broadcast %22 : vector<96x1xf32> to vector<96x8xf32>
    %50 = vector.broadcast %29 : vector<1x8xf32> to vector<96x8xf32>
    %51 = arith.addf %49, %50 : vector<96x8xf32>
    %52 = arith.subf %51, %48 : vector<96x8xf32>
    %53 = arith.divf %48, %52 : vector<96x8xf32>
    %54 = tpu.iota {dimensions = array<i32: 1>} : vector<96x8xi32>
    %55 = arith.sitofp %54 : vector<96x8xi32> to vector<96x8xf32>
    %56 = vector.broadcast %1 : i32 to vector<96x8xi32>
    %57 = arith.cmpi slt, %54, %56 : vector<96x8xi32>
    %cst_15 = arith.constant -1.000000e+00 : f32
    %58 = vector.broadcast %cst_15 : f32 to vector<96x8xf32>
    %59 = arith.select %57, %53, %58 : vector<96x8xi1>, vector<96x8xf32>
    %cst_16 = arith.constant dense<0xFF800000> : vector<96xf32>
    %60 = vector.multi_reduction <maximumf>, %59, %cst_16 [1] : vector<96x8xf32> to vector<96xf32>
    %61 = vector.shape_cast %60 : vector<96xf32> to vector<96x1xf32>
    %62 = vector.broadcast %61 : vector<96x1xf32> to vector<96x8xf32>
    %63 = arith.cmpf oeq, %59, %62 : vector<96x8xf32>
    %64 = arith.andi %63, %57 : vector<96x8xi1>
    %cst_17 = arith.constant 8.000000e+00 : f32
    %65 = vector.broadcast %cst_17 : f32 to vector<96x8xf32>
    %66 = arith.select %64, %55, %65 : vector<96x8xi1>, vector<96x8xf32>
    %cst_18 = arith.constant dense<0x7F800000> : vector<96xf32>
    %67 = vector.multi_reduction <minimumf>, %66, %cst_18 [1] : vector<96x8xf32> to vector<96xf32>
    %68 = vector.shape_cast %67 : vector<96xf32> to vector<96x1xf32>
    %69 = vector.broadcast %68 : vector<96x1xf32> to vector<96x8xf32>
    %70 = arith.cmpf oeq, %55, %69 : vector<96x8xf32>
    %71 = arith.extui %70 : vector<96x8xi1> to vector<96x8xi32>
    %72 = arith.sitofp %71 : vector<96x8xi32> to vector<96x8xf32>
    %73 = vector.broadcast %23 : vector<1x8xf32> to vector<96x8xf32>
    %74 = arith.mulf %72, %73 : vector<96x8xf32>
    %cst_19 = arith.constant dense<0.000000e+00> : vector<96xf32>
    %75 = vector.multi_reduction <add>, %74, %cst_19 [1] : vector<96x8xf32> to vector<96xf32>
    %76 = vector.shape_cast %75 : vector<96xf32> to vector<96x1xf32>
    %77 = vector.broadcast %24 : vector<1x8xf32> to vector<96x8xf32>
    %78 = arith.mulf %72, %77 : vector<96x8xf32>
    %cst_20 = arith.constant dense<0.000000e+00> : vector<96xf32>
    %79 = vector.multi_reduction <add>, %78, %cst_20 [1] : vector<96x8xf32> to vector<96xf32>
    %80 = vector.shape_cast %79 : vector<96xf32> to vector<96x1xf32>
    %81 = vector.broadcast %25 : vector<1x8xf32> to vector<96x8xf32>
    %82 = arith.mulf %72, %81 : vector<96x8xf32>
    %cst_21 = arith.constant dense<0.000000e+00> : vector<96xf32>
    %83 = vector.multi_reduction <add>, %82, %cst_21 [1] : vector<96x8xf32> to vector<96xf32>
    %84 = vector.shape_cast %83 : vector<96xf32> to vector<96x1xf32>
    %85 = vector.broadcast %26 : vector<1x8xf32> to vector<96x8xf32>
    %86 = arith.mulf %72, %85 : vector<96x8xf32>
    %cst_22 = arith.constant dense<0.000000e+00> : vector<96xf32>
    %87 = vector.multi_reduction <add>, %86, %cst_22 [1] : vector<96x8xf32> to vector<96xf32>
    %88 = vector.shape_cast %87 : vector<96xf32> to vector<96x1xf32>
    %89 = vector.broadcast %13 : vector<1x8xf32> to vector<96x8xf32>
    %90 = arith.mulf %72, %89 : vector<96x8xf32>
    %cst_23 = arith.constant dense<0.000000e+00> : vector<96xf32>
    %91 = vector.multi_reduction <add>, %90, %cst_23 [1] : vector<96x8xf32> to vector<96xf32>
    %92 = vector.shape_cast %91 : vector<96xf32> to vector<96x1xf32>
    %93 = tpu.iota {dimensions = array<i32: 0>} : vector<96x1xi32>
    %c96_i32 = arith.constant 96 : i32
    %94 = arith.muli %arg1, %c96_i32 : i32
    %95 = vector.broadcast %94 : i32 to vector<96x1xi32>
    %96 = arith.addi %93, %95 : vector<96x1xi32>
    %c256_i32 = arith.constant 256 : i32
    %97 = vector.broadcast %c256_i32 : i32 to vector<96x1xi32>
    %98 = arith.cmpi slt, %96, %97 : vector<96x1xi32>
    %cst_24 = arith.constant 5.000000e-01 : f32
    %99 = vector.broadcast %cst_24 : f32 to vector<96x1xf32>
    %100 = arith.cmpf oge, %61, %99 : vector<96x1xf32>
    %101 = arith.andi %100, %98 : vector<96x1xi1>
    %cst_25 = arith.constant 4.000000e-01 : f32
    %102 = vector.broadcast %cst_25 : f32 to vector<96x1xf32>
    %103 = arith.cmpf olt, %61, %102 : vector<96x1xf32>
    %104 = arith.andi %103, %98 : vector<96x1xi1>
    %105 = arith.extui %101 : vector<96x1xi1> to vector<96x1xi32>
    %106 = arith.sitofp %105 : vector<96x1xi32> to vector<96x1xf32>
    %cst_26 = arith.constant dense<0.000000e+00> : vector<1xf32>
    %107 = vector.multi_reduction <add>, %106, %cst_26 [0] : vector<96x1xf32> to vector<1xf32>
    %108 = vector.shape_cast %107 : vector<1xf32> to vector<1x1xf32>
    %109 = tpu.iota {dimensions = array<i32: 1>} : vector<96x8xi32>
    %110 = arith.sitofp %109 : vector<96x8xi32> to vector<96x8xf32>
    %111 = vector.broadcast %92 : vector<96x1xf32> to vector<96x8xf32>
    %112 = arith.cmpf oeq, %110, %111 : vector<96x8xf32>
    %113 = vector.broadcast %101 : vector<96x1xi1> to vector<96x8xi1>
    %114 = arith.andi %113, %112 : vector<96x8xi1>
    %115 = arith.ori %101, %104 : vector<96x1xi1>
    %cst_27 = arith.constant 1.000000e+00 : f32
    %116 = vector.broadcast %cst_27 : f32 to vector<96x8xf32>
    %117 = arith.subf %116, %6 : vector<96x8xf32>
    %118 = arith.select %114, %6, %117 : vector<96x8xi1>, vector<96x8xf32>
    %cst_28 = arith.constant 1.000000e+00 : f32
    %119 = vector.broadcast %cst_28 : f32 to vector<96x8xf32>
    %120 = arith.subf %119, %118 : vector<96x8xf32>
    %121 = math.sqrt %120 : vector<96x8xf32>
    %122 = arith.mulf %120, %121 : vector<96x8xf32>
    %cst_29 = arith.constant 2.500000e-01 : f32
    %cst_30 = arith.constant 7.500000e-01 : f32
    %123 = vector.broadcast %cst_29 : f32 to vector<96x8xf32>
    %124 = vector.broadcast %cst_30 : f32 to vector<96x8xf32>
    %125 = arith.select %114, %123, %124 : vector<96x8xi1>, vector<96x8xf32>
    %cst_31 = arith.constant 9.99999997E-7 : f32
    %cst_32 = arith.constant 1.000000e+00 : f32
    %126 = vector.broadcast %cst_31 : f32 to vector<96x8xf32>
    %127 = arith.maximumf %126, %118 : vector<96x8xf32>
    %128 = vector.broadcast %cst_32 : f32 to vector<96x8xf32>
    %129 = arith.minimumf %128, %127 : vector<96x8xf32>
    %130 = math.log %129 : vector<96x8xf32>
    %cst_33 = arith.constant 0.000000e+00 : f32
    %131 = vector.broadcast %cst_33 : f32 to vector<96x8xf32>
    %132 = arith.subf %131, %130 : vector<96x8xf32>
    %133 = arith.mulf %125, %122 : vector<96x8xf32>
    %134 = arith.mulf %133, %132 : vector<96x8xf32>
    %cst_34 = arith.constant 0.000000e+00 : f32
    %135 = vector.shape_cast %115 : vector<96x1xi1> to vector<96x1xi1>
    %136 = vector.broadcast %135 : vector<96x1xi1> to vector<96x8xi1>
    %137 = vector.broadcast %cst_34 : f32 to vector<96x8xf32>
    %138 = arith.select %136, %134, %137 : vector<96x8xi1>, vector<96x8xf32>
    %cst_35 = arith.constant dense<0.000000e+00> : vector<96xf32>
    %139 = vector.multi_reduction <add>, %138, %cst_35 [1] : vector<96x8xf32> to vector<96xf32>
    %140 = vector.shape_cast %139 : vector<96xf32> to vector<96x1xf32>
    %cst_36 = arith.constant dense<0.000000e+00> : vector<1xf32>
    %141 = vector.multi_reduction <add>, %140, %cst_36 [0] : vector<96x1xf32> to vector<1xf32>
    %142 = vector.shape_cast %141 : vector<1xf32> to vector<1x1xf32>
    %143 = arith.subf %84, %76 : vector<96x1xf32>
    %144 = arith.subf %88, %80 : vector<96x1xf32>
    %cst_37 = arith.constant 5.000000e-01 : f32
    %145 = vector.broadcast %cst_37 : f32 to vector<96x1xf32>
    %146 = arith.mulf %145, %143 : vector<96x1xf32>
    %147 = arith.addf %76, %146 : vector<96x1xf32>
    %cst_38 = arith.constant 5.000000e-01 : f32
    %148 = vector.broadcast %cst_38 : f32 to vector<96x1xf32>
    %149 = arith.mulf %148, %144 : vector<96x1xf32>
    %150 = arith.addf %80, %149 : vector<96x1xf32>
    %cst_39 = arith.constant 1.000000e+00 : f32
    %151 = vector.broadcast %cst_39 : f32 to vector<96x1xf32>
    %152 = arith.maximumf %143, %151 : vector<96x1xf32>
    %cst_40 = arith.constant 1.000000e+00 : f32
    %153 = vector.broadcast %cst_40 : f32 to vector<96x1xf32>
    %154 = arith.maximumf %144, %153 : vector<96x1xf32>
    %155 = arith.subf %147, %20 : vector<96x1xf32>
    %156 = arith.divf %155, %18 : vector<96x1xf32>
    %157 = arith.subf %150, %21 : vector<96x1xf32>
    %158 = arith.divf %157, %19 : vector<96x1xf32>
    %159 = arith.divf %152, %18 : vector<96x1xf32>
    %160 = math.log %159 : vector<96x1xf32>
    %161 = arith.divf %154, %19 : vector<96x1xf32>
    %162 = math.log %161 : vector<96x1xf32>
    %163 = vector.extract_strided_slice %8 {offsets = [0, 0], sizes = [96, 1], strides = [1, 1]} : vector<96x4xf32> to vector<96x1xf32>
    %164 = arith.subf %156, %163 : vector<96x1xf32>
    %165 = math.absf %164 : vector<96x1xf32>
    %cst_41 = arith.constant 0.111111112 : f32
    %166 = vector.broadcast %cst_41 : f32 to vector<96x1xf32>
    %167 = arith.cmpf ole, %165, %166 : vector<96x1xf32>
    %cst_42 = arith.constant 4.500000e+00 : f32
    %168 = vector.broadcast %cst_42 : f32 to vector<96x1xf32>
    %169 = arith.mulf %168, %165 : vector<96x1xf32>
    %170 = arith.mulf %169, %165 : vector<96x1xf32>
    %cst_43 = arith.constant 0.055555556 : f32
    %171 = vector.broadcast %cst_43 : f32 to vector<96x1xf32>
    %172 = arith.subf %165, %171 : vector<96x1xf32>
    %173 = arith.select %167, %170, %172 : vector<96x1xi1>, vector<96x1xf32>
    %174 = vector.extract_strided_slice %8 {offsets = [0, 1], sizes = [96, 1], strides = [1, 1]} : vector<96x4xf32> to vector<96x1xf32>
    %175 = arith.subf %158, %174 : vector<96x1xf32>
    %176 = math.absf %175 : vector<96x1xf32>
    %cst_44 = arith.constant 0.111111112 : f32
    %177 = vector.broadcast %cst_44 : f32 to vector<96x1xf32>
    %178 = arith.cmpf ole, %176, %177 : vector<96x1xf32>
    %cst_45 = arith.constant 4.500000e+00 : f32
    %179 = vector.broadcast %cst_45 : f32 to vector<96x1xf32>
    %180 = arith.mulf %179, %176 : vector<96x1xf32>
    %181 = arith.mulf %180, %176 : vector<96x1xf32>
    %cst_46 = arith.constant 0.055555556 : f32
    %182 = vector.broadcast %cst_46 : f32 to vector<96x1xf32>
    %183 = arith.subf %176, %182 : vector<96x1xf32>
    %184 = arith.select %178, %181, %183 : vector<96x1xi1>, vector<96x1xf32>
    %185 = arith.addf %173, %184 : vector<96x1xf32>
    %186 = vector.extract_strided_slice %8 {offsets = [0, 2], sizes = [96, 1], strides = [1, 1]} : vector<96x4xf32> to vector<96x1xf32>
    %187 = arith.subf %160, %186 : vector<96x1xf32>
    %188 = math.absf %187 : vector<96x1xf32>
    %cst_47 = arith.constant 0.111111112 : f32
    %189 = vector.broadcast %cst_47 : f32 to vector<96x1xf32>
    %190 = arith.cmpf ole, %188, %189 : vector<96x1xf32>
    %cst_48 = arith.constant 4.500000e+00 : f32
    %191 = vector.broadcast %cst_48 : f32 to vector<96x1xf32>
    %192 = arith.mulf %191, %188 : vector<96x1xf32>
    %193 = arith.mulf %192, %188 : vector<96x1xf32>
    %cst_49 = arith.constant 0.055555556 : f32
    %194 = vector.broadcast %cst_49 : f32 to vector<96x1xf32>
    %195 = arith.subf %188, %194 : vector<96x1xf32>
    %196 = arith.select %190, %193, %195 : vector<96x1xi1>, vector<96x1xf32>
    %197 = arith.addf %185, %196 : vector<96x1xf32>
    %198 = vector.extract_strided_slice %8 {offsets = [0, 3], sizes = [96, 1], strides = [1, 1]} : vector<96x4xf32> to vector<96x1xf32>
    %199 = arith.subf %162, %198 : vector<96x1xf32>
    %200 = math.absf %199 : vector<96x1xf32>
    %cst_50 = arith.constant 0.111111112 : f32
    %201 = vector.broadcast %cst_50 : f32 to vector<96x1xf32>
    %202 = arith.cmpf ole, %200, %201 : vector<96x1xf32>
    %cst_51 = arith.constant 4.500000e+00 : f32
    %203 = vector.broadcast %cst_51 : f32 to vector<96x1xf32>
    %204 = arith.mulf %203, %200 : vector<96x1xf32>
    %205 = arith.mulf %204, %200 : vector<96x1xf32>
    %cst_52 = arith.constant 0.055555556 : f32
    %206 = vector.broadcast %cst_52 : f32 to vector<96x1xf32>
    %207 = arith.subf %200, %206 : vector<96x1xf32>
    %208 = arith.select %202, %205, %207 : vector<96x1xi1>, vector<96x1xf32>
    %209 = arith.addf %197, %208 : vector<96x1xf32>
    %cst_53 = arith.constant 0.000000e+00 : f32
    %210 = vector.broadcast %cst_53 : f32 to vector<96x1xf32>
    %211 = arith.select %101, %209, %210 : vector<96x1xi1>, vector<96x1xf32>
    %cst_54 = arith.constant dense<0.000000e+00> : vector<1xf32>
    %212 = vector.multi_reduction <add>, %211, %cst_54 [0] : vector<96x1xf32> to vector<1xf32>
    %213 = vector.shape_cast %212 : vector<1xf32> to vector<1x1xf32>
    %c0_55 = arith.constant 0 : index
    %c0_56 = arith.constant 0 : index
    %214 = vector.load %arg10[%c0_55, %c0_56] : memref<1x1xf32, #tpu.memory_space<vmem>>, vector<1x1xf32>
    %215 = arith.addf %214, %142 : vector<1x1xf32>
    %c0_57 = arith.constant 0 : index
    %c0_58 = arith.constant 0 : index
    %216 = vector.load %arg10[%c0_57, %c0_58] : memref<1x1xf32, #tpu.memory_space<vmem>>, vector<1x1xf32>
    tpu.vector_store %arg10[%c0_57, %c0_58], %215 {strides = array<i32>} : memref<1x1xf32, #tpu.memory_space<vmem>>, vector<1x1xf32>,
    %c0_59 = arith.constant 0 : index
    %c0_60 = arith.constant 0 : index
    %217 = vector.load %arg11[%c0_59, %c0_60] : memref<1x1xf32, #tpu.memory_space<vmem>>, vector<1x1xf32>
    %218 = arith.addf %217, %213 : vector<1x1xf32>
    %c0_61 = arith.constant 0 : index
    %c0_62 = arith.constant 0 : index
    %219 = vector.load %arg11[%c0_61, %c0_62] : memref<1x1xf32, #tpu.memory_space<vmem>>, vector<1x1xf32>
    tpu.vector_store %arg11[%c0_61, %c0_62], %218 {strides = array<i32>} : memref<1x1xf32, #tpu.memory_space<vmem>>, vector<1x1xf32>,
    %c0_63 = arith.constant 0 : index
    %c0_64 = arith.constant 0 : index
    %220 = vector.load %arg12[%c0_63, %c0_64] : memref<1x1xf32, #tpu.memory_space<vmem>>, vector<1x1xf32>
    %221 = arith.addf %220, %108 : vector<1x1xf32>
    %c0_65 = arith.constant 0 : index
    %c0_66 = arith.constant 0 : index
    %222 = vector.load %arg12[%c0_65, %c0_66] : memref<1x1xf32, #tpu.memory_space<vmem>>, vector<1x1xf32>
    tpu.vector_store %arg12[%c0_65, %c0_66], %221 {strides = array<i32>} : memref<1x1xf32, #tpu.memory_space<vmem>>, vector<1x1xf32>,
    %c2_i32 = arith.constant 2 : i32
    %223 = arith.cmpi eq, %arg1, %c2_i32 : i32
    %224 = arith.extui %223 : i1 to i32
    %c0_i32_67 = arith.constant 0 : i32
    %225 = arith.cmpi ne, %224, %c0_i32_67 : i32
    scf.if %225 {
      %c0_68 = arith.constant 0 : index
      %c0_69 = arith.constant 0 : index
      %226 = vector.load %arg12[%c0_68, %c0_69] : memref<1x1xf32, #tpu.memory_space<vmem>>, vector<1x1xf32>
      %c0_i32_70 = arith.constant 0 : i32
      %227 = arith.cmpi sgt, %1, %c0_i32_70 : i32
      %c0_71 = arith.constant 0 : index
      %c0_72 = arith.constant 0 : index
      %228 = vector.load %arg10[%c0_71, %c0_72] : memref<1x1xf32, #tpu.memory_space<vmem>>, vector<1x1xf32>
      %cst_73 = arith.constant 1.000000e+00 : f32
      %229 = vector.broadcast %cst_73 : f32 to vector<1x1xf32>
      %230 = arith.maximumf %226, %229 : vector<1x1xf32>
      %231 = arith.divf %228, %230 : vector<1x1xf32>
      %cst_74 = arith.constant 0.000000e+00 : f32
      %232 = vector.broadcast %cst_74 : f32 to vector<1x1xf32>
      %233 = arith.select %227, %231, %232 : vector<1x1xf32>
      %cst_75 = arith.constant 0.000000e+00 : f32
      %234 = vector.broadcast %cst_75 : f32 to vector<1x1xf32>
      %235 = arith.cmpf ogt, %226, %234 : vector<1x1xf32>
      %c0_76 = arith.constant 0 : index
      %c0_77 = arith.constant 0 : index
      %236 = vector.load %arg11[%c0_76, %c0_77] : memref<1x1xf32, #tpu.memory_space<vmem>>, vector<1x1xf32>
      %cst_78 = arith.constant 4.000000e+00 : f32
      %237 = vector.broadcast %cst_78 : f32 to vector<1x1xf32>
      %238 = arith.mulf %226, %237 : vector<1x1xf32>
      %239 = arith.divf %236, %238 : vector<1x1xf32>
      %cst_79 = arith.constant 0.000000e+00 : f32
      %240 = vector.broadcast %cst_79 : f32 to vector<1x1xf32>
      %241 = arith.select %235, %239, %240 : vector<1x1xi1>, vector<1x1xf32>
      %242 = vector.shape_cast %233 : vector<1x1xf32> to vector<1x1x1xf32>
      %c0_80 = arith.constant 0 : index
      %c0_81 = arith.constant 0 : index
      %c0_82 = arith.constant 0 : index
      %243 = vector.load %arg8[%c0_80, %c0_81, %c0_82] : memref<1x1x1xf32, #tpu.memory_space<vmem>>, vector<1x1x1xf32>
      tpu.vector_store %arg8[%c0_80, %c0_81, %c0_82], %242 {strides = array<i32>} : memref<1x1x1xf32, #tpu.memory_space<vmem>>, vector<1x1x1xf32>,
      %244 = vector.shape_cast %241 : vector<1x1xf32> to vector<1x1x1xf32>
      %c0_83 = arith.constant 0 : index
      %c0_84 = arith.constant 0 : index
      %c0_85 = arith.constant 0 : index
      %245 = vector.load %arg9[%c0_83, %c0_84, %c0_85] : memref<1x1x1xf32, #tpu.memory_space<vmem>>, vector<1x1x1xf32>
      tpu.vector_store %arg9[%c0_83, %c0_84, %c0_85], %244 {strides = array<i32>} : memref<1x1x1xf32, #tpu.memory_space<vmem>>, vector<1x1x1xf32>,
    } else {
    }
    return
  }
  func.func @transform_0(%arg0: i32, %arg1: i32, %arg2: memref<2xi32, #tpu.memory_space<smem>>) -> (i32, i32, i32) {
    %c0_i32 = arith.constant 0 : i32
    %c0_i32_0 = arith.constant 0 : i32
    return %arg0, %arg1, %c0_i32 : i32, i32, i32
  }
  func.func @transform_1(%arg0: i32, %arg1: i32, %arg2: memref<2xi32, #tpu.memory_space<smem>>) -> (i32, i32, i32) {
    %c0_i32 = arith.constant 0 : i32
    %c0_i32_0 = arith.constant 0 : i32
    return %arg0, %arg1, %c0_i32 : i32, i32, i32
  }
  func.func @transform_2(%arg0: i32, %arg1: i32, %arg2: memref<2xi32, #tpu.memory_space<smem>>) -> (i32, i32) {
    %c0_i32 = arith.constant 0 : i32
    %c0_i32_0 = arith.constant 0 : i32
    return %arg1, %c0_i32 : i32, i32
  }
  func.func @transform_3(%arg0: i32, %arg1: i32, %arg2: memref<2xi32, #tpu.memory_space<smem>>) -> (i32, i32, i32) {
    %c0_i32 = arith.constant 0 : i32
    %c0_i32_0 = arith.constant 0 : i32
    %c0_i32_1 = arith.constant 0 : i32
    return %arg0, %c0_i32, %c0_i32_0 : i32, i32, i32
  }
  func.func @transform_4(%arg0: i32, %arg1: i32, %arg2: memref<2xi32, #tpu.memory_space<smem>>) -> (i32, i32, i32) {
    %c0_i32 = arith.constant 0 : i32
    %c0_i32_0 = arith.constant 0 : i32
    %c0_i32_1 = arith.constant 0 : i32
    return %arg0, %c0_i32, %c0_i32_0 : i32, i32, i32
  }
  func.func @transform_5(%arg0: i32, %arg1: i32, %arg2: memref<2xi32, #tpu.memory_space<smem>>) -> (i32, i32, i32) {
    %c0_i32 = arith.constant 0 : i32
    %c0_i32_0 = arith.constant 0 : i32
    %c0_i32_1 = arith.constant 0 : i32
    return %arg0, %c0_i32, %c0_i32_0 : i32, i32, i32
  }
  func.func @transform_6(%arg0: i32, %arg1: i32, %arg2: memref<2xi32, #tpu.memory_space<smem>>) -> (i32, i32, i32) {
    %c0_i32 = arith.constant 0 : i32
    %c0_i32_0 = arith.constant 0 : i32
    %c0_i32_1 = arith.constant 0 : i32
    return %arg0, %c0_i32, %c0_i32_0 : i32, i32, i32
  }
}

</mosaic_0001>

<bundles_post_ra>
// kernel: focal_loss_pallas.1
= control target key start
LH: loop header
LB: loop body
LE: loop exit
PB: predicated region body
PF: predicated region fallthrough
CT: control target
= control target key end

     0   :  { %s5912_s0 = inlined_call_operand.vmem [shape: s32[2], index: 0, kind: input, shape index: {}]   ;;  %s5913_s1 = inlined_call_operand.vmem [shape: f32[2,288,8], index: 1, kind: input, shape index: {}]   ;;  %s5914_s2 = inlined_call_operand.vmem [shape: f32[2,288,4], index: 2, kind: input, shape index: {}]   ;;  %s5915_s3 = inlined_call_operand.vmem [shape: f32[288,8], index: 3, kind: input, shape index: {}]   ;;  %s5916_s4 = inlined_call_operand.vmem [shape: f32[2,4,8], index: 4, kind: input, shape index: {}]   ;;  %s5917_s5 = inlined_call_operand.vmem [shape: f32[2,1,8], index: 5, kind: input, shape index: {}]   ;;  %s5918_s6 = inlined_call_operand.vmem [shape: f32[2,1,1], index: 6, kind: output, shape index: {0}]   ;;  %s5919_s7 = inlined_call_operand.vmem [shape: f32[2,1,1], index: 7, kind: output, shape index: {1}]  }
   0x1   :  { %s13_s26 = sshll.u32 %s5912_s0, 4  ;;  %s14_s26 = int_to_ptr.vmem [resolvable:$true] %s13_s26 }
   0x2   :  { %s3290_s27 = scalar_lea.vmem %s14_s26, 16  ;;  %p3295_p1 = scmp.lt.s32.totalorder %s14_s26, %s14_s26 }
   0x3   :  { %p3291_p0 = scmp.ne.s32.totalorder %s14_s26, %s3290_s27  ;;  %p3296_p2 = scmp.lt.s32.totalorder %s3290_s27, %s3290_s27 }
   0x5   :  { %p3297_p3 = por %p3296_p2, %p3295_p1 }
   0x7   :  { %p3298_p4 = pnand %p3297_p3, %p3291_p0 }
   0x9   :  { %3301 = shalt.err (!%p3298_p4)  }
   0xa   :  { %s3344_s28 = smov [#allocation6]  }
   0xb   :  { %16 = dma.vmem_to_smem %s14_s26, 16, %s3344_s28, [#allocation5] }
   0xc   :  { %3322 = dma.done.wait [#allocation5], 16 }
   0xd   :  { %3323 = vsyncadd [#allocation5], 4294967280 }
   0xe   :  { %18 = sfence }
   0xf   :  { %s3402_s29 = smov 0   ;;  %s3404_s30 = smov 0  }
  0x10   :  { %s3406_s8 = smov 0   ;;  %s3408_s0 = smov 0  }
  0x11   :  { %s3410_s9 = smov 0  }
  0x12 LB: > { %s33_s10 = sadd.s32 1, %s3334_s8  ;;  %s36_s11 = sadd.s32 1, %s3338_s0  ;;  %s3342_s9 = sphi %s3410_s9, %s24_s9   ;;  %s3338_s0 = sphi %s3408_s0, %s6490_s0   ;;  %s3334_s8 = sphi %s3406_s8, %s6489_s8   ;;  %s3330_s30 = sphi %s3404_s30, %s6488_s30   ;;  %s3326_s29 = sphi %s3402_s29, %s6487_s29  }
  0x13   : > { %p34_p5 = scmp.ge.s32.totalorder %s33_s10, 3  ;;  %p2937_p6 = scmp.ge.s32.totalorder %s3342_s9, 1 }
  0x14   : > { %p286_p7 = scmp.lt.s32.totalorder %s3342_s9, 7 }
  0x15   : > { %s6492_s10 = smov (%p34_p5, %s33_s10), 0  ;;  %s6494_s11 = smov (!%p34_p5, %s36_s11), %s3338_s0 }
  0x16   : > { %6082 = sst [smem:[#allocation8_spill]] %s6492_s10  ;;  %p287_p8 = pnand %p2937_p6, %p286_p7 }
  0x17   : > { %p38_p9 = scmp.ge.s32.totalorder %s6494_s11, 2 }
  0x18   : > { %290 = sbr.rel (%p287_p8) target bundleno = 1294 (0x50e), region = 40 }
  0x19   : > { %s6496_s11 = smov (%p38_p9, %s6494_s11), 0 }
  0x1a   : > { %6083 = sst [smem:[#allocation9_spill]] %s6496_s11 }
  0x1f   : > { %s342_s12 = smul.u32 12, %s3326_s29  ;;  %p343_p10 = scmp.lt.s32.totalorder %s3330_s30, 1 }
  0x20   : > { %s3435_s13 = sld [smem:[#allocation6 + %s3330_s30]]  ;;  %p2942_p12 = scmp.ne.s32.totalorder %s3326_s29, 0 }
  0x21   : > { %s6498_s30 = smov (!%p343_p10, %s3330_s30), 1  ;;  %p345_p11 = scmp.lt.s32.totalorder %s342_s12, 35  ;;  %vm386_vm0 = vcmask (!%p2942_p12), 0   ;;  %v3345_v0 = vmov (!%p2942_p12), 0.0  }
  0x22   : > { %s3019_s14 = smul.u32 36, %s6498_s30  ;;  %s2941_s15 = sshll.u32 %s6498_s30, 2  ;;  %387 = vst.msk [vmem:[#allocation2] sm:$0x1] (!%p2942_p12), %vm386_vm0, %v3345_v0  ;;  %388 = vst.msk [vmem:[#allocation3] sm:$0x1] (!%p2942_p12), %vm386_vm0, %v3345_v0 }
  0x23   : > { %s6500_s12 = smov (!%p345_p11, %s342_s12), 35  ;;  %s3444_s18 = scalar_lea.vmem %s5916_s4, %s2941_s15  ;;  %389 = vst.msk [vmem:[#allocation4] sm:$0x1] (!%p2942_p12), %vm386_vm0, %v3345_v0 }
  0x24   : > { %s374_s21 = scalar_lea.vmem %s5917_s5, %s6498_s30  ;;  %s348_s22 = sadd.s32 %s3019_s14, %s6500_s12 }
  0x25   : > { %s2940_s23 = sshll.u32 %s6500_s12, 3  ;;  %s2938_s24 = sshll.u32 %s348_s22, 3 }
  0x26   : > { %s3453_s27 = scalar_lea.vmem %s5915_s3, %s2940_s23  ;;  %s3458_s10 = scalar_lea.vmem %s5913_s1, %s2938_s24 }
  0x27   : > { %s3463_s17 = scalar_lea.vmem %s5914_s2, %s2938_s24  ;;  %s377_s12 = scalar_lea.vmem %s5918_s6, %s6498_s30 }
  0x28   : > { %s380_s25 = scalar_lea.vmem %s5919_s7, %s6498_s30  ;;  %385 = sbr.rel (%p2942_p12) target bundleno = 47 (0x2f), region = 44 }
  0x2f PF: > { %v3475_v1 = vld [vmem:[%s3453_s27 + $0x10] sm:$0xff]  ;;  %v3478_v2 = vld [vmem:[%s3453_s27] sm:$0xff]  ;;  %s3346_s11 = smov 127   ;;  %v3485_v3 = vld [vmem:[%s3453_s27 + $0x18] sm:$0xff]  ;;  %v3347_v5 = vmov 2   ;;  %v3348_v14 = vmov 0  }
  0x30   : > { %444 = vrot.lane.b32.xlu1 %v3475_v1, %s3346_s11  ;;  %440 = vrot.lane.b32.xlu0 %v3478_v2, %s3346_s11  ;;  %v3488_v4 = vld [vmem:[%s3453_s27 + $0x8] sm:$0xff]  ;;  %v3498_v7 = vld [vmem:[%s3453_s27 + $0x20] sm:$0xff]  ;;  %v3349_v15 = vmov 1   ;;  %v3350_v16 = vmov 3   ;;  %v3351_v17 = vmov 4   ;;  %s3352_s23 = smov 2  }
  0x31   : > { %3076 = vset.pattern.permute.xlu1 %v3347_v5  ;;  %3075 = vset.pattern.permute.xlu0 %v3347_v5  ;;  %v3495_v6 = vld [vmem:[%s3453_s27 + $0x28] sm:$0xff]  ;;  %v3505_v8 = vld [vmem:[%s3453_s27 + $0x38] sm:$0xff]  ;;  %v3508_v9 = vld [vmem:[%s3453_s27 + $0x30] sm:$0xff]  ;;  %vm5934_vm2 = vcmask 64512   ;;  %s1345_s24 = smul.u32 96, %s3326_s29  ;;  %p3016_p13 = scmp.ne.s32.totalorder %s3326_s29, 2 }
  0x32   : > { %v3515_v10 = vld [vmem:[%s3453_s27 + $0x48] sm:$0xff]  ;;  %v3518_v11 = vld [vmem:[%s3453_s27 + $0x40] sm:$0xff]  ;;  %v3525_v12 = vld [vmem:[%s3453_s27 + $0x58] sm:$0xff]  ;;  %p2776_p0 = scmp.gt.s32.totalorder (!%p3016_p13), %s3435_s13, 0 }
  0x33   : > { %6084 = vst [vmem:[#allocation10_spill] sm:$0xff] %v3525_v12  ;;  %v3528_v13 = vld [vmem:[%s3453_s27 + $0x50] sm:$0xff] }
  0x34   : > { %446 = vrot.lane.b32.xlu1 %v3485_v3, %s3346_s11  ;;  %442 = vrot.lane.b32.xlu0 %v3488_v4, %s3346_s11 }
  0x38   : > { %450 = vrot.lane.b32.xlu1 %v3495_v6, %s3346_s11  ;;  %448 = vrot.lane.b32.xlu0 %v3498_v7, %s3346_s11 }
  0x3c   : > { %454 = vrot.lane.b32.xlu1 %v3505_v8, %s3346_s11  ;;  %452 = vrot.lane.b32.xlu0 %v3508_v9, %s3346_s11 }
  0x40   : > { %458 = vrot.lane.b32.xlu1 %v3515_v10, %s3346_s11  ;;  %456 = vrot.lane.b32.xlu0 %v3518_v11, %s3346_s11 }
  0x44   : > { %462 = vrot.lane.b32.xlu1 %v3525_v12, %s3346_s11  ;;  %460 = vrot.lane.b32.xlu0 %v3528_v13, %s3346_s11 }
  0x48   : > { %501 = vperm.xlu1 %3076, %v3488_v4   ;;  %497 = vperm.xlu0 %3075, %v3478_v2  }
  0x4c   : > { %505 = vperm.xlu1 %3076, %v3475_v1   ;;  %509 = vperm.xlu0 %3075, %v3485_v3  }
  0x50   : > { %513 = vperm.xlu1 %3076, %v3498_v7   ;;  %517 = vperm.xlu0 %3075, %v3495_v6  }
  0x54   : > { %521 = vperm.xlu1 %3076, %v3508_v9   ;;  %525 = vperm.xlu0 %3075, %v3505_v8  }
  0x58   : > { %529 = vperm.xlu1 %3076, %v3518_v11   ;;  %533 = vperm.xlu0 %3075, %v3515_v10  }
  0x5c   : > { %537 = vperm.xlu1 %3076, %v3528_v13   ;;  %541 = vperm.xlu0 %3075, %v3525_v12  }
  0x60   : > { %3077 = vset.pattern.permute.xlu1 %v3348_v14  ;;  %3078 = vset.pattern.permute.xlu0 %v3348_v14 }
  0x61   : > { %561 = vperm.xlu1 %3077, %v3478_v2   ;;  %565 = vperm.xlu0 %3078, %v3488_v4  }
  0x65   : > { %569 = vperm.xlu1 %3077, %v3475_v1   ;;  %577 = vperm.xlu0 %3078, %v3498_v7  }
  0x69   : > { %573 = vperm.xlu1 %3077, %v3485_v3   ;;  %585 = vperm.xlu0 %3078, %v3508_v9  }
  0x6d   : > { %581 = vperm.xlu1 %3077, %v3495_v6   ;;  %593 = vperm.xlu0 %3078, %v3518_v11  }
  0x71   : > { %589 = vperm.xlu1 %3077, %v3505_v8   ;;  %601 = vperm.xlu0 %3078, %v3528_v13  }
  0x75   : > { %597 = vperm.xlu1 %3077, %v3515_v10   ;;  %3081 = vset.pattern.permute.xlu0 %v3349_v15 }
  0x76   : > { %717 = vperm.xlu0 %3081, %v3488_v4  }
  0x79   : > { %605 = vperm.xlu1 %3077, %v3525_v12  }
  0x7a   : > { %729 = vperm.xlu0 %3081, %v3498_v7  }
  0x7d   : > { %3079 = vset.pattern.permute.xlu1 %v3350_v16 }
  0x7e   : > { %653 = vperm.xlu1 %3079, %v3488_v4   ;;  %745 = vperm.xlu0 %3081, %v3518_v11  }
  0x82   : > { %3080 = vset.pattern.permute.xlu1 %v3349_v15  ;;  %749 = vperm.xlu0 %3081, %v3515_v10  }
  0x83   : > { %713 = vperm.xlu1 %3080, %v3478_v2  }
  0x86   : > { %3092 = vset.pattern.permute.xlu0 %v3350_v16 }
  0x87   : > { %3082 = vset.pattern.permute.xlu1 %v3350_v16  ;;  %649 = vperm.xlu0 %3092, %v3478_v2  }
  0x88   : > { %657 = vperm.xlu1 %3082, %v3475_v1  }
  0x8b   : > { %661 = vperm.xlu0 %3092, %v3485_v3  }
  0x8c   : > { %3083 = vset.pattern.permute.xlu1 %v3349_v15 }
  0x8d   : > { %721 = vperm.xlu1 %3083, %v3475_v1  }
  0x8f   : > { %669 = vperm.xlu0 %3092, %v3495_v6  }
  0x91   : > { %725 = vperm.xlu1 %3083, %v3485_v3  }
  0x93   : > { %673 = vperm.xlu0 %3092, %v3508_v9  }
  0x95   : > { %3084 = vset.pattern.permute.xlu1 %v3350_v16 }
  0x96   : > { %665 = vperm.xlu1 %3084, %v3498_v7  }
  0x97   : > { %689 = vperm.xlu0 %3092, %v3528_v13  }
  0x9a   : > { %3085 = vset.pattern.permute.xlu1 %v3349_v15 }
  0x9b   : > { %733 = vperm.xlu1 %3085, %v3495_v6   ;;  %693 = vperm.xlu0 %3092, %v3525_v12  }
  0x9f   : > { %737 = vperm.xlu1 %3085, %v3508_v9   ;;  %3096 = vset.pattern.permute.xlu0 %v3351_v17 }
  0xa2   : > { %v445_v18 = vpop.permute.xlu1 %444  ;;  %v441_v19 = vpop.permute.xlu0 %440 }
  0xa3   : > { %v476_v20 = vmul.f32 %v441_v19, %v3478_v2  ;;  %3086 = vset.pattern.permute.xlu1 %v3351_v17  ;;  %v478_v27 = vmul.f32 %v445_v18, %v3475_v1  ;;  %v5920_v19 = vlaneseq }
  0xa5   : > { %814 = vperm.xlu1 %3086, %v476_v20   ;;  %v426_v20 = vld [vmem:[%s3444_s18] sm:$0xf]  ;;  %s3353_s18 = smov 6  }
  0xa6   : > { %v447_v21 = vpop.permute.xlu1 %446  ;;  %v443_v22 = vpop.permute.xlu0 %442 }
  0xa7   : > { %v479_v23 = vmul.f32 %v447_v21, %v3485_v3  ;;  %v477_v24 = vmul.f32 %v443_v22, %v3488_v4 }
  0xa9   : > { %829 = vperm.xlu0 %3096, %v479_v23   ;;  %819 = vperm.xlu1 %3086, %v477_v24   ;;  %v3680_v23 = vshrl.u32 %v5920_v19, 7  ;;  %v489_v24 = vrot.slane %v426_v20, 6 }
  0xaa   : > { %v449_v25 = vpop.permute.xlu0 %448  ;;  %v451_v26 = vpop.permute.xlu1 %450 }
  0xab   : > { %v480_v28 = vmul.f32 %v449_v25, %v3498_v7  ;;  %v481_v36 = vmul.f32 %v451_v26, %v3495_v6  ;;  %6085 = vst [vmem:[#allocation11_spill] sm:$0xff] %v3680_v23  ;;  %v610_v25 = vsub.s32 0, %v3680_v23  ;;  %v698_v26 = vsub.s32 3, %v3680_v23 }
  0xad   : > { %824 = vperm.xlu1 %3086, %v478_v27   ;;  %834 = vperm.xlu0 %3096, %v480_v28   ;;  %v762_v27 = vsub.s32 1, %v3680_v23  ;;  %v546_v28 = vsub.s32 2, %v3680_v23 }
  0xae   : > { %v455_v29 = vpop.permute.xlu1 %454  ;;  %v453_v30 = vpop.permute.xlu0 %452 }
  0xaf   : > { %v482_v38 = vmul.f32 %v453_v30, %v3508_v9  ;;  %v483_v45 = vmul.f32 %v455_v29, %v3505_v8  ;;  %v491_v30 = vsub.f32 %v426_v20, %v489_v24 }
  0xb1   : > { %3087 = vset.pattern.permute.xlu1 %v3350_v16 }
  0xb2   : > { %677 = vperm.xlu1 %3087, %v3505_v8   ;;  %v459_v31 = vpop.permute.xlu1 %458  ;;  %v457_v32 = vpop.permute.xlu0 %456 }
  0xb3   : > { %v484_v33 = vmul.f32 %v457_v32, %v3518_v11  ;;  %v485_v52 = vmul.f32 %v459_v31, %v3515_v10  ;;  %v3688_v32 = vrot.slane %v426_v20, %v610_v25 }
  0xb5   : > { %854 = vperm.xlu0 %3096, %v484_v33   ;;  %v3690_v33 = vrot.slane %v426_v20, %v698_v26 }
  0xb6   : > { %3088 = vset.pattern.permute.xlu1 %v3349_v15  ;;  %v463_v34 = vpop.permute.xlu1 %462  ;;  %v461_v37 = vpop.permute.xlu0 %460 }
  0xb7   : > { %v487_v35 = vmul.f32 %v463_v34, %v3525_v12  ;;  %741 = vperm.xlu1 %3088, %v3505_v8   ;;  %v486_v53 = vmul.f32 %v461_v37, %v3528_v13  ;;  %v3692_v34 = vrot.slane %v426_v20, %v762_v27  ;;  %v493_v37 = vrot.slane %v491_v30, 1 }
  0xb9   : > { %869 = vperm.xlu0 %3096, %v487_v35   ;;  %v3694_v35 = vrot.slane %v426_v20, %v546_v28  ;;  %v495_v19 = vmul.f32 %v493_v37, %v491_v30 }
  0xbb   : > { %3089 = vset.pattern.permute.xlu1 %v3350_v16 }
  0xbc   : > { %681 = vperm.xlu1 %3089, %v3518_v11  }
  0xbd   : > { %1935 = vrot.lane.b32.xlu0 %v3488_v4, %s3352_s23 }
  0xc0   : > { %3090 = vset.pattern.permute.xlu1 %v3351_v17 }
  0xc1   : > { %839 = vperm.xlu1 %3090, %v481_v36   ;;  %1937 = vrot.lane.b32.xlu0 %v3475_v1, %s3352_s23 }
  0xc5   : > { %3091 = vset.pattern.permute.xlu1 %v3350_v16  ;;  %1941 = vrot.lane.b32.xlu0 %v3498_v7, %s3352_s23 }
  0xc6   : > { %685 = vperm.xlu1 %3091, %v3515_v10  }
  0xc7   : > { %v3610_v39 = vpop.permute.xlu1 %501  ;;  %v3612_v40 = vpop.permute.xlu0 %497 }
  0xca   : > { %3093 = vset.pattern.permute.xlu1 %v3351_v17 }
  0xcb   : > { %v3615_v41 = vpop.permute.xlu1 %505  ;;  %844 = vperm.xlu1 %3093, %v482_v38   ;;  %v3617_v42 = vpop.permute.xlu0 %509 }
  0xcc   : > { %v551_v23 = vmin.f32 %v3617_v42, %v3694_v35 }
  0xcf   : > { %v3619_v43 = vpop.permute.xlu1 %513  ;;  %3094 = vset.pattern.permute.xlu1 %v3349_v15  ;;  %v3622_v44 = vpop.permute.xlu0 %517 }
  0xd0   : > { %753 = vperm.xlu1 %3094, %v3528_v13  }
  0xd3   : > { %v3626_v46 = vpop.permute.xlu1 %521  ;;  %v3628_v47 = vpop.permute.xlu0 %525 }
  0xd4   : > { %3095 = vset.pattern.permute.xlu1 %v3351_v17 }
  0xd5   : > { %849 = vperm.xlu1 %3095, %v483_v45   ;;  %v548_v45 = vmin.f32 %v3612_v40, %v3694_v35 }
  0xd7   : > { %v3631_v48 = vpop.permute.xlu1 %529  ;;  %v3633_v49 = vpop.permute.xlu0 %533 }
  0xd9   : > { %3097 = vset.pattern.permute.xlu1 %v3349_v15 }
  0xda   : > { %757 = vperm.xlu1 %3097, %v3525_v12  }
  0xdb   : > { %v3637_v50 = vpop.permute.xlu1 %537  ;;  %v3639_v51 = vpop.permute.xlu0 %541 }
  0xde   : > { %3098 = vset.pattern.permute.xlu1 %v3351_v17 }
  0xdf   : > { %859 = vperm.xlu1 %3098, %v485_v52  }
  0xe0   : > { %v562_v54 = vpop.permute.xlu1 %561  ;;  %v3644_v55 = vpop.permute.xlu0 %565 }
  0xe1   : > { %v612_v52 = vmax.f32 %v562_v54, %v3688_v32  ;;  %v613_v40 = vmax.f32 %v3644_v55, %v3688_v32  ;;  %v3723_v55 = vrot.slane %v495_v19, %v546_v28 }
  0xe3   : > { %864 = vperm.xlu1 %3098, %v486_v53  }
  0xe4   : > { %v3646_v56 = vpop.permute.xlu1 %569  ;;  %v3648_v57 = vpop.permute.xlu0 %577 }
  0xe7   : > { %1933 = vrot.lane.b32.xlu1 %v3478_v2, %s3352_s23 }
  0xe8   : > { %v3652_v58 = vpop.permute.xlu1 %573  ;;  %v3654_v59 = vpop.permute.xlu0 %585 }
  0xe9   : > { %v615_v54 = vmax.f32 %v3652_v58, %v3688_v32  ;;  %v614_v58 = vmax.f32 %v3646_v56, %v3688_v32 }
  0xeb   : > { %1939 = vrot.lane.b32.xlu1 %v3485_v3, %s3352_s23 }
  0xec   : > { %v3658_v60 = vpop.permute.xlu1 %581  ;;  %v3660_v61 = vpop.permute.xlu0 %593 }
  0xf0   : > { %v3662_v62 = vpop.permute.xlu1 %589  ;;  %v3664_v63 = vpop.permute.xlu0 %601 }
  0xf4   : > { %v3666_v0 = vpop.permute.xlu1 %597 }
  0xf5   : > { %v718_v1 = vpop.permute.xlu0 %717 }
  0xf6   : > { %v765_v24 = vmax.f32 %v718_v1, %v3692_v34  ;;  %v624_v1 = vsub.f32 %v548_v45, %v612_v52  ;;  %v627_v45 = vsub.f32 %v551_v23, %v615_v54 }
  0xf8   : > { %v3668_v2 = vpop.permute.xlu1 %605 }
  0xf9   : > { %v3670_v4 = vpop.permute.xlu0 %729 }
  0xfa   : > { %v768_v30 = vmax.f32 %v3670_v4, %v3692_v34  ;;  %v550_v4 = vmin.f32 %v3615_v41, %v3694_v35 }
  0xfd   : > { %v3672_v5 = vpop.permute.xlu0 %745  ;;  %v654_v7 = vpop.permute.xlu1 %653 }
  0xfe   : > { %v701_v25 = vmin.f32 %v654_v7, %v3690_v33  ;;  %v549_v7 = vmin.f32 %v3610_v39, %v3694_v35 }
 0x100   : > { %v625_v37 = vsub.f32 %v549_v7, %v613_v40 }
 0x101   : > { %v3674_v3 = vpop.permute.xlu0 %749 }
 0x102   : > { %v714_v14 = vpop.permute.xlu1 %713 }
 0x103   : > { %v764_v53 = vmax.f32 %v714_v14, %v3692_v34  ;;  %v777_v14 = vsub.f32 %v701_v25, %v765_v24  ;;  %v552_v25 = vmin.f32 %v3619_v43, %v3694_v35 }
 0x105   : > { %v789_v24 = vmax.f32 %v777_v14, 0.0 }
 0x106   : > { %v650_v16 = vpop.permute.xlu0 %649 }
 0x107   : > { %v658_v15 = vpop.permute.xlu1 %657  ;;  %v700_v36 = vmin.f32 %v650_v16, %v3690_v33 }
 0x108   : > { %v702_v39 = vmin.f32 %v658_v15, %v3690_v33 }
 0x109   : > { %v776_v16 = vsub.f32 %v700_v36, %v764_v53  ;;  %v616_v53 = vmax.f32 %v3648_v57, %v3688_v32 }
 0x10a   : > { %v662_v18 = vpop.permute.xlu0 %661 }
 0x10b   : > { %v703_v20 = vmin.f32 %v662_v18, %v3690_v33  ;;  %v788_v42 = vmax.f32 %v776_v16, 0.0  ;;  %v639_v16 = vmax.f32 %v627_v45, 0.0  ;;  %v628_v40 = vsub.f32 %v552_v25, %v616_v53 }
 0x10c   : > { %v722_v17 = vpop.permute.xlu1 %721  ;;  %v927_v25 = vstv %s3435_s13 }
 0x10d   : > { %v766_v18 = vmax.f32 %v722_v17, %v3692_v34  ;;  %v636_v17 = vmax.f32 %v624_v1, 0.0 }
 0x10e   : > { %v3677_v22 = vpop.permute.xlu0 %669 }
 0x10f   : > { %v800_v23 = vmul.f32 %v788_v42, %v636_v17  ;;  %v640_v42 = vmax.f32 %v628_v40, 0.0 }
 0x110   : > { %v726_v21 = vpop.permute.xlu1 %725 }
 0x111   : > { %v767_v26 = vmax.f32 %v726_v21, %v3692_v34 }
 0x112   : > { %v3686_v31 = vpop.permute.xlu0 %673 }
 0x113   : > { %v779_v21 = vsub.f32 %v703_v20, %v767_v26  ;;  %v637_v26 = vmax.f32 %v625_v37, 0.0  ;;  %v626_v20 = vsub.f32 %v550_v4, %v614_v58 }
 0x115   : > { %v666_v29 = vpop.permute.xlu1 %665  ;;  %v791_v19 = vmax.f32 %v779_v21, 0.0  ;;  %v801_v7 = vmul.f32 %v789_v24, %v637_v26 }
 0x116   : > { %v3707_v27 = vpop.permute.xlu0 %689  ;;  %v704_v36 = vmin.f32 %v666_v29, %v3690_v33  ;;  %v778_v29 = vsub.f32 %v702_v39, %v766_v18 }
 0x117   : > { %v803_v41 = vmul.f32 %v791_v19, %v639_v16  ;;  %v6086_v19 = vlaneseq  ;;  %v705_v16 = vmin.f32 %v3677_v22, %v3690_v33 }
 0x118   : > { %v780_v56 = vsub.f32 %v704_v36, %v768_v30  ;;  %v790_v57 = vmax.f32 %v778_v29, 0.0  ;;  %v638_v30 = vmax.f32 %v626_v20, 0.0 }
 0x11a   : > { %v3697_v38 = vpop.permute.xlu1 %733  ;;  %v3728_v52 = vpop.permute.xlu0 %693  ;;  %v792_v18 = vmax.f32 %v780_v56, 0.0  ;;  %v802_v58 = vmul.f32 %v790_v57, %v638_v30  ;;  %v620_v30 = vmax.f32 %v3660_v61, %v3688_v32  ;;  %v772_v61 = vmax.f32 %v3672_v5, %v3692_v34 }
 0x11b   : > { %v769_v40 = vmax.f32 %v3697_v38, %v3692_v34  ;;  %v706_v5 = vmin.f32 %v3686_v31, %v3690_v33  ;;  %v554_v31 = vmin.f32 %v3626_v46, %v3694_v35 }
 0x11c   : > { %v804_v53 = vmul.f32 %v792_v18, %v640_v42 }
 0x11d   : > { %v781_v38 = vsub.f32 %v705_v16, %v769_v40  ;;  %v618_v40 = vmax.f32 %v3654_v59, %v3688_v32 }
 0x11e   : > { %v3718_v12 = vpop.permute.xlu1 %737 }
 0x124   : > { %v815_v28 = vpop.permute.xlu1 %814 }
 0x125   : > { %v876_v15 = vadd.f32 %v3723_v55, %v815_v28  ;;  %v3742_v28 = vand.u32 127, %v6086_v19 }
 0x127   : > { %v888_v54 = vsub.f32 %v876_v15, %v800_v23  ;;  %vm3748_vm1 = vcmp.lt.s32.totalorder %v3742_v28, %v927_v25 }
 0x128   : > { %v820_v1 = vpop.permute.xlu1 %819  ;;  %v830_v14 = vpop.permute.xlu0 %829 }
 0x129   : > { %3099 = vrcp.f32 %v888_v54  ;;  %v877_v21 = vadd.f32 %v3723_v55, %v820_v1  ;;  %v879_v43 = vadd.f32 %v3723_v55, %v830_v14  ;;  %v553_v14 = vmin.f32 %v3622_v44, %v3694_v35 }
 0x12a   : > { %v556_v44 = vmin.f32 %v3631_v48, %v3694_v35 }
 0x12b   : > { %v889_v36 = vsub.f32 %v877_v21, %v801_v7  ;;  %v891_v37 = vsub.f32 %v879_v43, %v803_v41 }
 0x12c   : > { %v825_v45 = vpop.permute.xlu1 %824  ;;  %v835_v39 = vpop.permute.xlu0 %834 }
 0x12d   : > { %3101 = vrcp.f32 %v889_v36  ;;  %v878_v17 = vadd.f32 %v3723_v55, %v825_v45  ;;  %v880_v4 = vadd.f32 %v3723_v55, %v835_v39 }
 0x12e   : > { %3103 = vrcp.f32 %v891_v37 }
 0x12f   : > { %v890_v24 = vsub.f32 %v878_v17, %v802_v58  ;;  %v892_v29 = vsub.f32 %v880_v4, %v804_v53  ;;  %v793_v4 = vmax.f32 %v781_v38, 0.0 }
 0x131   : > { %3105 = vrcp.f32 %v890_v24  ;;  %v3745_v56 = vpop.permute.xlu1 %677 }
 0x132   : > { %3107 = vrcp.f32 %v892_v29  ;;  %v632_v29 = vsub.f32 %v556_v44, %v620_v30 }
 0x133   : > { %v3100_v15 = vpop.eup %3099 }
 0x134   : > { %v901_v20 = vmul.f32 %v3100_v15, %v800_v23  ;;  %v617_v23 = vmax.f32 %v3658_v60, %v3688_v32  ;;  %v855_v38 = vpop.permute.xlu0 %854 }
 0x135   : > { %v884_v30 = vadd.f32 %v3723_v55, %v855_v38 }
 0x136   : > { %v3756_v54 = vpop.permute.xlu1 %741  ;;  %v3760_v57 = vsel %vm3748_vm1, %v901_v20, -1.0  ;;  %v629_v60 = vsub.f32 %v553_v14, %v617_v23  ;;  %v770_v20 = vmax.f32 %v3718_v12, %v3692_v34  ;;  %v644_v12 = vmax.f32 %v632_v29, 0.0 }
 0x137   : > { %v3102_v1 = vpop.eup %3101  ;;  %v942_v18 = vsel %vm5934_vm2, %v3760_v57, -inf }
 0x138   : > { %v3104_v22 = vpop.eup %3103  ;;  %943 = vmax.xlane.f32.xlu1 %v942_v18  ;;  %v903_v21 = vmul.f32 %v3102_v1, %v801_v7  ;;  %v641_v15 = vmax.f32 %v629_v60, 0.0  ;;  %v782_v18 = vsub.f32 %v706_v5, %v770_v20 }
 0x139   : > { %v907_v43 = vmul.f32 %v3104_v22, %v803_v41 }
 0x13a   : > { %v3772_v42 = vsel %vm3748_vm1, %v903_v21, -1.0  ;;  %v805_v14 = vmul.f32 %v793_v4, %v641_v15  ;;  %v794_v44 = vmax.f32 %v782_v18, 0.0 }
 0x13b   : > { %v3106_v36 = vpop.eup %3105  ;;  %v682_v37 = vpop.permute.xlu1 %681  ;;  %v945_v45 = vsel %vm5934_vm2, %v3772_v42, -inf  ;;  %v3780_v7 = vsel %vm3748_vm1, %v907_v43, -1.0  ;;  %v630_v43 = vsub.f32 %v554_v31, %v618_v40  ;;  %v621_v40 = vmax.f32 %v3666_v0, %v3688_v32 }
 0x13c   : > { %v3108_v41 = vpop.eup %3107  ;;  %v708_v39 = vmin.f32 %v682_v37, %v3690_v33  ;;  %946 = vmax.xlane.f32.xlu0 %v945_v45  ;;  %v951_v17 = vsel %vm5934_vm2, %v3780_v7, -inf  ;;  %v905_v48 = vmul.f32 %v3106_v36, %v802_v58  ;;  %v771_v37 = vmax.f32 %v3756_v54, %v3692_v34 }
 0x13d   : > { %952 = vmax.xlane.f32.xlu1 %v951_v17  ;;  %v909_v24 = vmul.f32 %v3108_v41, %v804_v53  ;;  %v642_v60 = vmax.f32 %v630_v43, 0.0  ;;  %v555_v45 = vmin.f32 %v3628_v47, %v3694_v35  ;;  %v710_v43 = vmin.f32 %v3707_v27, %v3690_v33 }
 0x13e   : > { %v784_v19 = vsub.f32 %v708_v39, %v772_v61  ;;  %v3789_v25 = vsel %vm3748_vm1, %v905_v48, -1.0  ;;  %v619_v61 = vmax.f32 %v3662_v62, %v3688_v32  ;;  %v707_v39 = vmin.f32 %v3745_v56, %v3690_v33 }
 0x13f   : > { %v948_v16 = vsel %vm5934_vm2, %v3789_v25, -inf  ;;  %v3799_v53 = vsel %vm3748_vm1, %v909_v24, -1.0  ;;  %v806_v17 = vmul.f32 %v794_v44, %v642_v60 }
 0x140   : > { %v840_v58 = vpop.permute.xlu1 %839  ;;  %949 = vmax.xlane.f32.xlu0 %v948_v16  ;;  %v796_v1 = vmax.f32 %v784_v19, 0.0  ;;  %v954_v21 = vsel %vm5934_vm2, %v3799_v53, -inf  ;;  %v783_v4 = vsub.f32 %v707_v39, %v771_v37  ;;  %v631_v19 = vsub.f32 %v555_v45, %v619_v61 }
 0x141   : > { %v881_v23 = vadd.f32 %v3723_v55, %v840_v58  ;;  %v557_v16 = vmin.f32 %v3633_v49, %v3694_v35  ;;  %v622_v49 = vmax.f32 %v3664_v63, %v3688_v32 }
 0x142   : > { %v808_v36 = vmul.f32 %v796_v1, %v644_v12  ;;  %v795_v5 = vmax.f32 %v783_v4, 0.0  ;;  %v643_v62 = vmax.f32 %v631_v19, 0.0  ;;  %v773_v1 = vmax.f32 %v3674_v3, %v3692_v34 }
 0x143   : > { %v893_v22 = vsub.f32 %v881_v23, %v805_v14  ;;  %v633_v38 = vsub.f32 %v557_v16, %v621_v40 }
 0x144   : > { %955 = vmax.xlane.f32.xlu0 %v954_v21  ;;  %v896_v46 = vsub.f32 %v884_v30, %v808_v36 }
 0x145   : > { %3109 = vrcp.f32 %v893_v22  ;;  %v686_v59 = vpop.permute.xlu1 %685  ;;  %v645_v45 = vmax.f32 %v633_v38, 0.0 }
 0x146   : > { %3111 = vrcp.f32 %v896_v46  ;;  %v709_v20 = vmin.f32 %v686_v59, %v3690_v33  ;;  %v558_v59 = vmin.f32 %v3637_v50, %v3694_v35 }
 0x148   : > { %v785_v12 = vsub.f32 %v709_v20, %v773_v1  ;;  %v634_v46 = vsub.f32 %v558_v59, %v622_v49 }
 0x14a   : > { %v845_v41 = vpop.permute.xlu1 %844  ;;  %v797_v44 = vmax.f32 %v785_v12, 0.0  ;;  %v646_v39 = vmax.f32 %v634_v46, 0.0  ;;  %v410_v46 = vld [vmem:[%s3463_s17 + $0x40] sm:$0xff] }
 0x14b   : > { %v882_v48 = vadd.f32 %v3723_v55, %v845_v41 }
 0x14c   : > { %v809_v61 = vmul.f32 %v797_v44, %v645_v45  ;;  %v408_v44 = vld [vmem:[%s3463_s17 + $0x30] sm:$0xff]  ;;  %v411_v45 = vld [vmem:[%s3463_s17 + $0x48] sm:$0xff] }
 0x14d   : > { %v894_v24 = vsub.f32 %v882_v48, %v806_v17 }
 0x14f   : > { %v3110_v29 = vpop.eup %3109  ;;  %3113 = vrcp.f32 %v894_v24  ;;  %v754_v54 = vpop.permute.xlu1 %753 }
 0x150   : > { %v911_v15 = vmul.f32 %v3110_v29, %v805_v14  ;;  %v807_v14 = vmul.f32 %v795_v5, %v643_v62  ;;  %v3112_v31 = vpop.eup %3111  ;;  %v774_v18 = vmax.f32 %v754_v54, %v3692_v34 }
 0x151   : > { %v917_v3 = vmul.f32 %v3112_v31, %v808_v36  ;;  %v402_v31 = vld [vmem:[%s3463_s17] sm:$0xff] }
 0x152   : > { %v3820_v47 = vsel %vm3748_vm1, %v911_v15, -1.0  ;;  %v786_v60 = vsub.f32 %v710_v43, %v774_v18  ;;  %v559_v18 = vmin.f32 %v3639_v51, %v3694_v35  ;;  %v870_v51 = vpop.permute.xlu0 %869 }
 0x153   : > { %v957_v56 = vsel %vm5934_vm2, %v3820_v47, -inf  ;;  %v3847_v27 = vsel %vm3748_vm1, %v917_v3, -1.0  ;;  %v407_v3 = vld [vmem:[%s3463_s17 + $0x28] sm:$0xff] }
 0x154   : > { %v850_v58 = vpop.permute.xlu1 %849  ;;  %958 = vmax.xlane.f32.xlu1 %v957_v56  ;;  %v798_v36 = vmax.f32 %v786_v60, 0.0  ;;  %v966_v48 = vsel %vm5934_vm2, %v3847_v27, -inf }
 0x155   : > { %v883_v23 = vadd.f32 %v3723_v55, %v850_v58 }
 0x156   : > { %v810_v29 = vmul.f32 %v798_v36, %v646_v39  ;;  %v3919_v36 = vpop.permute.xlu0 %1935 }
 0x157   : > { %v895_v22 = vsub.f32 %v883_v23, %v807_v14 }
 0x159   : > { %v3114_v21 = vpop.eup %3113  ;;  %3115 = vrcp.f32 %v895_v22  ;;  %v758_v0 = vpop.permute.xlu1 %757  ;;  %v623_v22 = vmax.f32 %v3668_v2, %v3688_v32  ;;  %v403_v2 = vld [vmem:[%s3463_s17 + $0x8] sm:$0xff] }
 0x15a   : > { %v913_v30 = vmul.f32 %v3114_v21, %v806_v17  ;;  %v775_v12 = vmax.f32 %v758_v0, %v3692_v34  ;;  %v711_v21 = vmin.f32 %v3728_v52, %v3690_v33  ;;  %v887_v52 = vadd.f32 %v3723_v55, %v870_v51 }
 0x15c   : > { %v3841_v37 = vsel %vm3748_vm1, %v913_v30, -1.0  ;;  %v787_v49 = vsub.f32 %v711_v21, %v775_v12 }
 0x15d   : > { %v960_v63 = vsel %vm5934_vm2, %v3841_v37, -inf }
 0x15e   : > { %v860_v41 = vpop.permute.xlu1 %859  ;;  %961 = vmax.xlane.f32.xlu0 %v960_v63  ;;  %v799_v38 = vmax.f32 %v787_v49, 0.0  ;;  %v412_v63 = vld [vmem:[%s3463_s17 + $0x50] sm:$0xff] }
 0x15f   : > { %v885_v50 = vadd.f32 %v3723_v55, %v860_v41  ;;  %v413_v41 = vld [vmem:[%s3463_s17 + $0x58] sm:$0xff] }
 0x161   : > { %v897_v17 = vsub.f32 %v885_v50, %v809_v61  ;;  %v3927_v50 = vpop.permute.xlu0 %1937 }
 0x162   : > { %v865_v4 = vpop.permute.xlu1 %864  ;;  %967 = vmax.xlane.f32.xlu0 %v966_v48  ;;  %v6089_v48 = vld [vmem:[#allocation10_spill] sm:$0xff] }
 0x163   : > { %v3116_v24 = vpop.eup %3115  ;;  %3117 = vrcp.f32 %v897_v17  ;;  %v886_v19 = vadd.f32 %v3723_v55, %v865_v4 }
 0x164   : > { %v915_v54 = vmul.f32 %v3116_v24, %v807_v14 }
 0x165   : > { %v898_v15 = vsub.f32 %v886_v19, %v810_v29  ;;  %v3932_v17 = vpop.permute.xlu0 %1941  ;;  %v3950_v19 = vcvt.s32.f32 %v3742_v28 }
 0x166   : > { %v3855_v5 = vsel %vm3748_vm1, %v915_v54, -1.0  ;;  %v3930_v39 = vpop.permute.xlu1 %1933 }
 0x167   : > { %3119 = vrcp.f32 %v898_v15  ;;  %v963_v62 = vsel %vm5934_vm2, %v3855_v5, -inf  ;;  %6093 = vst [vmem:[#allocation14_spill] sm:$0xff] %v3950_v19 }
 0x168   : > { %964 = vmax.xlane.f32.xlu1 %v963_v62 }
 0x16a   : > { %v3937_v4 = vpop.permute.xlu1 %1939 }
 0x16d   : > { %v3118_v20 = vpop.eup %3117 }
 0x16e   : > { %v919_v56 = vmul.f32 %v3118_v20, %v809_v61  ;;  %v406_v61 = vld [vmem:[%s3463_s17 + $0x20] sm:$0xff] }
 0x170   : > { %v3861_v16 = vsel %vm3748_vm1, %v919_v56, -1.0 }
 0x171   : > { %v3120_v58 = vpop.eup %3119  ;;  %v969_v40 = vsel %vm5934_vm2, %v3861_v16, -inf }
 0x172   : > { %970 = vmax.xlane.f32.xlu1 %v969_v40  ;;  %v921_v1 = vmul.f32 %v3120_v58, %v810_v29 }
 0x174   : > { %v3867_v14 = vsel %vm3748_vm1, %v921_v1, -1.0 }
 0x175   : > { %v972_v23 = vsel %vm5934_vm2, %v3867_v14, -inf }
 0x176   : > { %973 = vmax.xlane.f32.xlu0 %v972_v23 }
 0x183   : > { %1945 = vrot.lane.b32.xlu1 %v3508_v9, %s3352_s23  ;;  %v635_v9 = vsub.f32 %v559_v18, %v623_v22 }
 0x185   : > { %v647_v43 = vmax.f32 %v635_v9, 0.0 }
 0x187   : > { %2113 = vrot.lane.b32.xlu1 %v402_v31, %s3353_s18  ;;  %v811_v0 = vmul.f32 %v799_v38, %v647_v43 }
 0x189   : > { %v899_v30 = vsub.f32 %v887_v52, %v811_v0 }
 0x18b   : > { %1949 = vrot.lane.b32.xlu1 %v3518_v11, %s3352_s23  ;;  %v404_v11 = vld [vmem:[%s3463_s17 + $0x10] sm:$0xff]  ;;  %3121 = vrcp.f32 %v899_v30 }
 0x18c   : > { %1943 = vrot.lane.b32.xlu0 %v3495_v6, %s3352_s23  ;;  %v405_v6 = vld [vmem:[%s3463_s17 + $0x18] sm:$0xff]  ;;  %3123 = vrcp.f32 %v3930_v39 }
 0x190   : > { %1947 = vrot.lane.b32.xlu0 %v3505_v8, %s3352_s23 }
 0x194   : > { %2115 = vrot.lane.b32.xlu0 %v403_v2, %s3353_s18 }
 0x195   : > { %v3122_v8 = vpop.eup %3121 }
 0x196   : > { %v923_v55 = vmul.f32 %v3122_v8, %v811_v0 }
 0x198   : > { %2117 = vrot.lane.b32.xlu0 %v404_v11, %s3353_s18  ;;  %v3902_v59 = vsel %vm3748_vm1, %v923_v55, -1.0  ;;  %v4050_v55 = vstv %s1345_s24 }
 0x199   : > { %v975_v60 = vsel %vm5934_vm2, %v3902_v59, -inf }
 0x19c   : > { %2379 = vrot.lane.b32.xlu0 %v403_v2, %s3352_s23 }
 0x1a0   : > { %2119 = vrot.lane.b32.xlu0 %v405_v6, %s3353_s18 }
 0x1a4   : > { %1953 = vrot.lane.b32.xlu0 %v3528_v13, %s3352_s23  ;;  %v409_v13 = vld [vmem:[%s3463_s17 + $0x38] sm:$0xff] }
 0x1a8   : > { %2383 = vrot.lane.b32.xlu0 %v405_v6, %s3352_s23  ;;  %v6105_v6 = vld [vmem:[#allocation11_spill] sm:$0xff] }
 0x1a9   : > { %v1334_v8 = vadd.s32 8, %v6105_v6 }
 0x1ac   : > { %2123 = vrot.lane.b32.xlu0 %v407_v3, %s3353_s18 }
 0x1af   : > { %976 = vmax.xlane.f32.xlu1 %v975_v60 }
 0x1b0   : > { %2125 = vrot.lane.b32.xlu0 %v408_v44, %s3353_s18 }
 0x1b4   : > { %2127 = vrot.lane.b32.xlu0 %v409_v13, %s3353_s18 }
 0x1b8   : > { %2129 = vrot.lane.b32.xlu0 %v410_v46, %s3353_s18 }
 0x1bc   : > { %2131 = vrot.lane.b32.xlu0 %v411_v45, %s3353_s18 }
 0x1c0   : > { %2133 = vrot.lane.b32.xlu0 %v412_v63, %s3353_s18  ;;  %2377 = vrot.lane.b32.xlu1 %v402_v31, %s3352_s23 }
 0x1c4   : > { %2135 = vrot.lane.b32.xlu0 %v413_v41, %s3353_s18  ;;  %1951 = vrot.lane.b32.xlu1 %v3515_v10, %s3352_s23 }
 0x1c5   : > { %v3942_v24 = vpop.xlane.xlu1 %943 }
 0x1c6   : > { %6091 = vst [vmem:[#allocation12_spill] sm:$0xff] %v3942_v24  ;;  %vm978_vm3 = vcmp.eq.f32.partialorder %v3760_v57, %v3942_v24 }
 0x1c7   : > { %vm990_vm4 = vmand %vm978_vm3, %vm3748_vm1 }
 0x1c8   : > { %2399 = vrot.lane.b32.xlu0 %v413_v41, %s3352_s23  ;;  %2381 = vrot.lane.b32.xlu1 %v404_v11, %s3352_s23  ;;  %v1002_v15 = vsel %vm990_vm4, %v3950_v19, 8.0 }
 0x1c9   : > { %v3939_v10 = vpop.xlane.xlu0 %946  ;;  %v1014_v28 = vsel %vm5934_vm2, %v1002_v15, inf  ;;  %v6110_v15 = vmov 0 }
 0x1ca   : > { %6090 = vst [vmem:[#allocation10_spill] sm:$0xff] %v3939_v10  ;;  %vm979_vm15 = vcmp.eq.f32.partialorder %v3772_v42, %v3939_v10  ;;  %v3999_v31 = vpop.xlane.xlu1 %952 }
 0x1cb   : > { %6098 = vst [vmem:[#allocation19_spill] sm:$0xff] %v3999_v31  ;;  %vm991_vm0 = vmand %vm979_vm15, %vm3748_vm1  ;;  %vm981_vm3 = vcmp.eq.f32.partialorder %v3780_v7, %v3999_v31 }
 0x1cc   : > { %2121 = vrot.lane.b32.xlu1 %v406_v61, %s3353_s18  ;;  %v1003_v18 = vsel %vm991_vm0, %v3950_v19, 8.0  ;;  %vm993_vm4 = vmand %vm981_vm3, %vm3748_vm1 }
 0x1cd   : > { %v3944_v29 = vpop.xlane.xlu0 %949  ;;  %v1017_v22 = vsel %vm5934_vm2, %v1003_v18, inf  ;;  %v1005_v21 = vsel %vm993_vm4, %v3950_v19, 8.0 }
 0x1ce   : > { %6092 = vst [vmem:[#allocation13_spill] sm:$0xff] %v3944_v29  ;;  %vm980_vm5 = vcmp.eq.f32.partialorder %v3789_v25, %v3944_v29  ;;  %v1023_v49 = vsel %vm5934_vm2, %v1005_v21, inf  ;;  %vm1373_vm15 = vcmp.ge.f32.partialorder %v3944_v29, 0.5 }
 0x1cf   : > { %vm992_vm6 = vmand %vm980_vm5, %vm3748_vm1 }
 0x1d0   : > { %1955 = vrot.lane.b32.xlu1 %v6089_v48, %s3352_s23  ;;  %v1004_v57 = vsel %vm992_vm6, %v3950_v19, 8.0  ;;  %v1337_v48 = vadd.s32 32, %v6105_v6 }
 0x1d1   : > { %v3957_v54 = vpop.xlane.xlu0 %955  ;;  %v1020_v25 = vsel %vm5934_vm2, %v1004_v57, inf  ;;  %v1338_v57 = vadd.s32 40, %v6105_v6 }
 0x1d2   : > { %6094 = vst [vmem:[#allocation15_spill] sm:$0xff] %v3957_v54  ;;  %vm982_vm7 = vcmp.eq.f32.partialorder %v3799_v53, %v3957_v54 }
 0x1d3   : > { %vm994_vm8 = vmand %vm982_vm7, %vm3748_vm1 }
 0x1d4   : > { %2385 = vrot.lane.b32.xlu1 %v406_v61, %s3352_s23  ;;  %v1006_v20 = vsel %vm994_vm8, %v3950_v19, 8.0 }
 0x1d5   : > { %v1026_v53 = vsel %vm5934_vm2, %v1006_v20, inf }
 0x1d8   : > { %2387 = vrot.lane.b32.xlu1 %v407_v3, %s3352_s23  ;;  %v1335_v3 = vadd.s32 16, %v6105_v6 }
 0x1dc   : > { %2389 = vrot.lane.b32.xlu1 %v408_v44, %s3352_s23 }
 0x1e0   : > { %2391 = vrot.lane.b32.xlu1 %v409_v13, %s3352_s23  ;;  %v4058_v13 = vadd.s32 %v4050_v55, %v1334_v8  ;;  %v1341_v8 = vadd.s32 64, %v6105_v6 }
 0x1e2   : > { %6107 = vst [vmem:[#allocation27_spill] sm:$0xff] %v4058_v13 }
 0x1e4   : > { %2393 = vrot.lane.b32.xlu1 %v410_v46, %s3352_s23  ;;  %v4062_v46 = vadd.s32 %v4050_v55, %v6105_v6 }
 0x1e6   : > { %6108 = vst [vmem:[#allocation28_spill] sm:$0xff] %v4062_v46 }
 0x1e7   : > { %1015 = vmin.xlane.f32.xlu0 %v1014_v28 }
 0x1e8   : > { %2395 = vrot.lane.b32.xlu1 %v411_v45, %s3352_s23  ;;  %v4065_v45 = vadd.s32 %v4050_v55, %v1335_v3 }
 0x1ea   : > { %6109 = vst [vmem:[#allocation29_spill] sm:$0xff] %v4065_v45  ;;  %vm5932_vm0 = vcmp.lt.s32.totalorder %v4065_v45, 256 }
 0x1eb   : > { %v3971_v62 = vpop.xlane.xlu0 %961  ;;  %1021 = vmin.xlane.f32.xlu0 %v1020_v25  ;;  %v6114_v25 = vmov 0 }
 0x1ec   : > { %6095 = vst [vmem:[#allocation16_spill] sm:$0xff] %v3971_v62  ;;  %2397 = vrot.lane.b32.xlu1 %v412_v63, %s3352_s23  ;;  %vm984_vm9 = vcmp.eq.f32.partialorder %v3841_v37, %v3971_v62  ;;  %v1336_v63 = vadd.s32 24, %v6105_v6 }
 0x1ed   : > { %vm996_vm10 = vmand %vm984_vm9, %vm3748_vm1 }
 0x1ee   : > { %v1008_v58 = vsel %vm996_vm10, %v3950_v19, 8.0  ;;  %v4086_v28 = vadd.s32 %v4050_v55, %v1336_v63  ;;  %v1342_v63 = vadd.s32 72, %v6105_v6 }
 0x1ef   : > { %v3980_v56 = vpop.xlane.xlu0 %967  ;;  %1027 = vmin.xlane.f32.xlu0 %v1026_v53  ;;  %v1032_v40 = vsel %vm5934_vm2, %v1008_v58, inf  ;;  %v6118_v53 = vmov 0  ;;  %v5935_v58 = vmov 0.0  }
 0x1f0   : > { %6096 = vst [vmem:[#allocation17_spill] sm:$0xff] %v3980_v56  ;;  %vm986_vm11 = vcmp.eq.f32.partialorder %v3847_v27, %v3980_v56  ;;  %6113 = vst [vmem:[#allocation31_spill] sm:$0xff] %v4086_v28 }
 0x1f1   : > { %vm998_vm12 = vmand %vm986_vm11, %vm3748_vm1  ;;  %vm1372_vm11 = vcmp.ge.f32.partialorder %v3939_v10, 0.5 }
 0x1f2   : > { %v1010_v37 = vsel %vm998_vm12, %v3950_v19, 8.0  ;;  %vm5933_vm12 = vcmp.lt.s32.totalorder %v4058_v13, 256 }
 0x1f3   : > { %1033 = vmin.xlane.f32.xlu0 %v1032_v40  ;;  %v1038_v1 = vsel %vm5934_vm2, %v1010_v37, inf  ;;  %vm4081_vm3 = vmand %vm1372_vm11, %vm5933_vm12  ;;  %v4109_v37 = vadd.s32 %v4050_v55, %v1337_v48 }
 0x1f4   : > { %v6111_v15 = vsel %vm4081_vm3, 4294967295, %v6110_v15  ;;  %v2957_v40 = vsel %vm4081_vm3, 1.0, %v5935_v58 }
 0x1f5   : > { %6112 = vst [vmem:[#allocation30_spill] sm:$0xff] %v6111_v15  ;;  %6121 = vst [vmem:[#allocation35_spill] sm:$0xff] %v4109_v37 }
 0x1f7   : > { %1039 = vmin.xlane.f32.xlu0 %v1038_v1  ;;  %v1339_v1 = vadd.s32 48, %v6105_v6 }
 0x203   : > { %v3990_v23 = vpop.xlane.xlu0 %973 }
 0x204   : > { %6097 = vst [vmem:[#allocation18_spill] sm:$0xff] %v3990_v23  ;;  %vm988_vm13 = vcmp.eq.f32.partialorder %v3867_v14, %v3990_v23  ;;  %v4006_v14 = vpop.xlane.xlu1 %958 }
 0x205   : > { %vm1000_vm14 = vmand %vm988_vm13, %vm3748_vm1  ;;  %6099 = vst [vmem:[#allocation20_spill] sm:$0xff] %v4006_v14  ;;  %vm983_vm5 = vcmp.eq.f32.partialorder %v3820_v47, %v4006_v14  ;;  %vm1371_vm13 = vcmp.ge.f32.partialorder %v3942_v24, 0.5 }
 0x206   : > { %v1012_v27 = vsel %vm1000_vm14, %v3950_v19, 8.0  ;;  %vm995_vm6 = vmand %vm983_vm5, %vm3748_vm1  ;;  %vm5925_vm14 = vcmp.lt.s32.totalorder %v4062_v46, 256 }
 0x207   : > { %v1044_v12 = vsel %vm5934_vm2, %v1012_v27, inf  ;;  %v1007_v47 = vsel %vm995_vm6, %v3950_v19, 8.0  ;;  %v4025_v9 = vpop.permute.xlu0 %1943  ;;  %vm4091_vm4 = vmand %vm1371_vm13, %vm5925_vm14  ;;  %vm1376_vm13 = vcmp.ge.f32.partialorder %v4006_v14, 0.5 }
 0x208   : > { %1045 = vmin.xlane.f32.xlu0 %v1044_v12  ;;  %v4013_v42 = vpop.xlane.xlu1 %964  ;;  %v1029_v38 = vsel %vm5934_vm2, %v1007_v47, inf  ;;  %v6115_v25 = vsel %vm4091_vm4, 4294967295, %v6114_v25  ;;  %vm4099_vm5 = vmand %vm1373_vm15, %vm5932_vm0  ;;  %v4118_v12 = vadd.s32 %v4050_v55, %v1338_v57  ;;  %v2956_v26 = vsel %vm4091_vm4, 1.0, %v5935_v58 }
 0x209   : > { %6100 = vst [vmem:[#allocation21_spill] sm:$0xff] %v4013_v42  ;;  %vm985_vm7 = vcmp.eq.f32.partialorder %v3855_v5, %v4013_v42  ;;  %6116 = vst [vmem:[#allocation32_spill] sm:$0xff] %v6115_v25  ;;  %v6119_v53 = vsel %vm4099_vm5, 4294967295, %v6118_v53  ;;  %v4133_v47 = vadd.s32 %v4050_v55, %v1339_v1  ;;  %v6132_v57 = vmov 0 }
 0x20a   : > { %vm997_vm8 = vmand %vm985_vm7, %vm3748_vm1  ;;  %6120 = vst [vmem:[#allocation34_spill] sm:$0xff] %v6119_v53  ;;  %vm5928_vm15 = vcmp.lt.s32.totalorder %v4118_v12, 256  ;;  %v1343_v1 = vadd.s32 80, %v6105_v6  ;;  %v4571_v53 = vld [vmem:[%s3453_s27 + $0x38] sm:$0xff] }
 0x20b   : > { %v1009_v5 = vsel %vm997_vm8, %v3950_v19, 8.0  ;;  %v4035_v43 = vpop.permute.xlu0 %1947  ;;  %vm5924_vm8 = vcmp.lt.s32.totalorder %v4086_v28, 256  ;;  %6122 = vst [vmem:[#allocation36_spill] sm:$0xff] %v4118_v12  ;;  %6123 = vst [vmem:[#allocation37_spill] sm:$0xff] %v4133_v47 }
 0x20c   : > { %v4021_v7 = vpop.xlane.xlu1 %970  ;;  %v1035_v51 = vsel %vm5934_vm2, %v1009_v5, inf  ;;  %3125 = vrcp.f32 %v4035_v43 }
 0x20d   : > { %6101 = vst [vmem:[#allocation22_spill] sm:$0xff] %v4021_v7  ;;  %vm987_vm9 = vcmp.eq.f32.partialorder %v3861_v16, %v4021_v7 }
 0x20e   : > { %vm999_vm10 = vmand %vm987_vm9, %vm3748_vm1  ;;  %vm1374_vm9 = vcmp.ge.f32.partialorder %v3999_v31, 0.5 }
 0x20f   : > { %v1011_v2 = vsel %vm999_vm10, %v3950_v19, 8.0  ;;  %v4040_v52 = vpop.permute.xlu0 %2115  ;;  %vm5926_vm10 = vcmp.lt.s32.totalorder %v4109_v37, 256  ;;  %vm4137_vm11 = vmand %vm1374_vm9, %vm5924_vm8  ;;  %vm5929_vm9 = vcmp.lt.s32.totalorder %v4133_v47, 256 }
 0x210   : > { %1018 = vmin.xlane.f32.xlu1 %v1017_v22  ;;  %v1041_v0 = vsel %vm5934_vm2, %v1011_v2, inf  ;;  %6102 = vst [vmem:[#allocation23_spill] sm:$0xff] %v4040_v52  ;;  %v4044_v11 = vpop.permute.xlu1 %1945  ;;  %v2958_v22 = vsel %vm4099_vm5, 1.0, %v5935_v58  ;;  %v2959_v3 = vsel %vm4137_vm11, 1.0, %v5935_v58  ;;  %vm4163_vm8 = vmand %vm1376_vm13, %vm5928_vm15 }
 0x211   : > { %v6133_v57 = vsel %vm4163_vm8, 4294967295, %v6132_v57 }
 0x212   : > { %6134 = vst [vmem:[#allocation42_spill] sm:$0xff] %v6133_v57 }
 0x213   : > { %v4042_v16 = vpop.permute.xlu0 %2117 }
 0x214   : > { %1024 = vmin.xlane.f32.xlu1 %v1023_v49  ;;  %6103 = vst [vmem:[#allocation24_spill] sm:$0xff] %v4042_v16  ;;  %v4053_v44 = vpop.permute.xlu1 %2113  ;;  %v1443_v49 = vadd.f32 %v2957_v40, %v2956_v26  ;;  %v4186_v26 = vadd.s32 %v4050_v55, %v1342_v63 }
 0x215   : > { %6106 = vst [vmem:[#allocation26_spill] sm:$0xff] %v4053_v44 }
 0x216   : > { %v1444_v5 = vadd.f32 %v2958_v22, %v1443_v49  ;;  %v2961_v22 = vsel %vm4163_vm8, 1.0, %v5935_v58  ;;  %6139 = vst [vmem:[#allocation45_spill] sm:$0xff] %v4186_v26 }
 0x217   : > { %v4046_v30 = vpop.permute.xlu0 %2379 }
 0x218   : > { %1030 = vmin.xlane.f32.xlu1 %v1029_v38  ;;  %6104 = vst [vmem:[#allocation25_spill] sm:$0xff] %v4046_v30  ;;  %v4071_v41 = vpop.permute.xlu1 %1949  ;;  %v6124_v38 = vmov 0  ;;  %v1445_v48 = vadd.f32 %v2959_v3, %v1444_v5  ;;  %v6141_v3 = vmov 0 }
 0x219   : > { %v6125_v38 = vsel %vm4137_vm11, 4294967295, %v6124_v38 }
 0x21a   : > { %6126 = vst [vmem:[#allocation38_spill] sm:$0xff] %v6125_v38 }
 0x21b   : > { %v4055_v60 = vpop.permute.xlu0 %2119 }
 0x21c   : > { %1036 = vmin.xlane.f32.xlu1 %v1035_v51 }
 0x21f   : > { %v4073_v61 = vpop.permute.xlu0 %1953 }
 0x220   : > { %1042 = vmin.xlane.f32.xlu1 %v1041_v0  ;;  %v6129_v0 = vmov 0 }
 0x223   : > { %v4114_v27 = vpop.permute.xlu0 %2383 }
 0x227   : > { %v4146_v2 = vpop.permute.xlu0 %2123 }
 0x228   : > { %6128 = vst [vmem:[#allocation40_spill] sm:$0xff] %v4146_v2 }
 0x22b   : > { %v4189_v49 = vpop.permute.xlu0 %2125 }
 0x22c   : > { %6140 = vst [vmem:[#allocation46_spill] sm:$0xff] %v4189_v49 }
 0x23c   : > { %v4095_v20 = vpop.xlane.xlu1 %976 }
 0x23d   : > { %6117 = vst [vmem:[#allocation33_spill] sm:$0xff] %v4095_v20  ;;  %vm989_vm6 = vcmp.eq.f32.partialorder %v3902_v59, %v4095_v20  ;;  %v1340_v59 = vadd.s32 56, %v6105_v6 }
 0x23e   : > { %vm1001_vm7 = vmand %vm989_vm6, %vm3748_vm1  ;;  %vm1375_vm1 = vcmp.ge.f32.partialorder %v3957_v54, 0.5 }
 0x23f   : > { %v1013_v18 = vsel %vm1001_vm7, %v3950_v19, 8.0  ;;  %v4144_v51 = vadd.s32 %v4050_v55, %v1340_v59  ;;  %vm4150_vm6 = vmand %vm1375_vm1, %vm5926_vm10  ;;  %vm1377_vm7 = vcmp.ge.f32.partialorder %v3971_v62, 0.5  ;;  %vm1378_vm1 = vcmp.ge.f32.partialorder %v4013_v42, 0.5 }
 0x240   : > { %v1047_v21 = vsel %vm5934_vm2, %v1013_v18, inf  ;;  %v6130_v0 = vsel %vm4150_vm6, 4294967295, %v6129_v0  ;;  %v2960_v40 = vsel %vm4150_vm6, 1.0, %v5935_v58  ;;  %vm4175_vm10 = vmand %vm1377_vm7, %vm5929_vm9  ;;  %v6135_v59 = vmov 0 }
 0x241   : > { %1048 = vmin.xlane.f32.xlu1 %v1047_v21  ;;  %6127 = vst [vmem:[#allocation39_spill] sm:$0xff] %v4144_v51  ;;  %6131 = vst [vmem:[#allocation41_spill] sm:$0xff] %v6130_v0  ;;  %vm5931_vm14 = vcmp.lt.s32.totalorder %v4144_v51, 256  ;;  %v6136_v59 = vsel %vm4175_vm10, 4294967295, %v6135_v59  ;;  %v4180_v18 = vadd.s32 %v4050_v55, %v1341_v8  ;;  %v1344_v21 = vadd.s32 88, %v6105_v6  ;;  %v4254_v51 = vpop.permute.xlu1 %2377 }
 0x242   : > { %6137 = vst [vmem:[#allocation43_spill] sm:$0xff] %v6136_v59  ;;  %v1446_v5 = vadd.f32 %v2960_v40, %v1445_v48  ;;  %vm4193_vm13 = vmand %vm1378_vm1, %vm5931_vm14  ;;  %v2962_v8 = vsel %vm4175_vm10, 1.0, %v5935_v58  ;;  %v4201_v42 = vadd.s32 %v4050_v55, %v1343_v1  ;;  %vm1379_vm7 = vcmp.ge.f32.partialorder %v3980_v56, 0.5 }
 0x243   : > { %6138 = vst [vmem:[#allocation44_spill] sm:$0xff] %v4180_v18  ;;  %v6142_v3 = vsel %vm4193_vm13, 4294967295, %v6141_v3  ;;  %vm5989_vm15 = vcmp.lt.s32.totalorder %v4180_v18, 256  ;;  %vm1380_vm9 = vcmp.ge.f32.partialorder %v4021_v7, 0.5  ;;  %v2963_v48 = vsel %vm4193_vm13, 1.0, %v5935_v58  ;;  %6161 = vst [vmem:[#allocation56_spill] sm:$0xff] %v4254_v51 }
 0x244   : > { %6143 = vst [vmem:[#allocation47_spill] sm:$0xff] %v6142_v3  ;;  %6144 = vst [vmem:[#allocation48_spill] sm:$0xff] %v4201_v42  ;;  %v1447_v63 = vadd.f32 %v2961_v22, %v1446_v5  ;;  %vm5962_vm1 = vcmp.lt.s32.totalorder %v4186_v26, 256  ;;  %v4211_v40 = vadd.s32 %v4050_v55, %v1344_v21  ;;  %vm1381_vm14 = vcmp.ge.f32.partialorder %v3990_v23, 0.5  ;;  %v4221_v22 = vpop.permute.xlu0 %2127 }
 0x245   : > { %vm4216_vm0 = vmand %vm1379_vm7, %vm5989_vm15  ;;  %v6146_v1 = vmov 0  ;;  %vm5984_vm12 = vcmp.lt.s32.totalorder %v4201_v42, 256  ;;  %6149 = vst [vmem:[#allocation51_spill] sm:$0xff] %v4221_v22  ;;  %v6150_v58 = vmov 0  ;;  %vm1382_vm13 = vcmp.ge.f32.partialorder %v4095_v20, 0.5  ;;  %v4261_v42 = vpop.permute.xlu1 %1951 }
 0x246   : > { %6145 = vst [vmem:[#allocation49_spill] sm:$0xff] %v4211_v40  ;;  %v1448_v6 = vadd.f32 %v2962_v8, %v1447_v63  ;;  %v6147_v1 = vsel %vm4216_vm0, 4294967295, %v6146_v1  ;;  %vm4225_vm2 = vmand %vm1380_vm9, %vm5962_vm1  ;;  %vm5961_vm8 = vcmp.lt.s32.totalorder %v4211_v40, 256  ;;  %v6153_v55 = vmov 0 }
 0x247   : > { %6148 = vst [vmem:[#allocation50_spill] sm:$0xff] %v6147_v1  ;;  %v6151_v58 = vsel %vm4225_vm2, 4294967295, %v6150_v58  ;;  %vm4233_vm7 = vmand %vm1381_vm14, %vm5984_vm12  ;;  %v6156_v21 = vmov 0.0   ;;  %vm5963_vm14 = vcmask 0   ;;  %vm6167_vm1 = vcmask 64512  }
 0x248   : > { %v1449_v5 = vadd.f32 %v2963_v48, %v1448_v6  ;;  %6152 = vst [vmem:[#allocation52_spill] sm:$0xff] %v6151_v58  ;;  %v6154_v55 = vsel %vm4233_vm7, 4294967295, %v6153_v55  ;;  %v2964_v6 = vsel %vm4216_vm0, 1.0, %v6156_v21  ;;  %v2965_v8 = vsel %vm4225_vm2, 1.0, %v6156_v21  ;;  %vm4245_vm9 = vmand %vm1382_vm13, %vm5961_vm8  ;;  %v4252_v26 = vpop.permute.xlu0 %2129 }
 0x249   : > { %6155 = vst [vmem:[#allocation53_spill] sm:$0xff] %v6154_v55  ;;  %v6157_v48 = vmov 0  ;;  %v2966_v20 = vsel %vm4233_vm7, 1.0, %v6156_v21  ;;  %6160 = vst [vmem:[#allocation55_spill] sm:$0xff] %v4252_v26  ;;  %v2967_v12 = vsel %vm4245_vm9, 1.0, %v6156_v21  ;;  %v4265_v46 = vpop.permute.xlu1 %2381  ;;  %3127 = vrcp.f32 %v4261_v42 }
 0x24a   : > { %v1450_v63 = vadd.f32 %v2964_v6, %v1449_v5  ;;  %v6158_v48 = vsel %vm4245_vm9, 4294967295, %v6157_v48  ;;  %6164 = vst [vmem:[#allocation59_spill] sm:$0xff] %v4265_v46 }
 0x24b   : > { %6159 = vst [vmem:[#allocation54_spill] sm:$0xff] %v6158_v48 }
 0x24c   : > { %v1451_v7 = vadd.f32 %v2965_v8, %v1450_v63  ;;  %v4259_v40 = vpop.permute.xlu0 %2131 }
 0x24d   : > { %6162 = vst [vmem:[#allocation57_spill] sm:$0xff] %v4259_v40  ;;  %v4269_v63 = vpop.permute.xlu1 %2121 }
 0x24e   : > { %v1452_v5 = vadd.f32 %v2966_v20, %v1451_v7 }
 0x250   : > { %v1453_v6 = vadd.f32 %v2967_v12, %v1452_v5  ;;  %v4263_v28 = vpop.permute.xlu0 %2133  ;;  %v2768_v5 = vld [vmem:[#allocation4] sm:$0x1] }
 0x251   : > { %6163 = vst [vmem:[#allocation58_spill] sm:$0xff] %v4263_v28  ;;  %v4273_v20 = vpop.permute.xlu1 %1955 }
 0x252   : > { %v1454_v14 = vrot.slane %v1453_v6, 4 }
 0x254   : > { %v1455_v18 = vadd.f32 %v1454_v14, %v1453_v6  ;;  %v4267_v8 = vpop.permute.xlu0 %2135 }
 0x255   : > { %6165 = vst [vmem:[#allocation60_spill] sm:$0xff] %v4267_v8  ;;  %v4276_v14 = vpop.permute.xlu1 %2385 }
 0x256   : > { %v1456_v47 = vrot.slane %v1455_v18, 2 }
 0x258   : > { %v1457_v23 = vadd.f32 %v1456_v47, %v1455_v18  ;;  %v4271_v37 = vpop.permute.xlu0 %2399 }
 0x259   : > { %6166 = vst [vmem:[#allocation61_spill] sm:$0xff] %v4271_v37 }
 0x25a   : > { %v1458_v7 = vrot.slane %v1457_v23, 1 }
 0x25c   : > { %v1459_v12 = vadd.f32 %v1458_v7, %v1457_v23 }
 0x25e   : > { %v2769_v31 = vadd.f32 %v2768_v5, %v1459_v12 }
 0x260   : > { %2770 = vst.msk [vmem:[#allocation4] sm:$0x1] %vm5963_vm14, %v2769_v31  ;;  %v4289_v31 = vpop.permute.xlu1 %2387  ;;  %vm6169_vm14 = vmmov %vm6167_vm1 }
 0x261   : > { %6168 = vst [vmem:[#allocation62_spill] sm:$0xff] %v4289_v31 }
 0x264   : > { %v4300_v24 = vpop.permute.xlu1 %2389 }
 0x265   : > { %6170 = vst [vmem:[#allocation63_spill] sm:$0xff] %v4300_v24 }
 0x268   : > { %v4314_v54 = vpop.permute.xlu1 %2391 }
 0x269   : > { %6172 = vst [vmem:[#allocation64_spill] sm:$0xff] %v4314_v54 }
 0x274   : > { %v1016_v56 = vpop.xlane.xlu0 %1015 }
 0x275   : > { %vm1050_vm13 = vcmp.eq.f32.partialorder %v3950_v19, %v1016_v56 }
 0x276   : > { %v4280_v6 = vsel %vm1050_vm13, 1.0, %v6156_v21 }
 0x277   : > { %v1086_v47 = vmul.f32 %v4280_v6, %v3688_v32 }
 0x278   : > { %v1022_v18 = vpop.xlane.xlu0 %1021 }
 0x279   : > { %vm1052_vm8 = vcmp.eq.f32.partialorder %v3950_v19, %v1022_v18  ;;  %v1098_v23 = vsel %vm6167_vm1, %v1086_v47, 0.0 }
 0x27a   : > { %v4287_v7 = vsel %vm1052_vm8, 1.0, %v6156_v21  ;;  %1099 = vadd.xlane.f32.xlu0 %v1098_v23 }
 0x27b   : > { %v1088_v56 = vmul.f32 %v4287_v7, %v3688_v32 }
 0x27c   : > { %v1028_v12 = vpop.xlane.xlu0 %1027 }
 0x27d   : > { %vm1054_vm13 = vcmp.eq.f32.partialorder %v3950_v19, %v1028_v12  ;;  %v1104_v5 = vsel %vm6169_vm14, %v1088_v56, 0.0 }
 0x27e   : > { %v4296_v45 = vsel %vm1054_vm13, 1.0, %v6156_v21  ;;  %1105 = vadd.xlane.f32.xlu0 %v1104_v5  ;;  %vm6171_vm13 = vmmov %vm6167_vm1 }
 0x27f   : > { %v1090_v47 = vmul.f32 %v4296_v45, %v3688_v32 }
 0x280   : > { %v1034_v18 = vpop.xlane.xlu0 %1033 }
 0x281   : > { %vm1056_vm8 = vcmp.eq.f32.partialorder %v3950_v19, %v1034_v18  ;;  %v1110_v23 = vsel %vm6167_vm1, %v1090_v47, 0.0 }
 0x282   : > { %v4305_v62 = vsel %vm1056_vm8, 1.0, %v6156_v21  ;;  %1111 = vadd.xlane.f32.xlu0 %v1110_v23  ;;  %vm6173_vm8 = vmmov %vm6167_vm1  ;;  %v4319_v23 = vpop.permute.xlu1 %2393 }
 0x283   : > { %v1092_v56 = vmul.f32 %v4305_v62, %v3688_v32  ;;  %6174 = vst [vmem:[#allocation65_spill] sm:$0xff] %v4319_v23  ;;  %vm6179_vm12 = vmmov %vm6173_vm8 }
 0x284   : > { %v1040_v12 = vpop.xlane.xlu0 %1039  ;;  %vm6180_vm15 = vmmov %vm6173_vm8 }
 0x285   : > { %vm1058_vm14 = vcmp.eq.f32.partialorder %v3950_v19, %v1040_v12  ;;  %v1116_v5 = vsel %vm6171_vm13, %v1092_v56, 0.0 }
 0x286   : > { %v4312_v13 = vsel %vm1058_vm14, 1.0, %v6156_v21  ;;  %1117 = vadd.xlane.f32.xlu0 %v1116_v5  ;;  %v4321_v29 = vpop.permute.xlu1 %2395  ;;  %vm6177_vm14 = vmmov %vm6173_vm8 }
 0x287   : > { %v1094_v47 = vmul.f32 %v4312_v13, %v3688_v32  ;;  %6175 = vst [vmem:[#allocation66_spill] sm:$0xff] %v4321_v29 }
 0x289   : > { %v1122_v18 = vsel %vm6173_vm8, %v1094_v47, 0.0  ;;  %v1134_v47 = vmul.f32 %v4280_v6, %v3692_v34 }
 0x28a   : > { %1123 = vadd.xlane.f32.xlu0 %v1122_v18  ;;  %v4329_v5 = vpop.permute.xlu1 %2397 }
 0x28b   : > { %6176 = vst [vmem:[#allocation67_spill] sm:$0xff] %v4329_v5  ;;  %v1146_v58 = vsel %vm6173_vm8, %v1134_v47, 0.0  ;;  %v1138_v47 = vmul.f32 %v4296_v45, %v3692_v34 }
 0x295   : > { %v1046_v48 = vpop.xlane.xlu0 %1045 }
 0x296   : > { %vm1060_vm1 = vcmp.eq.f32.partialorder %v3950_v19, %v1046_v48  ;;  %v1136_v48 = vmul.f32 %v4287_v7, %v3692_v34 }
 0x297   : > { %v4325_v56 = vsel %vm1060_vm1, 1.0, %v6156_v21 }
 0x298   : > { %v1096_v12 = vmul.f32 %v4325_v56, %v3688_v32 }
 0x29a   : > { %v1128_v10 = vsel %vm6177_vm14, %v1096_v12, 0.0  ;;  %vm6178_vm14 = vmmov %vm6173_vm8 }
 0x29b   : > { %1129 = vadd.xlane.f32.xlu0 %v1128_v10  ;;  %v1152_v10 = vsel %vm6178_vm14, %v1136_v48, 0.0 }
 0x29d   : > { %v1019_v18 = vpop.xlane.xlu1 %1018 }
 0x29e   : > { %vm1051_vm13 = vcmp.eq.f32.partialorder %v3950_v19, %v1019_v18 }
 0x29f   : > { %v4339_v3 = vsel %vm1051_vm13, 1.0, %v6156_v21  ;;  %1147 = vadd.xlane.f32.xlu0 %v1146_v58 }
 0x2a0   : > { %v1087_v57 = vmul.f32 %v4339_v3, %v3688_v32 }
 0x2a1   : > { %v1025_v12 = vpop.xlane.xlu1 %1024 }
 0x2a2   : > { %vm1053_vm1 = vcmp.eq.f32.partialorder %v3950_v19, %v1025_v12  ;;  %v1101_v38 = vsel %vm6179_vm12, %v1087_v57, 0.0  ;;  %v1158_v12 = vsel %vm6173_vm8, %v1138_v47, 0.0  ;;  %v1140_v57 = vmul.f32 %v4305_v62, %v3692_v34 }
 0x2a3   : > { %v4349_v18 = vsel %vm1053_vm1, 1.0, %v6156_v21  ;;  %1153 = vadd.xlane.f32.xlu0 %v1152_v10  ;;  %1102 = vadd.xlane.f32.xlu1 %v1101_v38  ;;  %vm6181_vm1 = vmmov %vm6173_vm8 }
 0x2a4   : > { %v1089_v58 = vmul.f32 %v4349_v18, %v3688_v32  ;;  %vm6182_vm14 = vmmov %vm6181_vm1 }
 0x2a5   : > { %v1031_v25 = vpop.xlane.xlu1 %1030  ;;  %vm6184_vm8 = vmmov %vm6181_vm1 }
 0x2a6   : > { %vm1055_vm13 = vcmp.eq.f32.partialorder %v3950_v19, %v1031_v25  ;;  %v1107_v48 = vsel %vm6180_vm15, %v1089_v58, 0.0  ;;  %v1164_v25 = vsel %vm6181_vm1, %v1140_v57, 0.0  ;;  %v1183_v58 = vmul.f32 %v4339_v3, %v3694_v35 }
 0x2a7   : > { %v4359_v55 = vsel %vm1055_vm13, 1.0, %v6156_v21  ;;  %1159 = vadd.xlane.f32.xlu0 %v1158_v12  ;;  %1108 = vadd.xlane.f32.xlu1 %v1107_v48  ;;  %vm6183_vm13 = vmmov %vm6181_vm1 }
 0x2a8   : > { %v1091_v38 = vmul.f32 %v4359_v55, %v3688_v32 }
 0x2a9   : > { %v1037_v10 = vpop.xlane.xlu1 %1036 }
 0x2aa   : > { %vm1057_vm12 = vcmp.eq.f32.partialorder %v3950_v19, %v1037_v10  ;;  %v1113_v47 = vsel %vm6182_vm14, %v1091_v38, 0.0  ;;  %v1197_v10 = vsel %vm6183_vm13, %v1183_v58, 0.0  ;;  %v1230_v38 = vmul.f32 %v4280_v6, %v3690_v33  ;;  %vm6186_vm14 = vmmov %vm6181_vm1 }
 0x2ab   : > { %v4369_v1 = vsel %vm1057_vm12, 1.0, %v6156_v21  ;;  %1165 = vadd.xlane.f32.xlu0 %v1164_v25  ;;  %1114 = vadd.xlane.f32.xlu1 %v1113_v47  ;;  %vm6185_vm12 = vmmov %vm6181_vm1  ;;  %v1185_v58 = vmul.f32 %v4349_v18, %v3694_v35 }
 0x2ac   : > { %v1093_v12 = vmul.f32 %v4369_v1, %v3688_v32  ;;  %v1242_v47 = vsel %vm6185_vm12, %v1230_v38, 0.0  ;;  %vm6188_vm13 = vmmov %vm6181_vm1 }
 0x2ad   : > { %v1043_v48 = vpop.xlane.xlu1 %1042  ;;  %vm6190_vm12 = vmmov %vm6181_vm1 }
 0x2ae   : > { %vm1059_vm15 = vcmp.eq.f32.partialorder %v3950_v19, %v1043_v48  ;;  %v1119_v57 = vsel %vm6184_vm8, %v1093_v12, 0.0  ;;  %v1203_v12 = vsel %vm6186_vm14, %v1185_v58, 0.0  ;;  %v1186_v48 = vmul.f32 %v4296_v45, %v3694_v35  ;;  %vm6189_vm8 = vmmov %vm6181_vm1 }
 0x2af   : > { %v4379_v59 = vsel %vm1059_vm15, 1.0, %v6156_v21  ;;  %1198 = vadd.xlane.f32.xlu0 %v1197_v10  ;;  %1120 = vadd.xlane.f32.xlu1 %v1119_v57  ;;  %vm6187_vm15 = vmmov %vm6181_vm1  ;;  %v1187_v57 = vmul.f32 %v4359_v55, %v3694_v35 }
 0x2b0   : > { %v1095_v25 = vmul.f32 %v4379_v59, %v3688_v32  ;;  %v1206_v10 = vsel %vm6187_vm15, %v1186_v48, 0.0  ;;  %vm6191_vm14 = vmmov %vm6181_vm1 }
 0x2b1   : > { %v1209_v38 = vsel %vm6188_vm13, %v1187_v57, 0.0  ;;  %vm6192_vm13 = vmmov %vm6181_vm1 }
 0x2b2   : > { %v1125_v37 = vsel %vm6181_vm1, %v1095_v25, 0.0  ;;  %v1188_v25 = vmul.f32 %v4305_v62, %v3694_v35 }
 0x2b3   : > { %1243 = vadd.xlane.f32.xlu0 %v1242_v47  ;;  %1126 = vadd.xlane.f32.xlu1 %v1125_v37  ;;  %v1189_v47 = vmul.f32 %v4369_v1, %v3694_v35 }
 0x2b4   : > { %v1212_v37 = vsel %vm6189_vm8, %v1188_v25, 0.0  ;;  %v1191_v25 = vmul.f32 %v4379_v59, %v3694_v35  ;;  %vm6193_vm8 = vmmov %vm6181_vm1 }
 0x2b5   : > { %v1215_v58 = vsel %vm6190_vm12, %v1189_v47, 0.0  ;;  %vm6194_vm12 = vmmov %vm6181_vm1 }
 0x2b7   : > { %1204 = vadd.xlane.f32.xlu0 %v1203_v12  ;;  %v1141_v12 = vmul.f32 %v4369_v1, %v3692_v34 }
 0x2b9   : > { %v1167_v48 = vsel %vm6181_vm1, %v1141_v12, 0.0  ;;  %v1143_v12 = vmul.f32 %v4379_v59, %v3692_v34 }
 0x2bb   : > { %1207 = vadd.xlane.f32.xlu0 %v1206_v10  ;;  %v1237_v10 = vmul.f32 %v4369_v1, %v3690_v33 }
 0x2bf   : > { %1210 = vadd.xlane.f32.xlu0 %v1209_v38  ;;  %v1263_v38 = vsel %vm6191_vm14, %v1237_v10, 0.0  ;;  %v1135_v10 = vmul.f32 %v4339_v3, %v3692_v34  ;;  %vm6195_vm14 = vmmov %vm6181_vm1 }
 0x2c3   : > { %1213 = vadd.xlane.f32.xlu0 %v1212_v37 }
 0x2c7   : > { %1216 = vadd.xlane.f32.xlu0 %v1215_v58  ;;  %v1221_v58 = vsel %vm6192_vm13, %v1191_v25, 0.0  ;;  %vm6197_vm13 = vmmov %vm6181_vm1 }
 0x2cb   : > { %1168 = vadd.xlane.f32.xlu0 %v1167_v48 }
 0x2ce   : > { %v1049_v57 = vpop.xlane.xlu1 %1048 }
 0x2cf   : > { %vm1061_vm15 = vcmp.eq.f32.partialorder %v3950_v19, %v1049_v57  ;;  %1264 = vadd.xlane.f32.xlu0 %v1263_v38  ;;  %v1173_v57 = vsel %vm6194_vm12, %v1143_v12, 0.0  ;;  %v1137_v38 = vmul.f32 %v4349_v18, %v3692_v34  ;;  %v1139_v12 = vmul.f32 %v4359_v55, %v3692_v34  ;;  %vm6199_vm12 = vmmov %vm6181_vm1  ;;  %v4588_v19 = vld [vmem:[%s3453_s27 + $0x48] sm:$0xff] }
 0x2d0   : > { %v4410_v37 = vsel %vm1061_vm15, 1.0, %v6156_v21  ;;  %v1239_v21 = vmul.f32 %v4379_v59, %v3690_v33  ;;  %vm6196_vm15 = vmmov %vm6181_vm1 }
 0x2d1   : > { %v1097_v47 = vmul.f32 %v4410_v37, %v3688_v32  ;;  %v1149_v32 = vsel %vm6181_vm1, %v1135_v10, 0.0 }
 0x2d2   : > { %v1269_v25 = vsel %vm6195_vm14, %v1239_v21, 0.0  ;;  %vm6200_vm14 = vmmov %vm6181_vm1 }
 0x2d3   : > { %1222 = vadd.xlane.f32.xlu0 %v1221_v58  ;;  %v1131_v48 = vsel %vm6193_vm8, %v1097_v47, 0.0  ;;  %v1193_v47 = vmul.f32 %v4410_v37, %v3694_v35  ;;  %v1155_v58 = vsel %vm6196_vm15, %v1137_v38, 0.0  ;;  %vm6198_vm8 = vmmov %vm6181_vm1 }
 0x2d4   : > { %1132 = vadd.xlane.f32.xlu1 %v1131_v48  ;;  %v4437_v48 = vld [vmem:[%s374_s21] ss:$0 sm:$0xff]  ;;  %v1161_v21 = vsel %vm6198_vm8, %v1139_v12, 0.0  ;;  %vm6201_vm15 = vmmov %vm6181_vm1  ;;  %s3355_s21 = smov 1  }
 0x2d5   : > { %v1227_v10 = vsel %vm6197_vm13, %v1193_v47, 0.0  ;;  %v1184_v47 = vmul.f32 %v4287_v7, %v3694_v35  ;;  %v1288_v12 = vmul.f32 %v4437_v48, %v4296_v45  ;;  %vm6202_vm13 = vmmov %vm6181_vm1 }
 0x2d6   : > { %vm6203_vm8 = vmmov %vm6181_vm1 }
 0x2d7   : > { %1174 = vadd.xlane.f32.xlu0 %v1173_v57  ;;  %v1285_v57 = vmul.f32 %v4437_v48, %v4339_v3 }
 0x2d8   : > { %1150 = vadd.xlane.f32.xlu1 %v1149_v32  ;;  %v1182_v32 = vmul.f32 %v4280_v6, %v3694_v35 }
 0x2d9   : > { %v1299_v38 = vsel %vm6199_vm12, %v1285_v57, 0.0  ;;  %v1231_v57 = vmul.f32 %v4339_v3, %v3690_v33  ;;  %vm6204_vm12 = vmmov %vm6181_vm1 }
 0x2db   : > { %1270 = vadd.xlane.f32.xlu0 %v1269_v25  ;;  %v1286_v25 = vmul.f32 %v4437_v48, %v4287_v7 }
 0x2dc   : > { %1156 = vadd.xlane.f32.xlu1 %v1155_v58  ;;  %v1194_v58 = vsel %vm6181_vm1, %v1182_v32, 0.0  ;;  %v1290_v32 = vmul.f32 %v4437_v48, %v4305_v62 }
 0x2df   : > { %1228 = vadd.xlane.f32.xlu0 %v1227_v10  ;;  %v1302_v10 = vsel %vm6200_vm14, %v1286_v25, 0.0  ;;  %v1232_v25 = vmul.f32 %v4287_v7, %v3690_v33  ;;  %vm6205_vm14 = vmmov %vm6181_vm1 }
 0x2e0   : > { %1162 = vadd.xlane.f32.xlu1 %v1161_v21  ;;  %v1200_v21 = vsel %vm6201_vm15, %v1184_v47, 0.0  ;;  %v1292_v47 = vmul.f32 %v4437_v48, %v4312_v13  ;;  %vm6206_vm15 = vmmov %vm6181_vm1 }
 0x2e1   : > { %v1248_v3 = vsel %vm6181_vm1, %v1232_v25, 0.0  ;;  %v1235_v25 = vmul.f32 %v4359_v55, %v3690_v33 }
 0x2e3   : > { %1300 = vadd.xlane.f32.xlu0 %v1299_v38  ;;  %v1308_v38 = vsel %vm6202_vm13, %v1288_v12, 0.0  ;;  %v1233_v12 = vmul.f32 %v4349_v18, %v3690_v33  ;;  %vm6207_vm13 = vmmov %vm6181_vm1 }
 0x2e4   : > { %1195 = vadd.xlane.f32.xlu1 %v1194_v58  ;;  %v1245_v58 = vsel %vm6203_vm8, %v1231_v57, 0.0  ;;  %v1294_v57 = vmul.f32 %v4437_v48, %v4325_v56  ;;  %vm6208_vm8 = vmmov %vm6181_vm1 }
 0x2e5   : > { %v1251_v7 = vsel %vm6206_vm15, %v1233_v12, 0.0  ;;  %vm6211_vm15 = vmmov %vm6181_vm1 }
 0x2e7   : > { %1303 = vadd.xlane.f32.xlu0 %v1302_v10  ;;  %v1314_v10 = vsel %vm6204_vm12, %v1290_v32, 0.0  ;;  %v1326_v32 = vsel %vm6207_vm13, %v1294_v57, 0.0  ;;  %vm6209_vm12 = vmmov %vm6181_vm1 }
 0x2e8   : > { %1201 = vadd.xlane.f32.xlu1 %v1200_v21  ;;  %v1320_v21 = vsel %vm6205_vm14, %v1292_v47, 0.0  ;;  %v1236_v47 = vmul.f32 %v4305_v62, %v3690_v33  ;;  %vm6210_vm14 = vmmov %vm6181_vm1 }
 0x2e9   : > { %vm6212_vm13 = vmmov %vm6181_vm1 }
 0x2eb   : > { %1309 = vadd.xlane.f32.xlu0 %v1308_v38  ;;  %v1234_v38 = vmul.f32 %v4296_v45, %v3690_v33  ;;  %v1190_v45 = vmul.f32 %v4312_v13, %v3694_v35 }
 0x2ec   : > { %1246 = vadd.xlane.f32.xlu1 %v1245_v58 }
 0x2ed   : > { %v1254_v58 = vsel %vm6208_vm8, %v1234_v38, 0.0  ;;  %v1218_v12 = vsel %vm6210_vm14, %v1190_v45, 0.0  ;;  %v1192_v38 = vmul.f32 %v4325_v56, %v3694_v35  ;;  %vm6213_vm8 = vmmov %vm6181_vm1  ;;  %v1145_v35 = vmul.f32 %v4410_v37, %v3692_v34 }
 0x2ee   : > { %vm6216_vm14 = vmmov %vm6181_vm1 }
 0x2ef   : > { %1315 = vadd.xlane.f32.xlu0 %v1314_v10  ;;  %v1257_v10 = vsel %vm6209_vm12, %v1235_v25, 0.0  ;;  %v1144_v25 = vmul.f32 %v4325_v56, %v3692_v34  ;;  %vm6214_vm12 = vmmov %vm6181_vm1 }
 0x2f0   : > { %1249 = vadd.xlane.f32.xlu1 %v1248_v3  ;;  %v1260_v3 = vsel %vm6181_vm1, %v1236_v47, 0.0 }
 0x2f1   : > { %v1176_v47 = vsel %vm6214_vm12, %v1144_v25, 0.0  ;;  %vm6221_vm12 = vmmov %vm6181_vm1 }
 0x2f3   : > { %1321 = vadd.xlane.f32.xlu0 %v1320_v21  ;;  %v1142_v21 = vmul.f32 %v4312_v13, %v3692_v34  ;;  %v1287_v34 = vmul.f32 %v4437_v48, %v4349_v18 }
 0x2f4   : > { %1252 = vadd.xlane.f32.xlu1 %v1251_v7  ;;  %v1238_v7 = vmul.f32 %v4312_v13, %v3690_v33  ;;  %v1240_v13 = vmul.f32 %v4325_v56, %v3690_v33  ;;  %v1284_v56 = vmul.f32 %v4437_v48, %v4280_v6  ;;  %v1291_v6 = vmul.f32 %v4437_v48, %v4369_v1 }
 0x2f5   : > { %v1170_v57 = vsel %vm6211_vm15, %v1142_v21, 0.0  ;;  %v1241_v21 = vmul.f32 %v4410_v37, %v3690_v33  ;;  %vm6218_vm15 = vmmov %vm6181_vm1  ;;  %v1289_v33 = vmul.f32 %v4437_v48, %v4359_v55 }
 0x2f6   : > { %v1266_v62 = vsel %vm6212_vm13, %v1238_v7, 0.0  ;;  %vm6219_vm13 = vmmov %vm6181_vm1  ;;  %v1317_v18 = vsel %vm6181_vm1, %v1291_v6, 0.0  ;;  %v3124_v6 = vpop.eup %3123 }
 0x2f7   : > { %1327 = vadd.xlane.f32.xlu0 %v1326_v32  ;;  %v1275_v7 = vsel %vm6218_vm15, %v1241_v21, 0.0  ;;  %vm6223_vm15 = vmmov %vm6181_vm1 }
 0x2f8   : > { %1255 = vadd.xlane.f32.xlu1 %v1254_v58  ;;  %v1224_v58 = vsel %vm6213_vm8, %v1192_v38, 0.0  ;;  %vm6220_vm8 = vmmov %vm6181_vm1 }
 0x2fc   : > { %1258 = vadd.xlane.f32.xlu1 %v1257_v10 }
 0x300   : > { %1261 = vadd.xlane.f32.xlu1 %v1260_v3  ;;  %v1272_v3 = vsel %vm6181_vm1, %v1240_v13, 0.0 }
 0x304   : > { %1219 = vadd.xlane.f32.xlu1 %v1218_v12  ;;  %v1179_v12 = vsel %vm6216_vm14, %v1145_v35, 0.0  ;;  %vm6222_vm14 = vmmov %vm6181_vm1 }
 0x307   : > { %v4494_v32 = vpop.xlane.xlu0 %1099 }
 0x308   : > { %1171 = vadd.xlane.f32.xlu1 %v1170_v57 }
 0x30b   : > { %v4499_v10 = vpop.xlane.xlu0 %1105 }
 0x30c   : > { %1267 = vadd.xlane.f32.xlu1 %v1266_v62  ;;  %v1296_v62 = vsel %vm6219_vm13, %v1284_v56, 0.0 }
 0x30f   : > { %v4507_v45 = vpop.xlane.xlu0 %1111 }
 0x310   : > { %1225 = vadd.xlane.f32.xlu1 %v1224_v58  ;;  %6215 = vst [vmem:[#allocation68_spill] sm:$0xff] %v4507_v45  ;;  %v1305_v58 = vsel %vm6220_vm8, %v1287_v34, 0.0 }
 0x313   : > { %v4512_v57 = vpop.xlane.xlu0 %1117 }
 0x314   : > { %1177 = vadd.xlane.f32.xlu1 %v1176_v47  ;;  %6217 = vst [vmem:[#allocation69_spill] sm:$0xff] %v4512_v57  ;;  %v1311_v47 = vsel %vm6221_vm12, %v1289_v33, 0.0 }
 0x317   : > { %v4520_v38 = vpop.xlane.xlu0 %1123 }
 0x318   : > { %1273 = vadd.xlane.f32.xlu1 %v1272_v3  ;;  %v1293_v3 = vmul.f32 %v4437_v48, %v4379_v59 }
 0x31a   : > { %v1323_v55 = vsel %vm6222_vm14, %v1293_v3, 0.0 }
 0x31c   : > { %1180 = vadd.xlane.f32.xlu1 %v1179_v12  ;;  %v1295_v12 = vmul.f32 %v4437_v48, %v4410_v37  ;;  %v3267_v48 = vld [vmem:[%s3453_s27] sm:$0xff] }
 0x31e   : > { %v1329_v1 = vsel %vm6223_vm15, %v1295_v12, 0.0 }
 0x320   : > { %1276 = vadd.xlane.f32.xlu1 %v1275_v7 }
 0x324   : > { %1297 = vadd.xlane.f32.xlu1 %v1296_v62 }
 0x328   : > { %v4525_v25 = vpop.xlane.xlu0 %1129  ;;  %1306 = vadd.xlane.f32.xlu1 %v1305_v58 }
 0x32c   : > { %v1148_v13 = vpop.xlane.xlu0 %1147  ;;  %1312 = vadd.xlane.f32.xlu1 %v1311_v47 }
 0x330   : > { %v4533_v35 = vpop.xlane.xlu0 %1153  ;;  %1318 = vadd.xlane.f32.xlu1 %v1317_v18  ;;  %v4546_v34 = vpop.xlane.xlu1 %1102 }
 0x331   : > { %6224 = vst [vmem:[#allocation70_spill] sm:$0xff] %v4546_v34 }
 0x334   : > { %v4538_v21 = vpop.xlane.xlu0 %1159  ;;  %1324 = vadd.xlane.f32.xlu1 %v1323_v55  ;;  %v4552_v18 = vpop.xlane.xlu1 %1108 }
 0x335   : > { %6225 = vst [vmem:[#allocation71_spill] sm:$0xff] %v4552_v18 }
 0x338   : > { %v4541_v7 = vpop.xlane.xlu0 %1165  ;;  %1330 = vadd.xlane.f32.xlu1 %v1329_v1 }
 0x33c   : > { %v1199_v56 = vpop.xlane.xlu0 %1198 }
 0x33d   : > { %v4611_v24 = vsub.f32 %v1199_v56, %v4546_v34 }
 0x33f   : > { %6231 = vst [vmem:[#allocation77_spill] sm:$0xff] %v4611_v24  ;;  %v1898_v26 = vmax.f32 %v4611_v24, 1.0 }
 0x340   : > { %v1244_v59 = vpop.xlane.xlu0 %1243 }
 0x341   : > { %v4544_v62 = vsub.f32 %v1244_v59, %v1148_v13  ;;  %v4559_v59 = vpop.xlane.xlu1 %1114 }
 0x342   : > { %6226 = vst [vmem:[#allocation72_spill] sm:$0xff] %v4559_v59 }
 0x343   : > { %v1873_v58 = vmul.f32 0.5, %v4544_v62 }
 0x344   : > { %v4549_v33 = vpop.xlane.xlu0 %1204 }
 0x345   : > { %v1885_v37 = vadd.f32 %v1873_v58, %v1148_v13  ;;  %v1121_v58 = vpop.xlane.xlu1 %1120 }
 0x347   : > { %v1993_v47 = vsub.f32 %v1885_v37, %v3267_v48 }
 0x348   : > { %v4554_v3 = vpop.xlane.xlu0 %1207 }
 0x349   : > { %v2005_v55 = vmul.f32 %v3124_v6, %v1993_v47 }
 0x34b   : > { %v2233_v39 = vsub.f32 %v2005_v55, %v4053_v44 }
 0x34c   : > { %v4557_v12 = vpop.xlane.xlu0 %1210 }
 0x34d   : > { %v2245_v1 = vand.u32 2147483647, %v2233_v39 }
 0x34f   : > { %v2269_v5 = vmul.f32 4.5, %v2245_v1  ;;  %v2980_v23 = vadd.f32 -0.055555556, %v2245_v1  ;;  %vm2257_vm13 = vcmp.le.f32.partialorder %v2245_v1, 0.11111111 }
 0x350   : > { %v4561_v0 = vpop.xlane.xlu0 %1213 }
 0x351   : > { %v2281_v13 = vmul.f32 %v2269_v5, %v2245_v1  ;;  %v4574_v5 = vpop.eup %3125 }
 0x352   : > { %v4591_v54 = vpop.eup %3127 }
 0x353   : > { %v2305_v47 = vsel %vm2257_vm13, %v2281_v13, %v2980_v23 }
 0x354   : > { %v1217_v37 = vpop.xlane.xlu0 %1216  ;;  %2329 = vrot.lane.b32.xlu0 %v2305_v47, %s3346_s11 }
 0x355   : > { %v4564_v29 = vsub.f32 %v1217_v37, %v1121_v58  ;;  %v1127_v37 = vpop.xlane.xlu1 %1126 }
 0x357   : > { %v1856_v55 = vmul.f32 0.5, %v4564_v29 }
 0x358   : > { %v4568_v39 = vpop.xlane.xlu0 %1168 }
 0x359   : > { %v1868_v44 = vadd.f32 %v1856_v55, %v1121_v58 }
 0x35b   : > { %v1928_v43 = vsub.f32 %v1868_v44, %v4571_v53 }
 0x35c   : > { %v4576_v15 = vpop.xlane.xlu0 %1264 }
 0x35d   : > { %v4579_v1 = vmul.f32 %v4574_v5, %v1928_v43 }
 0x35f   : > { %6227 = vst [vmem:[#allocation73_spill] sm:$0xff] %v4579_v1 }
 0x360   : > { %v1223_v23 = vpop.xlane.xlu0 %1222 }
 0x361   : > { %v4582_v13 = vpop.xlane.xlu1 %1132  ;;  %v4584_v47 = vsub.f32 %v1223_v23, %v1127_v37 }
 0x362   : > { %6228 = vst [vmem:[#allocation74_spill] sm:$0xff] %v4582_v13 }
 0x363   : > { %6229 = vst [vmem:[#allocation75_spill] sm:$0xff] %v4584_v47  ;;  %v1858_v58 = vmul.f32 0.5, %v4584_v47 }
 0x365   : > { %v1151_v55 = vpop.xlane.xlu1 %1150  ;;  %v1870_v44 = vadd.f32 %v1858_v58, %v1127_v37  ;;  %v4605_v58 = vld [vmem:[%s3453_s27 + $0x8] sm:$0xff] }
 0x366   : > { %3129 = vrcp.f32 %v4605_v58 }
 0x367   : > { %v1930_v46 = vsub.f32 %v1870_v44, %v4588_v19  ;;  %3131 = vrcp.f32 %v3267_v48 }
 0x368   : > { %3133 = vrcp.f32 %v3927_v50 }
 0x369   : > { %v4593_v43 = vpop.xlane.xlu1 %1156  ;;  %v4596_v42 = vmul.f32 %v4591_v54, %v1930_v46 }
 0x36b   : > { %6230 = vst [vmem:[#allocation76_spill] sm:$0xff] %v4596_v42 }
 0x36d   : > { %v4598_v1 = vpop.xlane.xlu1 %1162 }
 0x370   : > { %v4624_v50 = vpop.eup %3129 }
 0x371   : > { %v1196_v13 = vpop.xlane.xlu1 %1195  ;;  %6234 = vst [vmem:[#allocation80_spill] sm:$0xff] %v4624_v50  ;;  %v2020_v34 = vmul.f32 %v4624_v50, %v1898_v26 }
 0x372   : > { %v4601_v23 = vsub.f32 %v1196_v13, %v4494_v32 }
 0x374   : > { %v1849_v37 = vmul.f32 0.5, %v4601_v23 }
 0x375   : > { %v1202_v44 = vpop.xlane.xlu1 %1201 }
 0x376   : > { %v1861_v8 = vadd.f32 %v1849_v37, %v4494_v32  ;;  %v4616_v28 = vsub.f32 %v1202_v44, %v4499_v10  ;;  %v4621_v32 = vld [vmem:[%s3453_s27 + $0x18] sm:$0xff]  ;;  %v4633_v37 = vld [vmem:[%s3453_s27 + $0x10] sm:$0xff] }
 0x377   : > { %3135 = vrcp.f32 %v4621_v32 }
 0x378   : > { %v1921_v46 = vsub.f32 %v1861_v8, %v3267_v48  ;;  %6233 = vst [vmem:[#allocation79_spill] sm:$0xff] %v4616_v28  ;;  %v1851_v31 = vmul.f32 0.5, %v4616_v28  ;;  %v1909_v48 = vmax.f32 %v4544_v62, 1.0  ;;  %3137 = vrcp.f32 %v3919_v36 }
 0x379   : > { %v1247_v42 = vpop.xlane.xlu1 %1246 }
 0x37a   : > { %v4613_v13 = vmul.f32 %v3124_v6, %v1921_v46  ;;  %v1863_v8 = vadd.f32 %v1851_v31, %v4499_v10  ;;  %v4627_v56 = vsub.f32 %v1247_v42, %v1151_v55  ;;  %v4630_v6 = vpop.eup %3131  ;;  %v4642_v31 = vsub.f32 %v4549_v33, %v4552_v18 }
 0x37b   : > { %v2065_v42 = vmul.f32 %v4630_v6, %v1909_v48  ;;  %v4663_v48 = vsub.f32 %v4554_v3, %v4507_v45 }
 0x37c   : > { %6232 = vst [vmem:[#allocation78_spill] sm:$0xff] %v4613_v13  ;;  %6235 = vst [vmem:[#allocation81_spill] sm:$0xff] %v4627_v56  ;;  %v1923_v44 = vsub.f32 %v1863_v8, %v4633_v37  ;;  %v4636_v13 = vpop.eup %3133  ;;  %v1874_v62 = vmul.f32 0.5, %v4627_v56  ;;  %v4650_v8 = vld [vmem:[%s3453_s27 + $0x20] sm:$0xff]  ;;  %v1900_v36 = vmax.f32 %v4642_v31, 1.0  ;;  %v4755_v56 = vld [vmem:[%s3458_s10 + $0x50] sm:$0xff] }
 0x37d   : > { %v1250_v47 = vpop.xlane.xlu1 %1249  ;;  %6236 = vst [vmem:[#allocation82_spill] sm:$0xff] %v4642_v31  ;;  %3139 = vrcp.f32 %v4650_v8  ;;  %6239 = vst [vmem:[#allocation85_spill] sm:$0xff] %v4663_v48  ;;  %v1901_v3 = vmax.f32 %v4663_v48, 1.0 }
 0x37e   : > { %v4645_v10 = vmul.f32 %v4636_v13, %v1923_v44  ;;  %3141 = vrcp.f32 %v3932_v17  ;;  %v1886_v33 = vadd.f32 %v1874_v62, %v1151_v55  ;;  %v4668_v17 = vld [vmem:[%s3453_s27 + $0x28] sm:$0xff]  ;;  %v4675_v55 = vsub.f32 %v1250_v47, %v4533_v35  ;;  %v4682_v62 = vld [vmem:[%s3453_s27 + $0x30] sm:$0xff]  ;;  %6254 = vst [vmem:[#allocation100_spill] sm:$0xff] %v4755_v56 }
 0x37f   : > { %3143 = vlog2.f32 %v2020_v34  ;;  %v4801_v56 = vld [vmem:[%s3453_s27 + $0x50] sm:$0xff] }
 0x380   : > { %6237 = vst [vmem:[#allocation83_spill] sm:$0xff] %v4645_v10  ;;  %3145 = vrcp.f32 %v3937_v4  ;;  %v1994_v34 = vsub.f32 %v1886_v33, %v4605_v58  ;;  %v4698_v58 = vsub.f32 %v4557_v12, %v4559_v59 }
 0x381   : > { %v1253_v46 = vpop.xlane.xlu1 %1252  ;;  %v4658_v44 = vpop.eup %3135  ;;  %3147 = vlog2.f32 %v2065_v42  ;;  %v1875_v42 = vmul.f32 0.5, %v4675_v55 }
 0x382   : > { %6238 = vst [vmem:[#allocation84_spill] sm:$0xff] %v4658_v44  ;;  %3149 = vrcp.f32 %v4044_v11  ;;  %v2024_v4 = vmul.f32 %v4658_v44, %v1900_v36  ;;  %v4678_v11 = vpop.eup %3137  ;;  %v4692_v47 = vsub.f32 %v1253_v46, %v4593_v43  ;;  %6243 = vst [vmem:[#allocation89_spill] sm:$0xff] %v4698_v58  ;;  %v4738_v44 = vld [vmem:[%s3453_s27 + $0x58] sm:$0xff] }
 0x383   : > { %3151 = vrcp.f32 %v4668_v17  ;;  %6240 = vst [vmem:[#allocation86_spill] sm:$0xff] %v4678_v11  ;;  %v2006_v33 = vmul.f32 %v4678_v11, %v1994_v34  ;;  %v1887_v18 = vadd.f32 %v1875_v42, %v4533_v35  ;;  %v4716_v35 = vsub.f32 %v4561_v0, %v4512_v57  ;;  %v4723_v34 = vld [vmem:[%s3458_s10 + $0x10] sm:$0xff]  ;;  %6251 = vst [vmem:[#allocation97_spill] sm:$0xff] %v4738_v44 }
 0x384   : > { %3153 = vrcp.f32 %v4025_v9  ;;  %6242 = vst [vmem:[#allocation88_spill] sm:$0xff] %v4692_v47  ;;  %6248 = vst [vmem:[#allocation94_spill] sm:$0xff] %v4723_v34  ;;  %v1876_v11 = vmul.f32 0.5, %v4692_v47  ;;  %v1902_v0 = vmax.f32 %v4698_v58, 1.0  ;;  %v4743_v47 = vld [vmem:[%s3458_s10 + $0x30] sm:$0xff] }
 0x385   : > { %v4654_v26 = vpop.xlane.xlu1 %1255  ;;  %3155 = vrcp.f32 %v4071_v41  ;;  %6246 = vst [vmem:[#allocation92_spill] sm:$0xff] %v4716_v35  ;;  %v1995_v42 = vsub.f32 %v1887_v18, %v4633_v37  ;;  %6252 = vst [vmem:[#allocation98_spill] sm:$0xff] %v4743_v47 }
 0x386   : > { %3157 = vrcp.f32 %v4682_v62  ;;  %v1888_v50 = vadd.f32 %v1876_v11, %v4593_v43  ;;  %v1903_v43 = vmax.f32 %v4716_v35, 1.0 }
 0x387   : > { %v4688_v36 = vpop.eup %3139  ;;  %3159 = vrcp.f32 %v4073_v61  ;;  %v4703_v61 = vpop.xlane.xlu0 %1174  ;;  %v2007_v58 = vmul.f32 %v4636_v13, %v1995_v42  ;;  %v4775_v13 = vld [vmem:[%s3453_s27 + $0x40] sm:$0xff] }
 0x388   : > { %6241 = vst [vmem:[#allocation87_spill] sm:$0xff] %v4688_v36  ;;  %v4694_v41 = vpop.eup %3141  ;;  %3161 = vlog2.f32 %v2024_v4  ;;  %v2026_v31 = vmul.f32 %v4688_v36, %v1901_v3  ;;  %v4710_v4 = vld [vmem:[%s3458_s10 + $0x8] sm:$0xff]  ;;  %v4726_v3 = vld [vmem:[%s3458_s10 + $0x20] sm:$0xff]  ;;  %v1996_v35 = vsub.f32 %v1888_v50, %v4621_v32 }
 0x389   : > { %v4665_v10 = vpop.xlane.xlu1 %1258  ;;  %v3144_v45 = vpop.eup %3143  ;;  %3163 = vrcp.f32 %v4273_v20  ;;  %6245 = vst [vmem:[#allocation91_spill] sm:$0xff] %v4710_v4  ;;  %v4720_v20 = vsub.f32 %v4576_v15, %v4568_v39  ;;  %6249 = vst [vmem:[#allocation95_spill] sm:$0xff] %v4726_v3  ;;  %v2234_v15 = vsub.f32 %v2006_v33, %v4040_v52  ;;  %v4752_v52 = vld [vmem:[%s3458_s10 + $0x40] sm:$0xff]  ;;  %v2235_v4 = vsub.f32 %v2007_v58, %v4042_v16 }
 0x38a   : > { %v4705_v46 = vpop.eup %3145  ;;  %3165 = vrcp.f32 %v4571_v53  ;;  %v2044_v24 = vmul.f32 0.6931472, %v3144_v45  ;;  %6253 = vst [vmem:[#allocation99_spill] sm:$0xff] %v4752_v52  ;;  %v4788_v32 = vsub.f32 %v4665_v10, %v4598_v1 }
 0x38b   : > { %6244 = vst [vmem:[#allocation90_spill] sm:$0xff] %v4705_v46  ;;  %v3148_v59 = vpop.eup %3147  ;;  %6247 = vst [vmem:[#allocation93_spill] sm:$0xff] %v4720_v20  ;;  %3167 = vrcp.f32 %v4588_v19  ;;  %v1271_v11 = vpop.xlane.xlu0 %1270  ;;  %v2246_v34 = vand.u32 2147483647, %v2234_v15  ;;  %v4784_v15 = vsub.f32 %v4654_v26, %v4538_v21  ;;  %v4805_v26 = vld [vmem:[%s3458_s10 + $0x18] sm:$0xff] }
 0x38c   : > { %v4730_v48 = vpop.eup %3149  ;;  %3169 = vrcp.f32 %v4738_v44  ;;  %v2078_v36 = vmul.f32 0.6931472, %v3148_v59  ;;  %v1880_v59 = vmul.f32 0.5, %v4720_v20  ;;  %v2414_v33 = vsub.f32 %v2044_v24, %v4046_v30  ;;  %6257 = vst [vmem:[#allocation103_spill] sm:$0xff] %v4788_v32  ;;  %v4793_v20 = vld [vmem:[%s3458_s10] sm:$0xff]  ;;  %6260 = vst [vmem:[#allocation106_spill] sm:$0xff] %v4805_v26 }
 0x38d   : > { %v4686_v9 = vpop.xlane.xlu1 %1261  ;;  %v4735_v57 = vpop.eup %3151  ;;  %3171 = vrcp.f32 %v4633_v37  ;;  %6258 = vst [vmem:[#allocation104_spill] sm:$0xff] %v4793_v20  ;;  %v1877_v47 = vmul.f32 0.5, %v4784_v15  ;;  %v2270_v30 = vmul.f32 4.5, %v2246_v34  ;;  %v2247_v58 = vand.u32 2147483647, %v2235_v4 }
 0x38e   : > { %6250 = vst [vmem:[#allocation96_spill] sm:$0xff] %v4735_v57  ;;  %v4746_v45 = vpop.eup %3153  ;;  %3173 = vlog2.f32 %v2026_v31  ;;  %v2028_v3 = vmul.f32 %v4735_v57, %v1902_v0  ;;  %v2557_v42 = vsub.f32 %v2078_v36, %v4254_v51  ;;  %v4780_v0 = vsub.f32 %v1271_v11, %v4703_v61 }
 0x38f   : > { %v4759_v18 = vpop.eup %3155  ;;  %3175 = vrcp.f32 %v4775_v13  ;;  %v1892_v11 = vadd.f32 %v1880_v59, %v4568_v39  ;;  %v4809_v52 = vand.u32 2147483647, %v2414_v33  ;;  %v1878_v39 = vmul.f32 0.5, %v4788_v32  ;;  %v4816_v59 = vld [vmem:[%s3458_s10 + $0x28] sm:$0xff] }
 0x390   : > { %v4764_v37 = vpop.eup %3157  ;;  %6256 = vst [vmem:[#allocation102_spill] sm:$0xff] %v4780_v0  ;;  %3177 = vrcp.f32 %v4801_v56  ;;  %v1882_v33 = vmul.f32 0.5, %v4780_v0  ;;  %v2282_v32 = vmul.f32 %v2270_v30, %v2246_v34  ;;  %vm2258_vm8 = vcmp.le.f32.partialorder %v2246_v34, 0.11111111 }
 0x391   : > { %v4712_v12 = vpop.xlane.xlu1 %1219  ;;  %6255 = vst [vmem:[#allocation101_spill] sm:$0xff] %v4764_v37  ;;  %v4769_v28 = vpop.eup %3159  ;;  %v2030_v36 = vmul.f32 %v4764_v37, %v1903_v43  ;;  %3179 = vlog2.f32 %v2028_v3  ;;  %v2008_v43 = vmul.f32 %v4705_v46, %v1996_v35  ;;  %v4820_v37 = vand.u32 2147483647, %v2557_v42 }
 0x392   : > { %v3162_v24 = vpop.eup %3161  ;;  %v1889_v3 = vadd.f32 %v1877_v47, %v4538_v21  ;;  %v2000_v35 = vsub.f32 %v1892_v11, %v4571_v53  ;;  %v1890_v46 = vadd.f32 %v1878_v39, %v4598_v1  ;;  %v1904_v42 = vmax.f32 %v4564_v29, 1.0  ;;  %v4887_v21 = vld [vmem:[%s3458_s10 + $0x38] sm:$0xff] }
 0x393   : > { %v4795_v31 = vpop.eup %3163  ;;  %v2048_v57 = vmul.f32 0.6931472, %v3162_v24  ;;  %3181 = vlog2.f32 %v2030_v36  ;;  %v2236_v26 = vsub.f32 %v2008_v43, %v4055_v60  ;;  %v2981_v53 = vadd.f32 -0.055555556, %v2246_v34 }
 0x394   : > { %6259 = vst [vmem:[#allocation105_spill] sm:$0xff] %v4795_v31  ;;  %v4807_v10 = vpop.eup %3165  ;;  %v1997_v0 = vsub.f32 %v1889_v3, %v4650_v8  ;;  %v1998_v36 = vsub.f32 %v1890_v46, %v4668_v17  ;;  %v1894_v4 = vadd.f32 %v1882_v33, %v4703_v61  ;;  %v4843_v29 = vsub.f32 %v4686_v9, %v4541_v7 }
 0x395   : > { %v4757_v44 = vpop.xlane.xlu1 %1171  ;;  %v4818_v16 = vpop.eup %3167  ;;  %v2416_v24 = vsub.f32 %v2048_v57, %v4114_v27  ;;  %v2012_v8 = vmul.f32 %v4574_v5, %v2000_v35  ;;  %v2306_v11 = vsel %vm2258_vm8, %v2282_v32, %v2981_v53  ;;  %v2271_v57 = vmul.f32 4.5, %v2247_v58 }
 0x396   : > { %v4827_v51 = vpop.eup %3169  ;;  %v2009_v1 = vmul.f32 %v4694_v41, %v1997_v0  ;;  %v2593_v17 = vmul.f32 4.5, %v4820_v37  ;;  %v2010_v0 = vmul.f32 %v4746_v45, %v1998_v36  ;;  %2331 = vrot.lane.b32.xlu1 %v2306_v11, %s3346_s11  ;;  %v1879_v9 = vmul.f32 0.5, %v4843_v29 }
 0x397   : > { %v4831_v20 = vpop.eup %3171  ;;  %v2032_v43 = vmul.f32 %v4807_v10, %v1904_v42  ;;  %v2248_v5 = vand.u32 2147483647, %v2236_v26  ;;  %v2283_v32 = vmul.f32 %v2271_v57, %v2247_v58  ;;  %v2982_v33 = vadd.f32 -0.055555556, %v2247_v58 }
 0x398   : > { %v3174_v47 = vpop.eup %3173  ;;  %v2237_v61 = vsub.f32 %v2009_v1, %v4269_v63  ;;  %v2002_v35 = vsub.f32 %v1894_v4, %v4588_v19  ;;  %v1891_v53 = vadd.f32 %v1879_v9, %v4541_v7  ;;  %vm2259_vm12 = vcmp.le.f32.partialorder %v2247_v58, 0.11111111 }
 0x399   : > { %v4790_v50 = vpop.xlane.xlu1 %1267  ;;  %v4845_v30 = vpop.eup %3175  ;;  %v2050_v46 = vmul.f32 0.6931472, %v3174_v47  ;;  %v4862_v36 = vand.u32 2147483647, %v2416_v24  ;;  %v2240_v1 = vsub.f32 %v2012_v8, %v4221_v22  ;;  %v2307_v11 = vsel %vm2259_vm12, %v2283_v32, %v2982_v33 }
 0x39a   : > { %v4855_v34 = vpop.eup %3177  ;;  %v2249_v47 = vand.u32 2147483647, %v2237_v61  ;;  %vm2581_vm1 = vcmp.le.f32.partialorder %v4820_v37, 0.11111111  ;;  %v3004_v42 = vadd.f32 -0.055555556, %v4820_v37  ;;  %v2238_v26 = vsub.f32 %v2010_v0, %v4146_v2  ;;  %2333 = vrot.lane.b32.xlu1 %v2307_v11, %s3346_s11 }
 0x39b   : > { %v4858_v3 = vpop.eup %3179  ;;  %v1999_v57 = vsub.f32 %v1891_v53, %v4682_v62  ;;  %v4872_v19 = vsub.f32 %v4712_v12, %v4520_v38  ;;  %v2605_v7 = vmul.f32 %v2593_v17, %v4820_v37  ;;  %v2417_v24 = vsub.f32 %v2050_v46, %v4276_v14 }
 0x39c   : > { %v1897_v4 = vmax.f32 %v4601_v23, 1.0  ;;  %v2272_v8 = vmul.f32 4.5, %v2248_v5  ;;  %v2273_v61 = vmul.f32 4.5, %v2249_v47  ;;  %3183 = vlog2.f32 %v2032_v43 }
 0x39d   : > { %v4824_v31 = vpop.xlane.xlu1 %1225  ;;  %v4875_v58 = vpop.eup %3181  ;;  %v2014_v62 = vmul.f32 %v4591_v54, %v2002_v35  ;;  %v2011_v9 = vmul.f32 %v4730_v48, %v1999_v57  ;;  %v1857_v12 = vmul.f32 0.5, %v4872_v19  ;;  %v2252_v32 = vand.u32 2147483647, %v2240_v1 }
 0x39e   : > { %v2284_v17 = vmul.f32 %v2272_v8, %v2248_v5  ;;  %v2983_v33 = vadd.f32 -0.055555556, %v2248_v5  ;;  %v2285_v53 = vmul.f32 %v2273_v61, %v2249_v47  ;;  %v2250_v11 = vand.u32 2147483647, %v2238_v26 }
 0x39f   : > { %v2239_v46 = vsub.f32 %v2011_v9, %v4189_v49  ;;  %v1869_v23 = vadd.f32 %v1857_v12, %v4520_v38  ;;  %vm2260_vm14 = vcmp.le.f32.partialorder %v2248_v5, 0.11111111  ;;  %v2018_v43 = vmul.f32 %v4630_v6, %v1897_v4 }
 0x3a0   : > { %v2308_v22 = vsel %vm2260_vm14, %v2284_v17, %v2983_v33  ;;  %v2984_v54 = vadd.f32 -0.055555556, %v2249_v47  ;;  %v4892_v35 = vsub.f32 %v4790_v50, %v4757_v44  ;;  %v2242_v1 = vsub.f32 %v2014_v62, %v4259_v40  ;;  %v6287_v40 = vld [vmem:[#allocation14_spill] sm:$0xff] }
 0x3a1   : > { %v4848_v39 = vpop.xlane.xlu1 %1177  ;;  %v2251_v57 = vand.u32 2147483647, %v2239_v46  ;;  %v1929_v26 = vsub.f32 %v1869_v23, %v4775_v13  ;;  %2335 = vrot.lane.b32.xlu0 %v2308_v22, %s3346_s11  ;;  %vm2261_vm15 = vcmp.le.f32.partialorder %v2249_v47, 0.11111111  ;;  %v2276_v8 = vmul.f32 4.5, %v2252_v32 }
 0x3a2   : > { %v2309_v38 = vsel %vm2261_vm15, %v2285_v53, %v2984_v54  ;;  %v1881_v5 = vmul.f32 0.5, %v4892_v35  ;;  %v4899_v4 = vand.u32 2147483647, %v2417_v24  ;;  %v2274_v9 = vmul.f32 4.5, %v2250_v11 }
 0x3a3   : > { %v4902_v50 = vmul.f32 %v4759_v18, %v1929_v26  ;;  %v4906_v62 = vsel %vm2581_vm1, %v2605_v7, %v3004_v42  ;;  %3185 = vlog2.f32 %v2018_v43  ;;  %v4911_v47 = vsub.f32 %v4824_v31, %v4525_v25 }
 0x3a4   : > { %v1893_v22 = vadd.f32 %v1881_v5, %v4757_v44  ;;  %v2450_v12 = vmul.f32 4.5, %v4809_v52  ;;  %v2254_v17 = vand.u32 2147483647, %v2242_v1  ;;  %v2286_v24 = vmul.f32 %v2274_v9, %v2250_v11 }
 0x3a5   : > { %v4879_v0 = vpop.xlane.xlu1 %1273  ;;  %6261 = vst [vmem:[#allocation107_spill] sm:$0xff] %v4902_v50  ;;  %2337 = vrot.lane.b32.xlu0 %v2309_v38, %s3346_s11  ;;  %v2985_v33 = vadd.f32 -0.055555556, %v2250_v11  ;;  %v2275_v53 = vmul.f32 4.5, %v2251_v57  ;;  %vm2262_vm13 = vcmp.le.f32.partialorder %v2250_v11, 0.11111111  ;;  %v2288_v42 = vmul.f32 %v2276_v8, %v2252_v32 }
 0x3a6   : > { %v2001_v46 = vsub.f32 %v1893_v22, %v4775_v13  ;;  %v1859_v37 = vmul.f32 0.5, %v4911_v47  ;;  %v4917_v7 = vpop.eup %3183  ;;  %v1911_v44 = vmax.f32 %v4675_v55, 1.0  ;;  %v2993_v43 = vadd.f32 -0.055555556, %v4809_v52  ;;  %v6262_v55 = vld [vmem:[#allocation55_spill] sm:$0xff] }
 0x3a7   : > { %v2310_v31 = vsel %vm2262_vm13, %v2286_v24, %v2985_v33  ;;  %v2287_v23 = vmul.f32 %v2275_v53, %v2251_v57  ;;  %v2987_v26 = vadd.f32 -0.055555556, %v2252_v32  ;;  %v2986_v13 = vadd.f32 -0.055555556, %v2251_v57  ;;  %v6263_v53 = vld [vmem:[#allocation93_spill] sm:$0xff] }
 0x3a8   : > { %v2013_v54 = vmul.f32 %v4759_v18, %v2001_v46  ;;  %2339 = vrot.lane.b32.xlu1 %v2310_v31, %s3346_s11  ;;  %v1871_v1 = vadd.f32 %v1859_v37, %v4525_v25  ;;  %vm2264_vm8 = vcmp.le.f32.partialorder %v2252_v32, 0.11111111  ;;  %vm2263_vm12 = vcmp.le.f32.partialorder %v2251_v57, 0.11111111 }
 0x3a9   : > { %v1181_v61 = vpop.xlane.xlu1 %1180  ;;  %v2278_v38 = vmul.f32 4.5, %v2254_v17  ;;  %v4925_v5 = vmul.f32 4.5, %v4862_v36  ;;  %v2312_v22 = vsel %vm2264_vm8, %v2288_v42, %v2987_v26  ;;  %v2311_v24 = vsel %vm2263_vm12, %v2287_v23, %v2986_v13 }
 0x3aa   : > { %v2241_v8 = vsub.f32 %v2013_v54, %v6262_v55  ;;  %v1931_v9 = vsub.f32 %v1871_v1, %v4801_v56  ;;  %v2067_v18 = vmul.f32 %v4831_v20, %v1911_v44  ;;  %2341 = vrot.lane.b32.xlu0 %v2311_v24, %s3346_s11  ;;  %v4933_v33 = vsub.f32 %v4879_v0, %v4848_v39  ;;  %v6265_v1 = vld [vmem:[#allocation79_spill] sm:$0xff] }
 0x3ab   : > { %v2290_v25 = vmul.f32 %v2278_v38, %v2254_v17  ;;  %vm2438_vm1 = vcmp.le.f32.partialorder %v4809_v52, 0.11111111  ;;  %v2052_v57 = vmul.f32 0.6931472, %v4858_v3  ;;  %v1916_v46 = vmax.f32 %v6263_v53, 1.0 }
 0x3ac   : > { %v2253_v37 = vand.u32 2147483647, %v2241_v8  ;;  %v4941_v42 = vmul.f32 %v4769_v28, %v1931_v9  ;;  %2343 = vrot.lane.b32.xlu1 %v2312_v22, %s3346_s11  ;;  %v2989_v44 = vadd.f32 -0.055555556, %v2254_v17  ;;  %v1883_v31 = vmul.f32 0.5, %v4933_v33  ;;  %v6266_v22 = vld [vmem:[#allocation75_spill] sm:$0xff] }
 0x3ad   : > { %v1277_v11 = vpop.xlane.xlu1 %1276  ;;  %v2462_v23 = vmul.f32 %v2450_v12, %v4809_v52  ;;  %v3186_v54 = vpop.eup %3185  ;;  %v1899_v26 = vmax.f32 %v6265_v1, 1.0  ;;  %vm2266_vm14 = vcmp.le.f32.partialorder %v2254_v17, 0.11111111  ;;  %v2453_v13 = vmul.f32 4.5, %v4899_v4  ;;  %v6267_v1 = vld [vmem:[#allocation97_spill] sm:$0xff] }
 0x3ae   : > { %v4935_v32 = vsub.f32 %v1277_v11, %v1181_v61  ;;  %6264 = vst [vmem:[#allocation93_spill] sm:$0xff] %v4941_v42  ;;  %v2277_v3 = vmul.f32 4.5, %v2253_v37  ;;  %3187 = vlog2.f32 %v2067_v18  ;;  %v2314_v11 = vsel %vm2266_vm14, %v2290_v25, %v2989_v44  ;;  %v6268_v18 = vld [vmem:[#allocation62_spill] sm:$0xff] }
 0x3af   : > { %v1895_v38 = vadd.f32 %v1883_v31, %v4848_v39  ;;  %v2072_v9 = vmul.f32 %v4807_v10, %v1916_v46  ;;  %v1906_v24 = vmax.f32 %v6266_v22, 1.0  ;;  %v2988_v12 = vadd.f32 -0.055555556, %v2253_v37  ;;  %v6269_v46 = vld [vmem:[#allocation81_spill] sm:$0xff] }
 0x3b0   : > { %v1884_v0 = vmul.f32 0.5, %v4935_v32  ;;  %2347 = vrot.lane.b32.xlu1 %v2314_v11, %s3346_s11  ;;  %v2289_v53 = vmul.f32 %v2277_v3, %v2253_v37  ;;  %v2042_v6 = vmul.f32 0.6931472, %v3186_v54  ;;  %vm2265_vm15 = vcmp.le.f32.partialorder %v2253_v37, 0.11111111  ;;  %v6272_v11 = vld [vmem:[#allocation105_spill] sm:$0xff] }
 0x3b1   : > { %v2003_v17 = vsub.f32 %v1895_v38, %v4801_v56  ;;  %v2418_v25 = vsub.f32 %v2052_v57, %v6268_v18  ;;  %v2022_v39 = vmul.f32 %v4831_v20, %v1899_v26  ;;  %v1910_v44 = vmax.f32 %v6269_v46, 1.0  ;;  %v4967_v20 = vld [vmem:[%s3458_s10 + $0x48] sm:$0xff] }
 0x3b2   : > { %v1896_v8 = vadd.f32 %v1884_v0, %v1181_v61  ;;  %v1913_v61 = vmax.f32 %v4784_v15, 1.0  ;;  %v2313_v10 = vsel %vm2265_vm15, %v2289_v53, %v2988_v12  ;;  %vm2441_vm13 = vcmp.le.f32.partialorder %v4899_v4, 0.11111111  ;;  %v6271_v26 = vld [vmem:[#allocation58_spill] sm:$0xff]  ;;  %v6275_v12 = vld [vmem:[#allocation88_spill] sm:$0xff] }
 0x3b3   : > { %v2015_v31 = vmul.f32 %v4769_v28, %v2003_v17  ;;  %2345 = vrot.lane.b32.xlu0 %v2313_v10, %s3346_s11  ;;  %v2996_v56 = vadd.f32 -0.055555556, %v4899_v4  ;;  %v2054_v37 = vmul.f32 0.6931472, %v4875_v58  ;;  %v2036_v0 = vmul.f32 %v4818_v16, %v1906_v24  ;;  %v6270_v28 = vld [vmem:[#allocation56_spill] sm:$0xff]  ;;  %v6273_v58 = vld [vmem:[#allocation87_spill] sm:$0xff] }
 0x3b4   : > { %v2004_v42 = vsub.f32 %v1896_v8, %v6267_v1  ;;  %v1915_v57 = vmax.f32 %v4843_v29, 1.0  ;;  %v4971_v15 = vsel %vm2438_vm1, %v2462_v23, %v2993_v43  ;;  %3189 = vlog2.f32 %v2072_v9  ;;  %v6274_v24 = vld [vmem:[#allocation80_spill] sm:$0xff]  ;;  %v6276_v9 = vld [vmem:[#allocation63_spill] sm:$0xff]  ;;  %v6277_v17 = vld [vmem:[#allocation101_spill] sm:$0xff] }
 0x3b5   : > { %v2413_v54 = vsub.f32 %v2042_v6, %v6270_v28  ;;  %v2243_v3 = vsub.f32 %v2015_v31, %v6271_v26  ;;  %v4976_v8 = vand.u32 2147483647, %v2418_v25  ;;  %3191 = vlog2.f32 %v2022_v39  ;;  %v1229_v25 = vpop.xlane.xlu0 %1228 }
 0x3b6   : > { %v2016_v38 = vmul.f32 %v6272_v11, %v2004_v42  ;;  %v2069_v22 = vmul.f32 %v6273_v58, %v1913_v61  ;;  %v2465_v29 = vmul.f32 %v2453_v13, %v4899_v4  ;;  %v2066_v53 = vmul.f32 %v6274_v24, %v1910_v44  ;;  %v6278_v61 = vld [vmem:[#allocation60_spill] sm:$0xff] }
 0x3b7   : > { %v1912_v52 = vmax.f32 %v6275_v12, 1.0  ;;  %v2255_v43 = vand.u32 2147483647, %v2243_v3  ;;  %v2419_v6 = vsub.f32 %v2054_v37, %v6276_v9  ;;  %3193 = vlog2.f32 %v2036_v0  ;;  %v6279_v0 = vld [vmem:[#allocation84_spill] sm:$0xff] }
 0x3b8   : > { %v2071_v1 = vmul.f32 %v6277_v17, %v1915_v57  ;;  %vm2440_vm8 = vcmp.le.f32.partialorder %v4862_v36, 0.11111111  ;;  %v3188_v42 = vpop.eup %3187  ;;  %v2425_v39 = vand.u32 2147483647, %v2413_v54  ;;  %v1905_v13 = vmax.f32 %v4872_v19, 1.0  ;;  %v4994_v19 = vld [vmem:[%s3458_s10 + $0x58] sm:$0xff] }
 0x3b9   : > { %v2244_v10 = vsub.f32 %v2016_v38, %v6278_v61  ;;  %v2279_v46 = vmul.f32 4.5, %v2255_v43  ;;  %v2056_v44 = vmul.f32 0.6931472, %v4917_v7  ;;  %3195 = vlog2.f32 %v2069_v22 }
 0x3ba   : > { %v2464_v31 = vmul.f32 %v4925_v5, %v4862_v36  ;;  %v2995_v37 = vadd.f32 -0.055555556, %v4862_v36  ;;  %3197 = vlog2.f32 %v2066_v53  ;;  %v2068_v57 = vmul.f32 %v6279_v0, %v1912_v52 }
 0x3bb   : > { %v2291_v28 = vmul.f32 %v2279_v46, %v2255_v43  ;;  %v2990_v3 = vadd.f32 -0.055555556, %v2255_v43  ;;  %v2082_v58 = vmul.f32 0.6931472, %v3188_v42  ;;  %3199 = vlog2.f32 %v2071_v1  ;;  %v6281_v42 = vld [vmem:[#allocation64_spill] sm:$0xff] }
 0x3bc   : > { %vm2267_vm12 = vcmp.le.f32.partialorder %v2255_v43, 0.11111111  ;;  %v4998_v54 = vsel %vm2441_vm13, %v2465_v29, %v2996_v56  ;;  %v2034_v7 = vmul.f32 %v4845_v30, %v1905_v13  ;;  %v2256_v38 = vand.u32 2147483647, %v2244_v10  ;;  %v1301_v56 = vpop.xlane.xlu0 %1300  ;;  %v6280_v29 = vld [vmem:[#allocation103_spill] sm:$0xff] }
 0x3bd   : > { %v2315_v5 = vsel %vm2267_vm12, %v2291_v28, %v2990_v3  ;;  %v2449_v22 = vmul.f32 4.5, %v2425_v39  ;;  %v5001_v24 = vand.u32 2147483647, %v2419_v6  ;;  %v1917_v53 = vmax.f32 %v4892_v35, 1.0  ;;  %v6282_v35 = vld [vmem:[#allocation74_spill] sm:$0xff] }
 0x3be   : > { %2349 = vrot.lane.b32.xlu0 %v2315_v5, %s3346_s11  ;;  %v5007_v12 = vsel %vm2440_vm8, %v2464_v31, %v2995_v37  ;;  %v2454_v52 = vmul.f32 4.5, %v4976_v8  ;;  %v3190_v4 = vpop.eup %3189  ;;  %3201 = vlog2.f32 %v2068_v57  ;;  %v1914_v43 = vmax.f32 %v6280_v29, 1.0  ;;  %v6284_v31 = vld [vmem:[#allocation59_spill] sm:$0xff]  ;;  %v6286_v29 = vld [vmem:[#allocation96_spill] sm:$0xff] }
 0x3bf   : > { %v2461_v17 = vmul.f32 %v2449_v22, %v2425_v39  ;;  %v3192_v6 = vpop.eup %3191  ;;  %v2420_v13 = vsub.f32 %v2056_v44, %v6281_v42  ;;  %v5014_v10 = vsub.f32 %v1229_v25, %v6282_v35  ;;  %v1907_v36 = vmax.f32 %v4911_v47, 1.0  ;;  %v6285_v25 = vld [vmem:[#allocation102_spill] sm:$0xff] }
 0x3c0   : > { %v2992_v46 = vadd.f32 -0.055555556, %v2425_v39  ;;  %vm2442_vm1 = vcmp.le.f32.partialorder %v4976_v8, 0.11111111  ;;  %v2559_v37 = vsub.f32 %v2082_v58, %v6284_v31  ;;  %3203 = vlog2.f32 %v2034_v7  ;;  %v1304_v26 = vpop.xlane.xlu0 %1303 }
 0x3c1   : > { %6283 = vst [vmem:[#allocation79_spill] sm:$0xff] %v5014_v10  ;;  %vm2437_vm14 = vcmp.le.f32.partialorder %v2425_v39, 0.11111111  ;;  %v2280_v0 = vmul.f32 4.5, %v2256_v38  ;;  %v3194_v57 = vpop.eup %3193  ;;  %v2073_v28 = vmul.f32 %v4845_v30, %v1917_v53  ;;  %v2455_v5 = vmul.f32 4.5, %v5001_v24 }
 0x3c2   : > { %v2485_v3 = vsel %vm2437_vm14, %v2461_v17, %v2992_v46  ;;  %v5022_v44 = vadd.f32 -0.055555556, %v5001_v24  ;;  %v1918_v22 = vmax.f32 %v6285_v25, 1.0  ;;  %v2046_v47 = vmul.f32 0.6931472, %v3192_v6 }
 0x3c3   : > { %v2070_v1 = vmul.f32 %v6286_v29, %v1914_v43  ;;  %2509 = vrot.lane.b32.xlu0 %v2485_v3, %s3352_s23  ;;  %v2997_v58 = vadd.f32 -0.055555556, %v4976_v8  ;;  %v3196_v39 = vpop.eup %3195  ;;  %v1908_v7 = vmax.f32 %v5014_v10, 1.0  ;;  %v2038_v30 = vmul.f32 %v4855_v34, %v1907_v36 }
 0x3c4   : > { %v2292_v53 = vmul.f32 %v2280_v0, %v2256_v38  ;;  %v2991_v17 = vadd.f32 -0.055555556, %v2256_v38  ;;  %v3198_v46 = vpop.eup %3197  ;;  %v2092_v23 = vmul.f32 0.6931472, %v3190_v4  ;;  %v2571_v61 = vand.u32 2147483647, %v2559_v37 }
 0x3c5   : > { %vm2268_vm15 = vcmp.le.f32.partialorder %v2256_v38, 0.11111111  ;;  %vm2443_vm13 = vcmp.le.f32.partialorder %v5001_v24, 0.11111111  ;;  %v2466_v43 = vmul.f32 %v2454_v52, %v4976_v8  ;;  %v3200_v6 = vpop.eup %3199  ;;  %v5032_v3 = vand.u32 2147483647, %v2420_v13  ;;  %v5060_v8 = vpop.xlane.xlu0 %1309 }
 0x3c6   : > { %3205 = vlog2.f32 %v2073_v28  ;;  %v2316_v25 = vsel %vm2268_vm15, %v2292_v53, %v2991_v17  ;;  %v2467_v29 = vmul.f32 %v2455_v5, %v5001_v24  ;;  %vm1461_vm8 = vcmp.eq.f32.partialorder %v6287_v40, %v1301_v56  ;;  %v6291_v56 = vld [vmem:[#allocation25_spill] sm:$0xff] }
 0x3c7   : > { %v2415_v36 = vsub.f32 %v2046_v47, %v6284_v31  ;;  %v2086_v0 = vmul.f32 0.6931472, %v3196_v39  ;;  %3207 = vlog2.f32 %v2070_v1  ;;  %2653 = vrot.lane.b32.xlu0 %v4906_v62, %s3355_s21  ;;  %2351 = vrot.lane.b32.xlu1 %v2316_v25, %s3346_s11  ;;  %v2074_v38 = vmul.f32 %v4818_v16, %v1918_v22  ;;  %v6288_v62 = vld [vmem:[#allocation30_spill] sm:$0xff]  ;;  %vm5054_vm12 = vmand %vm4081_vm3, %vm1461_vm8 }
 0x3c8   : > { %v2040_v52 = vmul.f32 %v4827_v51, %v1908_v7  ;;  %v2080_v4 = vmul.f32 0.6931472, %v3198_v46  ;;  %3209 = vlog2.f32 %v2038_v30  ;;  %v3202_v13 = vpop.eup %3201  ;;  %v2564_v37 = vsub.f32 %v2092_v23, %v6281_v42  ;;  %v6292_v30 = vld [vmem:[#allocation91_spill] sm:$0xff] }
 0x3c9   : > { %v1920_v28 = vmax.f32 %v4935_v32, 1.0  ;;  %v2595_v31 = vmul.f32 4.5, %v2571_v61  ;;  %v5046_v1 = vsel %vm2442_vm1, %v2466_v43, %v2997_v58  ;;  %v5048_v5 = vmul.f32 0.6931472, %v3194_v57 }
 0x3ca   : > { %vm1462_vm14 = vcmp.eq.f32.partialorder %v6287_v40, %v1304_v26  ;;  %v2090_v23 = vmul.f32 0.6931472, %v3200_v6  ;;  %v2456_v32 = vmul.f32 4.5, %v5032_v3  ;;  %v3204_v42 = vpop.eup %3203  ;;  %v2427_v22 = vand.u32 2147483647, %v2415_v36  ;;  %v6314_v6 = vld [vmem:[#allocation50_spill] sm:$0xff] }
 0x3cb   : > { %v2561_v57 = vsub.f32 %v2086_v0, %v4276_v14  ;;  %v2607_v47 = vmul.f32 %v2595_v31, %v2571_v61  ;;  %v3006_v58 = vadd.f32 -0.055555556, %v2571_v61  ;;  %2511 = vrot.lane.b32.xlu1 %v4971_v15, %s3352_s23  ;;  %3211 = vlog2.f32 %v2040_v52  ;;  %vm5080_vm15 = vmand %vm4099_vm5, %vm1462_vm14 }
 0x3cc   : > { %v2558_v39 = vsub.f32 %v2080_v4, %v6291_v56  ;;  %v2084_v7 = vmul.f32 0.6931472, %v3202_v13  ;;  %vm2583_vm1 = vcmp.le.f32.partialorder %v2571_v61, 0.11111111  ;;  %3213 = vlog2.f32 %v2074_v38  ;;  %v6297_v4 = vld [vmem:[#allocation66_spill] sm:$0xff] }
 0x3cd   : > { %v6293_v53 = vsub.f32 1.0, %v6292_v30  ;;  %v2076_v14 = vmul.f32 %v4827_v51, %v1920_v28  ;;  %v2631_v46 = vsel %vm2583_vm1, %v2607_v47, %v3006_v58  ;;  %v5074_v43 = vand.u32 2147483647, %v2564_v37  ;;  %v6298_v28 = vld [vmem:[#allocation94_spill] sm:$0xff]  ;;  %v6300_v47 = vld [vmem:[#allocation65_spill] sm:$0xff] }
 0x3ce   : > { %v2563_v61 = vsub.f32 %v2090_v23, %v6276_v9  ;;  %v2058_v25 = vmul.f32 0.6931472, %v3204_v42  ;;  %2657 = vrot.lane.b32.xlu0 %v2631_v46, %s3355_s21  ;;  %v5089_v51 = vsel %vm2443_vm13, %v2467_v29, %v5022_v44  ;;  %v2573_v36 = vand.u32 2147483647, %v2561_v57 }
 0x3cf   : > { %v5071_v17 = vsel %vm5054_vm12, %v6292_v30, %v6293_v53  ;;  %v2451_v0 = vmul.f32 4.5, %v2427_v22  ;;  %v5092_v26 = vmul.f32 %v2456_v32, %v5032_v3  ;;  %v5095_v38 = vadd.f32 -0.055555556, %v5032_v3  ;;  %v5111_v32 = vpop.xlane.xlu0 %1315 }
 0x3d0   : > { %v3206_v52 = vpop.eup %3205  ;;  %v2422_v9 = vsub.f32 %v5048_v5, %v6297_v4  ;;  %v5100_v13 = vsub.f32 1.0, %v5071_v17  ;;  %v2570_v37 = vand.u32 2147483647, %v2558_v39  ;;  %v2560_v24 = vsub.f32 %v2084_v7, %v4114_v27 }
 0x3d1   : > { %v3208_v44 = vpop.eup %3207  ;;  %v1653_v29 = vmax.f32 %v5071_v17, 1e-06  ;;  %v6299_v31 = vsub.f32 1.0, %v6298_v28  ;;  %v1919_v5 = vmax.f32 %v4933_v33, 1.0  ;;  %3215 = vlog2.f32 %v2076_v14 }
 0x3d2   : > { %v3210_v42 = vpop.eup %3209  ;;  %v5114_v57 = vand.u32 2147483647, %v2563_v61  ;;  %v2421_v27 = vsub.f32 %v2058_v25, %v6300_v47  ;;  %2517 = vrot.lane.b32.xlu0 %v4998_v54, %s3352_s23  ;;  %v2463_v58 = vmul.f32 %v2451_v0, %v2427_v22  ;;  %v2994_v56 = vadd.f32 -0.055555556, %v2427_v22 }
 0x3d3   : > { %v5109_v23 = vsel %vm5080_vm15, %v6298_v28, %v6299_v31  ;;  %vm1464_vm13 = vcmp.eq.f32.partialorder %v6287_v40, %v5060_v8  ;;  %v2094_v39 = vmul.f32 0.6931472, %v3206_v52  ;;  %vm2439_vm8 = vcmp.le.f32.partialorder %v2427_v22, 0.11111111  ;;  %v1322_v31 = vpop.xlane.xlu0 %1321 }
 0x3d4   : > { %v2597_v7 = vmul.f32 4.5, %v2573_v36  ;;  %v5121_v30 = vand.u32 2147483647, %v2560_v24  ;;  %v2088_v33 = vmul.f32 0.6931472, %v3208_v44  ;;  %v2487_v53 = vsel %vm2439_vm8, %v2463_v58, %v2994_v56  ;;  %vm5151_vm8 = vmand %vm4150_vm6, %vm1464_vm13 }
 0x3d5   : > { %v2594_v17 = vmul.f32 4.5, %v2570_v37  ;;  %v2062_v14 = vmul.f32 0.6931472, %v3210_v42  ;;  %v2075_v46 = vmul.f32 %v4855_v34, %v1919_v5  ;;  %2513 = vrot.lane.b32.xlu1 %v2487_v53, %s3352_s23  ;;  %v3008_v54 = vadd.f32 -0.055555556, %v2573_v36  ;;  %v3212_v25 = vpop.eup %3211 }
 0x3d6   : > { %v2609_v61 = vmul.f32 %v2597_v7, %v2573_v36  ;;  %v5125_v0 = vand.u32 2147483647, %v2421_v27  ;;  %vm2585_vm14 = vcmp.le.f32.partialorder %v2573_v36, 0.11111111  ;;  %v3005_v52 = vadd.f32 -0.055555556, %v2570_v37  ;;  %v3214_v22 = vpop.eup %3213 }
 0x3d7   : > { %v2606_v28 = vmul.f32 %v2594_v17, %v2570_v37  ;;  %v2565_v24 = vsub.f32 %v2094_v39, %v6300_v47  ;;  %vm2582_vm1 = vcmp.le.f32.partialorder %v2570_v37, 0.11111111  ;;  %v2599_v42 = vmul.f32 4.5, %v5114_v57  ;;  %v6301_v47 = vld [vmem:[#allocation67_spill] sm:$0xff]  ;;  %v6342_v17 = vld [vmem:[#allocation42_spill] sm:$0xff] }
 0x3d8   : > { %v2633_v44 = vsel %vm2585_vm14, %v2609_v61, %v3008_v54  ;;  %v5130_v34 = vsub.f32 1.0, %v5109_v23  ;;  %v2562_v5 = vsub.f32 %v2088_v33, %v6268_v18  ;;  %v2596_v36 = vmul.f32 4.5, %v5121_v30 }
 0x3d9   : > { %2661 = vrot.lane.b32.xlu0 %v2633_v44, %s3355_s21  ;;  %v2630_v27 = vsel %vm2582_vm1, %v2606_v28, %v3005_v52  ;;  %v5135_v58 = vand.u32 2147483647, %v2422_v9  ;;  %v2064_v56 = vmul.f32 0.6931472, %v3212_v25  ;;  %v6071_v7 = vmov 0.75   ;;  %v6302_v9 = vld [vmem:[#allocation41_spill] sm:$0xff] }
 0x3da   : > { %v5140_v37 = vsel %vm5054_vm12, 0.25, %v6071_v7  ;;  %v2423_v39 = vsub.f32 %v2062_v14, %v6301_v47  ;;  %2655 = vrot.lane.b32.xlu1 %v2630_v27, %s3355_s21  ;;  %v2096_v53 = vmul.f32 0.6931472, %v3214_v22  ;;  %3217 = vrsqrt.f32 %v5100_v13  ;;  %v6306_v28 = vld [vmem:[#allocation95_spill] sm:$0xff]  ;;  %v1328_v22 = vpop.xlane.xlu0 %1327  ;;  %v5189_v27 = vpop.xlane.xlu1 %1297 }
 0x3db   : > { %v1665_v18 = vmin.f32 %v1653_v29, 1.0  ;;  %v1654_v33 = vmax.f32 %v5109_v23, 1e-06  ;;  %v3216_v16 = vpop.eup %3215  ;;  %v5155_v61 = vand.u32 2147483647, %v2565_v24  ;;  %3219 = vlog2.f32 %v2075_v46  ;;  %v6305_v23 = vld [vmem:[#allocation61_spill] sm:$0xff] }
 0x3dc   : > { %v2611_v14 = vmul.f32 %v2599_v42, %v5114_v57  ;;  %v2457_v54 = vmul.f32 4.5, %v5125_v0  ;;  %3221 = vrsqrt.f32 %v5130_v34  ;;  %vm1466_vm12 = vcmp.eq.f32.partialorder %v6287_v40, %v5111_v32  ;;  %v6308_v42 = vld [vmem:[#allocation43_spill] sm:$0xff] }
 0x3dd   : > { %v5162_v8 = vand.u32 2147483647, %v2562_v5  ;;  %2521 = vrot.lane.b32.xlu0 %v5089_v51, %s3352_s23  ;;  %v2608_v29 = vmul.f32 %v2596_v36, %v5121_v30  ;;  %v2424_v25 = vsub.f32 %v2064_v56, %v6305_v23  ;;  %v6307_v46 = vsub.f32 1.0, %v6306_v28  ;;  %vm5185_vm1 = vmand %vm4175_vm10, %vm1466_vm12 }
 0x3de   : > { %v5175_v24 = vand.u32 2147483647, %v2423_v39  ;;  %2515 = vrot.lane.b32.xlu1 %v5007_v12, %s3352_s23  ;;  %v3010_v32 = vadd.f32 -0.055555556, %v5114_v57  ;;  %v2100_v51 = vmul.f32 0.6931472, %v3216_v16  ;;  %v2469_v12 = vmul.f32 %v2457_v54, %v5125_v0 }
 0x3df   : > { %v5173_v52 = vsel %vm5151_vm8, %v6306_v28, %v6307_v46  ;;  %vm2587_vm14 = vcmp.le.f32.partialorder %v5114_v57, 0.11111111  ;;  %v3007_v44 = vadd.f32 -0.055555556, %v5121_v30  ;;  %vm2584_vm6 = vcmp.le.f32.partialorder %v5121_v30, 0.11111111 }
 0x3e0   : > { %v2635_v36 = vsel %vm2587_vm14, %v2611_v14, %v3010_v32  ;;  %v2601_v56 = vmul.f32 4.5, %v5155_v61  ;;  %v2566_v39 = vsub.f32 %v2096_v53, %v6297_v4  ;;  %vm1470_vm13 = vcmp.eq.f32.partialorder %v6287_v40, %v1328_v22  ;;  %v6311_v53 = vld [vmem:[#allocation98_spill] sm:$0xff] }
 0x3e1   : > { %2665 = vrot.lane.b32.xlu0 %v2635_v36, %s3355_s21  ;;  %v2632_v57 = vsel %vm2584_vm6, %v2608_v29, %v3007_v44  ;;  %v2598_v16 = vmul.f32 4.5, %v5162_v8  ;;  %v5202_v14 = vsel %vm5080_vm15, 0.25, %v6071_v7  ;;  %v5205_v30 = vsub.f32 1.0, %v5173_v52  ;;  %v6317_v44 = vld [vmem:[#allocation53_spill] sm:$0xff]  ;;  %vm5232_vm14 = vmand %vm4233_vm7, %vm1470_vm13  ;;  %v1307_v7 = vpop.xlane.xlu1 %1306 }
 0x3e2   : > { %2659 = vrot.lane.b32.xlu1 %v2632_v57, %s3355_s21  ;;  %v3000_v4 = vadd.f32 -0.055555556, %v5125_v0  ;;  %3223 = vlog2.f32 %v1665_v18  ;;  %v6312_v54 = vsub.f32 1.0, %v6311_v53  ;;  %vm6313_vm6 = vcmp.eq.f32.partialorder %v6287_v40, %v1322_v31 }
 0x3e3   : > { %vm5220_vm15 = vmand %vm4216_vm0, %vm6313_vm6  ;;  %v2568_v32 = vsub.f32 %v2100_v51, %v6305_v23  ;;  %vm2445_vm12 = vcmp.le.f32.partialorder %v5125_v0, 0.11111111  ;;  %v5226_v18 = vand.u32 2147483647, %v2424_v25  ;;  %v2613_v57 = vmul.f32 %v2601_v56, %v5155_v61 }
 0x3e4   : > { %v5214_v29 = vsel %vm5185_vm1, %v6311_v53, %v6312_v54  ;;  %v2493_v31 = vsel %vm2445_vm12, %v2469_v12, %v3000_v4  ;;  %v2459_v53 = vmul.f32 4.5, %v5175_v24  ;;  %vm2444_vm6 = vcmp.le.f32.partialorder %v5032_v3, 0.11111111  ;;  %v3218_v23 = vpop.eup %3217  ;;  %v6320_v4 = vld [vmem:[#allocation99_spill] sm:$0xff] }
 0x3e5   : > { %v5239_v51 = vand.u32 2147483647, %v2566_v39  ;;  %v1666_v25 = vmin.f32 %v1654_v33, 1.0  ;;  %2525 = vrot.lane.b32.xlu0 %v2493_v31, %s3352_s23  ;;  %v2610_v22 = vmul.f32 %v2598_v16, %v5162_v8  ;;  %v3220_v12 = vpop.eup %3219  ;;  %3225 = vrsqrt.f32 %v5205_v30  ;;  %v6322_v31 = vld [vmem:[#allocation100_spill] sm:$0xff] }
 0x3e6   : > { %v5248_v56 = vsub.f32 1.0, %v5214_v29  ;;  %v6321_v39 = vsub.f32 1.0, %v6320_v4  ;;  %2519 = vrot.lane.b32.xlu1 %v5046_v1, %s3352_s23  ;;  %v3012_v33 = vadd.f32 -0.055555556, %v5155_v61  ;;  %v3222_v16 = vpop.eup %3221  ;;  %v6323_v0 = vsub.f32 1.0, %v6322_v31 }
 0x3e7   : > { %v5267_v11 = vand.u32 2147483647, %v2568_v32  ;;  %vm2589_vm13 = vcmp.le.f32.partialorder %v5155_v61, 0.11111111  ;;  %vm2586_vm12 = vcmp.le.f32.partialorder %v5162_v8, 0.11111111  ;;  %v2471_v1 = vmul.f32 %v2459_v53, %v5175_v24 }
 0x3e8   : > { %v5255_v54 = vsel %vm5220_vm15, %v6320_v4, %v6321_v39  ;;  %v5265_v28 = vsel %vm5232_vm14, %v6322_v31, %v6323_v0  ;;  %v3009_v4 = vadd.f32 -0.055555556, %v5162_v8  ;;  %v2637_v39 = vsel %vm2589_vm13, %v2613_v57, %v3012_v33 }
 0x3e9   : > { %v2460_v50 = vmul.f32 4.5, %v5226_v18  ;;  %v1552_v55 = vmul.f32 %v3218_v23, %v5100_v13  ;;  %v2098_v0 = vmul.f32 0.6931472, %v3220_v12  ;;  %2669 = vrot.lane.b32.xlu0 %v2637_v39, %s3355_s21  ;;  %v2600_v61 = vmul.f32 4.5, %v5074_v43 }
 0x3ea   : > { %v2634_v32 = vsel %vm2586_vm12, %v2610_v22, %v3009_v4  ;;  %v1559_v57 = vmul.f32 %v3222_v16, %v5130_v34  ;;  %v5281_v8 = vsub.f32 1.0, %v5255_v54  ;;  %vm1460_vm13 = vcmp.eq.f32.partialorder %v6287_v40, %v5189_v27  ;;  %v5293_v22 = vpop.xlane.xlu1 %1312 }
 0x3eb   : > { %2663 = vrot.lane.b32.xlu1 %v2634_v32, %s3355_s21  ;;  %v3002_v53 = vadd.f32 -0.055555556, %v5175_v24  ;;  %3227 = vlog2.f32 %v1666_v25  ;;  %v1656_v23 = vmax.f32 %v5173_v52, 1e-06  ;;  %v5289_v12 = vsub.f32 1.0, %v5265_v28  ;;  %vm5302_vm0 = vmand %vm4091_vm4, %vm1460_vm13 }
 0x3ec   : > { %vm2447_vm12 = vcmp.le.f32.partialorder %v5175_v24, 0.11111111  ;;  %3229 = vrsqrt.f32 %v5248_v56  ;;  %v2472_v16 = vmul.f32 %v2460_v50, %v5226_v18  ;;  %v2604_v27 = vmul.f32 4.5, %v5267_v11  ;;  %v5297_v31 = vpop.eup %3223 }
 0x3ed   : > { %v2495_v33 = vsel %vm2447_vm12, %v2471_v1, %v3002_v53  ;;  %v2567_v25 = vsub.f32 %v2098_v0, %v6301_v47  ;;  %v2492_v24 = vsel %vm2444_vm6, %v5092_v26, %v5095_v38  ;;  %v2612_v50 = vmul.f32 %v2600_v61, %v5074_v43 }
 0x3ee   : > { %2529 = vrot.lane.b32.xlu0 %v2495_v33, %s3352_s23  ;;  %v2458_v39 = vmul.f32 4.5, %v5135_v58  ;;  %vm6327_vm12 = vcmp.eq.f32.partialorder %v5100_v13, inf  ;;  %vm6328_vm13 = vcmp.eq.f32.partialorder %v5130_v34, inf  ;;  %3231 = vrsqrt.f32 %v5281_v8 }
 0x3ef   : > { %v1554_v47 = vsel %vm6327_vm12, %v5100_v13, %v1552_v55  ;;  %v1561_v1 = vsel %vm6328_vm13, %v5130_v34, %v1559_v57  ;;  %2523 = vrot.lane.b32.xlu1 %v2492_v24, %s3352_s23  ;;  %v3003_v0 = vadd.f32 -0.055555556, %v5226_v18  ;;  %3233 = vrsqrt.f32 %v5289_v12  ;;  %v3226_v26 = vpop.eup %3225  ;;  %v6329_v55 = vld [vmem:[#allocation104_spill] sm:$0xff] }
 0x3f0   : > { %vm1463_vm6 = vcmp.eq.f32.partialorder %v6287_v40, %v1307_v7  ;;  %vm2448_vm10 = vcmp.le.f32.partialorder %v5226_v18, 0.11111111  ;;  %v3011_v3 = vadd.f32 -0.055555556, %v5074_v43  ;;  %v6330_v38 = vsub.f32 1.0, %v6329_v55 }
 0x3f1   : > { %v2496_v61 = vsel %vm2448_vm10, %v2472_v16, %v3003_v0  ;;  %vm2588_vm12 = vcmp.le.f32.partialorder %v5074_v43, 0.11111111  ;;  %v2616_v57 = vmul.f32 %v2604_v27, %v5267_v11  ;;  %v5335_v53 = vand.u32 2147483647, %v2567_v25  ;;  %v6335_v25 = vld [vmem:[#allocation38_spill] sm:$0xff] }
 0x3f2   : > { %v5331_v32 = vsel %vm5302_vm0, %v6329_v55, %v6330_v38  ;;  %2531 = vrot.lane.b32.xlu0 %v2496_v61, %s3352_s23  ;;  %v2636_v18 = vsel %vm2588_vm12, %v2612_v50, %v3011_v3  ;;  %v2470_v33 = vmul.f32 %v2458_v39, %v5135_v58  ;;  %v2602_v24 = vmul.f32 4.5, %v5239_v51  ;;  %vm5352_vm12 = vmand %vm4137_vm11, %vm1463_vm6  ;;  %v1319_v39 = vpop.xlane.xlu1 %1318  ;;  %v6338_v38 = vld [vmem:[#allocation106_spill] sm:$0xff] }
 0x3f3   : > { %v6331_v35 = vand.u32 2147483648, %v5100_v13  ;;  %vm6332_vm13 = vcmp.eq.f32.partialorder %v5100_v13, 0.0  ;;  %v6333_v16 = vand.u32 2147483648, %v5130_v34  ;;  %vm6334_vm10 = vcmp.eq.f32.partialorder %v5130_v34, 0.0  ;;  %2667 = vrot.lane.b32.xlu1 %v2636_v18, %s3355_s21 }
 0x3f4   : > { %v1668_v27 = vmin.f32 %v1656_v23, 1.0  ;;  %v3015_v0 = vadd.f32 -0.055555556, %v5267_v11  ;;  %v3001_v23 = vadd.f32 -0.055555556, %v5135_v58  ;;  %v5363_v7 = vsub.f32 1.0, %v5331_v32 }
 0x3f5   : > { %v1557_v55 = vsel %vm6332_vm13, %v6331_v35, %v1554_v47  ;;  %v1564_v43 = vsel %vm6334_vm10, %v6333_v16, %v1561_v1  ;;  %v1573_v35 = vmul.f32 %v3226_v26, %v5205_v30  ;;  %v1658_v47 = vmax.f32 %v5214_v29, 1e-06  ;;  %v5368_v3 = vpop.eup %3227 }
 0x3f6   : > { %vm2592_vm13 = vcmp.le.f32.partialorder %v5267_v11, 0.11111111  ;;  %vm2446_vm10 = vcmp.le.f32.partialorder %v5135_v58, 0.11111111  ;;  %v6339_v61 = vsub.f32 1.0, %v6338_v38  ;;  %v2614_v26 = vmul.f32 %v2602_v24, %v5239_v51  ;;  %v3230_v16 = vpop.eup %3229 }
 0x3f7   : > { %v2640_v1 = vsel %vm2592_vm13, %v2616_v57, %v3015_v0  ;;  %v2494_v11 = vsel %vm2446_vm10, %v2470_v33, %v3001_v23  ;;  %v2603_v18 = vmul.f32 4.5, %v5335_v53  ;;  %v1629_v57 = vmul.f32 %v1557_v55, %v5100_v13 }
 0x3f8   : > { %v5375_v29 = vsel %vm5352_vm12, %v6338_v38, %v6339_v61  ;;  %2675 = vrot.lane.b32.xlu0 %v2640_v1, %s3355_s21  ;;  %v6340_v58 = vmov 0.75   ;;  %2527 = vrot.lane.b32.xlu1 %v2494_v11, %s3352_s23  ;;  %v1630_v33 = vmul.f32 %v1564_v43, %v5130_v34  ;;  %v1577_v24 = vand.u32 2147483648, %v5205_v30  ;;  %v3232_v1 = vpop.eup %3231  ;;  %v1325_v43 = vpop.xlane.xlu1 %1324  ;;  %v6378_v34 = vld [vmem:[#allocation17_spill] sm:$0xff] }
 0x3f9   : > { %v5386_v0 = vsel %vm5151_vm8, 0.25, %v6340_v58  ;;  %3235 = vlog2.f32 %v1668_v27  ;;  %v3013_v23 = vadd.f32 -0.055555556, %v5239_v51  ;;  %v1670_v13 = vmin.f32 %v1658_v47, 1.0  ;;  %v3234_v27 = vpop.eup %3233 }
 0x3fa   : > { %3237 = vrsqrt.f32 %v5363_v7  ;;  %v5394_v55 = vsub.f32 1.0, %v5375_v29  ;;  %vm6341_vm8 = vcmp.eq.f32.partialorder %v6287_v40, %v5293_v22  ;;  %vm6343_vm10 = vnez %v6342_v17 }
 0x3fb   : > { %vm5401_vm6 = vmand %vm6343_vm10, %vm6341_vm8  ;;  %vm2590_vm13 = vcmp.le.f32.partialorder %v5239_v51, 0.11111111  ;;  %vm6346_vm7 = vcmp.eq.f32.partialorder %v5205_v30, inf  ;;  %vm1467_vm11 = vcmp.eq.f32.partialorder %v6287_v40, %v1319_v39  ;;  %v2615_v22 = vmul.f32 %v2603_v18, %v5335_v53 }
 0x3fc   : > { %v1575_v47 = vsel %vm6346_vm7, %v5205_v30, %v1573_v35  ;;  %v2638_v38 = vsel %vm2590_vm13, %v2614_v26, %v3013_v23  ;;  %v5412_v61 = vmul.f32 %v5140_v37, %v1629_v57  ;;  %v1587_v11 = vmul.f32 %v3230_v16, %v5248_v56  ;;  %v3279_v26 = vld [vmem:[%s3458_s10 + $0x28] sm:$0xff]  ;;  %s3358_s10 = smov 122  }
 0x3fd   : > { %v5419_v51 = vsel %vm5185_vm1, 0.25, %v6340_v58  ;;  %2671 = vrot.lane.b32.xlu1 %v2638_v38, %s3355_s21  ;;  %v1591_v35 = vand.u32 2147483648, %v5248_v56  ;;  %v6347_v18 = vsub.f32 1.0, %v4816_v59  ;;  %v3014_v16 = vadd.f32 -0.055555556, %v5335_v53  ;;  %v6349_v23 = vld [vmem:[#allocation47_spill] sm:$0xff] }
 0x3fe   : > { %vm6348_vm13 = vcmp.eq.f32.partialorder %v5205_v30, 0.0  ;;  %v1601_v57 = vmul.f32 %v3232_v1, %v5281_v8  ;;  %3239 = vrsqrt.f32 %v5394_v55  ;;  %vm6350_vm1 = vnez %v6349_v23 }
 0x3ff   : > { %v5429_v37 = vsel %vm5401_vm6, %v3279_v26, %v6347_v18  ;;  %v1578_v5 = vsel %vm6348_vm13, %v1577_v24, %v1575_v47  ;;  %vm5440_vm7 = vmand %vm6350_vm1, %vm1467_vm11  ;;  %v6351_v38 = vmov 0  ;;  %vm2591_vm8 = vcmp.le.f32.partialorder %v5335_v53, 0.11111111  ;;  %v1331_v53 = vpop.xlane.xlu1 %1330 }
 0x400   : > { %v6352_v38 = vsel %vm5440_vm7, 4294967295, %v6351_v38  ;;  %v5446_v59 = vmul.f32 %v5202_v14, %v1630_v33  ;;  %3241 = vlog2.f32 %v1670_v13  ;;  %vm1469_vm13 = vcmp.eq.f32.partialorder %v6287_v40, %v1325_v43 }
 0x401   : > { %v2639_v24 = vsel %vm2591_vm8, %v2615_v22, %v3014_v16  ;;  %vm6353_vm10 = vcmp.eq.f32.partialorder %v5248_v56, inf  ;;  %v1648_v39 = vsel %vm5220_vm15, 0.25, %v6340_v58  ;;  %v1615_v47 = vmul.f32 %v3234_v27, %v5289_v12 }
 0x402   : > { %v1589_v1 = vsel %vm6353_vm10, %v5248_v56, %v1587_v11  ;;  %v5457_v26 = vsub.f32 1.0, %v5429_v37  ;;  %2673 = vrot.lane.b32.xlu1 %v2639_v24, %s3355_s21  ;;  %v1632_v14 = vmul.f32 %v1578_v5, %v5205_v30  ;;  %vm1602_vm11 = vcmp.eq.f32.partialorder %v5281_v8, inf  ;;  %vm5478_vm10 = vmand %vm4225_vm2, %vm1469_vm13 }
 0x403   : > { %v1652_v33 = vmax.f32 %v5331_v32, 1e-06  ;;  %v6354_v13 = vsub.f32 1.0, %v4887_v21  ;;  %v1603_v27 = vsel %vm1602_vm11, %v5281_v8, %v1601_v57  ;;  %vm1604_vm15 = vcmp.eq.f32.partialorder %v5281_v8, 0.0  ;;  %v5482_v18 = vpop.eup %3235 }
 0x404   : > { %v1605_v22 = vand.u32 2147483648, %v5281_v8  ;;  %v1660_v11 = vmax.f32 %v5255_v54, 1e-06  ;;  %vm6358_vm8 = vcmp.eq.f32.partialorder %v5248_v56, 0.0  ;;  %vm1616_vm11 = vcmp.eq.f32.partialorder %v5289_v12, inf  ;;  %v6359_v54 = vld [vmem:[#allocation10_spill] sm:$0xff]  ;;  %v3238_v43 = vpop.eup %3237 }
 0x405   : > { %v5468_v46 = vsel %vm5440_vm7, %v4887_v21, %v6354_v13  ;;  %v1592_v21 = vsel %vm6358_vm8, %v1591_v35, %v1589_v1  ;;  %v1662_v16 = vmax.f32 %v5265_v28, 1e-06  ;;  %vm1471_vm1 = vcmp.eq.f32.partialorder %v6287_v40, %v1331_v53 }
 0x406   : > { %vm1396_vm7 = vcmp.lt.f32.partialorder %v6359_v54, 0.4  ;;  %v1617_v5 = vsel %vm1616_vm11, %v5289_v12, %v1615_v47  ;;  %v1619_v57 = vand.u32 2147483648, %v5289_v12  ;;  %3243 = vrsqrt.f32 %v5457_v26 }
 0x407   : > { %v5494_v24 = vsub.f32 1.0, %v5468_v46  ;;  %v1606_v13 = vsel %vm1604_vm15, %v1605_v22, %v1603_v27  ;;  %v1664_v35 = vmin.f32 %v1652_v33, 1.0  ;;  %v1655_v1 = vmax.f32 %v5375_v29, 1e-06  ;;  %vm5513_vm15 = vmand %vm4245_vm9, %vm1471_vm1 }
 0x408   : > { %v6360_v28 = vsub.f32 1.0, %v4967_v20  ;;  %v5505_v47 = vmul.f32 %v5386_v0, %v1632_v14  ;;  %v1634_v2 = vmul.f32 %v1592_v21, %v5248_v56  ;;  %v1672_v49 = vmin.f32 %v1660_v11, 1.0  ;;  %v6364_v56 = vld [vmem:[#allocation13_spill] sm:$0xff]  ;;  %v3240_v22 = vpop.eup %3239 }
 0x409   : > { %vm1618_vm13 = vcmp.eq.f32.partialorder %v5289_v12, 0.0  ;;  %v1674_v0 = vmin.f32 %v1662_v16, 1.0  ;;  %v1545_v14 = vmul.f32 %v3238_v43, %v5363_v7  ;;  %v1636_v11 = vmul.f32 %v1606_v13, %v5281_v8 }
 0x40a   : > { %v5502_v10 = vsel %vm5478_vm10, %v4967_v20, %v6360_v28  ;;  %v1620_v27 = vsel %vm1618_vm13, %v1619_v57, %v1617_v5  ;;  %v1650_v20 = vsel %vm5232_vm14, 0.25, %v6340_v58  ;;  %3245 = vrsqrt.f32 %v5494_v24  ;;  %v3242_v21 = vpop.eup %3241 }
 0x40b   : > { %v5525_v40 = vsub.f32 1.0, %v5502_v10  ;;  %v1679_v53 = vmul.f32 0.6931472, %v5297_v31  ;;  %3247 = vlog2.f32 %v1664_v35  ;;  %v1667_v5 = vmin.f32 %v1655_v1, 1.0  ;;  %v6366_v35 = vld [vmem:[#allocation15_spill] sm:$0xff] }
 0x40c   : > { %v1657_v36 = vmax.f32 %v5429_v37, 1e-06  ;;  %v6365_v16 = vsub.f32 1.0, %v4994_v19  ;;  %v5537_v8 = vmul.f32 %v5419_v51, %v1634_v2  ;;  %3249 = vlog2.f32 %v1672_v49 }
 0x40d   : > { %v1638_v57 = vmul.f32 %v1620_v27, %v5289_v12  ;;  %vm1546_vm14 = vcmp.eq.f32.partialorder %v5363_v7, inf  ;;  %3251 = vlog2.f32 %v1674_v0  ;;  %v1566_v37 = vmul.f32 %v3240_v22, %v5394_v55 }
 0x40e   : > { %v5534_v43 = vsel %vm5513_vm15, %v4994_v19, %v6365_v16  ;;  %v1547_v31 = vsel %vm1546_vm14, %v5363_v7, %v1545_v14  ;;  %v1659_v13 = vmax.f32 %v5468_v46, 1e-06  ;;  %3253 = vrsqrt.f32 %v5525_v40  ;;  %v6367_v46 = vld [vmem:[#allocation27_spill] sm:$0xff] }
 0x40f   : > { %v5547_v19 = vsub.f32 1.0, %v5534_v43  ;;  %v1701_v2 = vsub.f32 0.0, %v1679_v53  ;;  %v1681_v49 = vmul.f32 0.6931472, %v5368_v3  ;;  %v5550_v12 = vmul.f32 %v1648_v39, %v1636_v11  ;;  %v6371_v11 = vld [vmem:[#allocation16_spill] sm:$0xff] }
 0x410   : > { %v1549_v51 = vand.u32 2147483648, %v5363_v7  ;;  %3255 = vlog2.f32 %v1667_v5  ;;  %v1669_v1 = vmin.f32 %v1657_v36, 1.0  ;;  %v3244_v28 = vpop.eup %3243  ;;  %v5553_v27 = vmul.f32 %v1650_v20, %v1638_v57  ;;  %v6373_v57 = vld [vmem:[#allocation29_spill] sm:$0xff] }
 0x411   : > { %vm1548_vm11 = vcmp.eq.f32.partialorder %v5363_v7, 0.0  ;;  %vm1567_vm13 = vcmp.eq.f32.partialorder %v5394_v55, inf  ;;  %vm6368_vm14 = vcmp.lt.s32.totalorder %v6367_v46, 256  ;;  %v1725_v3 = vmul.f32 %v5412_v61, %v1701_v2 }
 0x412   : > { %vm5561_vm1 = vmand %vm1396_vm7, %vm6368_vm14  ;;  %v1550_v39 = vsel %vm1548_vm11, %v1549_v51, %v1547_v31  ;;  %v1640_v20 = vsel %vm5302_vm0, 0.25, %v6340_v58  ;;  %v1568_v14 = vsel %vm1567_vm13, %v5394_v55, %v1566_v37  ;;  %v1671_v22 = vmin.f32 %v1659_v13, 1.0 }
 0x413   : > { %vm1401_vm8 = vcmp.lt.f32.partialorder %v6371_v11, 0.4  ;;  %v1661_v53 = vmax.f32 %v5502_v10, 1e-06  ;;  %3257 = vrsqrt.f32 %v5547_v19  ;;  %v1702_v54 = vsub.f32 0.0, %v1681_v49  ;;  %vm1497_vm0 = vmor %vm4081_vm3, %vm5561_vm1  ;;  %v6372_v10 = vld [vmem:[#allocation12_spill] sm:$0xff] }
 0x414   : > { %v1685_v5 = vmul.f32 0.6931472, %v5482_v18  ;;  %v1570_v36 = vand.u32 2147483648, %v5394_v55  ;;  %v1643_v61 = vsel %vm5352_vm12, 0.25, %v6340_v58  ;;  %v1580_v52 = vmul.f32 %v3244_v28, %v5457_v26  ;;  %v3246_v16 = vpop.eup %3245 }
 0x415   : > { %3259 = vlog2.f32 %v1669_v1  ;;  %vm1569_vm11 = vcmp.eq.f32.partialorder %v5394_v55, 0.0  ;;  %v5588_v18 = vsel %vm5401_vm6, 0.25, %v6340_v58  ;;  %v1761_v50 = vsel %vm1497_vm0, %v1725_v3, 0.0  ;;  %v3248_v13 = vpop.eup %3247 }
 0x416   : > { %vm6374_vm12 = vcmp.lt.s32.totalorder %v6373_v57, 256  ;;  %vm6375_vm13 = vcmp.lt.f32.partialorder %v6364_v56, 0.4  ;;  %v1726_v37 = vmul.f32 %v5446_v59, %v1702_v54  ;;  %v1628_v2 = vmul.f32 %v1550_v39, %v5363_v7  ;;  %v3250_v51 = vpop.eup %3249  ;;  %v6380_v39 = vld [vmem:[#allocation19_spill] sm:$0xff]  ;;  %v6386_v57 = vld [vmem:[#allocation18_spill] sm:$0xff] }
 0x417   : > { %vm5594_vm14 = vmand %vm6375_vm13, %vm6374_vm12  ;;  %v1571_v49 = vsel %vm1569_vm11, %v1570_v36, %v1568_v14  ;;  %vm1581_vm1 = vcmp.eq.f32.partialorder %v5457_v26, inf  ;;  %vm1583_vm6 = vcmp.eq.f32.partialorder %v5457_v26, 0.0  ;;  %3261 = vlog2.f32 %v1671_v22  ;;  %v3252_v46 = vpop.eup %3251 }
 0x418   : > { %v1673_v1 = vmin.f32 %v1661_v53, 1.0  ;;  %v1704_v56 = vsub.f32 0.0, %v1685_v5  ;;  %v1689_v28 = vmul.f32 0.6931472, %v3242_v21  ;;  %v1582_v0 = vsel %vm1581_vm1, %v5457_v26, %v1580_v52  ;;  %vm1498_vm11 = vmor %vm4099_vm5, %vm5594_vm14  ;;  %v3254_v14 = vpop.eup %3253  ;;  %v6381_v53 = vld [vmem:[#allocation35_spill] sm:$0xff] }
 0x419   : > { %v1594_v59 = vmul.f32 %v3246_v16, %v5494_v24  ;;  %v1663_v3 = vmax.f32 %v5534_v43, 1e-06  ;;  %vm6379_vm12 = vcmask 64512   ;;  %v1584_v22 = vand.u32 2147483648, %v5457_v26  ;;  %v5657_v43 = vpop.permute.xlu0 %2329 }
 0x41a   : > { %v1775_v7 = vsel %vm6379_vm12, %v1761_v50, 0.0  ;;  %v1762_v21 = vsel %vm1498_vm11, %v1726_v37, 0.0  ;;  %vm6382_vm1 = vcmp.lt.s32.totalorder %v6381_v53, 256  ;;  %vm6383_vm0 = vcmp.lt.f32.partialorder %v6366_v35, 0.4  ;;  %v3256_v36 = vpop.eup %3255 }
 0x41b   : > { %1776 = vadd.xlane.f32.xlu0 %v1775_v7  ;;  %vm5617_vm7 = vmand %vm6383_vm0, %vm6382_vm1  ;;  %v1728_v54 = vmul.f32 %v5505_v47, %v1704_v56  ;;  %v1677_v5 = vmul.f32 0.6931472, %v3248_v13  ;;  %v1712_v52 = vmul.f32 %v1640_v20, %v1628_v2  ;;  %v1631_v16 = vmul.f32 %v1571_v49, %v5394_v55  ;;  %v6389_v49 = vld [vmem:[#allocation37_spill] sm:$0xff] }
 0x41c   : > { %vm1595_vm14 = vcmp.eq.f32.partialorder %v5494_v24, inf  ;;  %v1598_v50 = vand.u32 2147483648, %v5494_v24  ;;  %v1585_v35 = vsel %vm1583_vm6, %v1584_v22, %v1582_v0  ;;  %3263 = vlog2.f32 %v1673_v1  ;;  %vm6387_vm0 = vmmov %vm6379_vm12  ;;  %v6393_v22 = vld [vmem:[#allocation28_spill] sm:$0xff] }
 0x41d   : > { %v1706_v31 = vsub.f32 0.0, %v1689_v28  ;;  %v1693_v37 = vmul.f32 0.6931472, %v3250_v51  ;;  %v1596_v7 = vsel %vm1595_vm14, %v5494_v24, %v1594_v59  ;;  %v1608_v47 = vmul.f32 %v3254_v14, %v5525_v40  ;;  %v3258_v55 = vpop.eup %3257  ;;  %v6413_v51 = vld [vmem:[#allocation48_spill] sm:$0xff] }
 0x41e   : > { %v1675_v13 = vmin.f32 %v1663_v3, 1.0  ;;  %v1778_v20 = vsel %vm6387_vm0, %v1762_v21, 0.0  ;;  %vm6388_vm11 = vnez %v6302_v9  ;;  %vm6390_vm6 = vcmp.lt.s32.totalorder %v6389_v49, 256 }
 0x41f   : > { %vm1500_vm1 = vmor %vm6388_vm11, %vm5617_vm7  ;;  %1779 = vadd.xlane.f32.xlu0 %v1778_v20  ;;  %v1730_v1 = vmul.f32 %v5537_v8, %v1706_v31  ;;  %v1700_v56 = vsub.f32 0.0, %v1677_v5  ;;  %v1683_v28 = vmul.f32 0.6931472, %v3256_v36  ;;  %v3260_v0 = vpop.eup %3259  ;;  %v1715_v59 = vmul.f32 %v1643_v61, %v1631_v16  ;;  %v6400_v36 = vld [vmem:[#allocation44_spill] sm:$0xff] }
 0x420   : > { %v1764_v2 = vsel %vm1500_vm1, %v1728_v54, 0.0  ;;  %vm5639_vm12 = vmand %vm1401_vm8, %vm6390_vm6  ;;  %v1633_v3 = vmul.f32 %v1585_v35, %v5457_v26  ;;  %vm1597_vm7 = vcmp.eq.f32.partialorder %v5494_v24, 0.0  ;;  %vm1609_vm14 = vcmp.eq.f32.partialorder %v5525_v40, inf }
 0x421   : > { %v1599_v14 = vsel %vm1597_vm7, %v1598_v50, %v1596_v7  ;;  %vm6394_vm0 = vcmp.lt.s32.totalorder %v6393_v22, 256  ;;  %vm6395_vm8 = vcmp.lt.f32.partialorder %v6372_v10, 0.4  ;;  %v1724_v8 = vmul.f32 %v1712_v52, %v1700_v56  ;;  %v3262_v10 = vpop.eup %3261  ;;  %v6405_v7 = vld [vmem:[#allocation31_spill] sm:$0xff]  ;;  %v5719_v22 = vpop.permute.xlu1 %2331 }
 0x422   : > { %vm5651_vm1 = vmand %vm6395_vm8, %vm6394_vm0  ;;  %v1708_v21 = vsub.f32 0.0, %v1693_v37  ;;  %v1697_v53 = vmul.f32 0.6931472, %v3252_v46  ;;  %v1610_v61 = vsel %vm1609_vm14, %v5525_v40, %v1608_v47  ;;  %v1622_v26 = vmul.f32 %v3258_v55, %v5547_v19  ;;  %v5691_v55 = vpop.permute.xlu0 %2335 }
 0x423   : > { %3265 = vlog2.f32 %v1675_v13  ;;  %vm6398_vm6 = vcmask 64512   ;;  %vm6399_vm7 = vnez %v6308_v42  ;;  %vm6401_vm8 = vcmp.lt.s32.totalorder %v6400_v36, 256 }
 0x424   : > { %v1784_v54 = vsel %vm6398_vm6, %v1764_v2, 0.0  ;;  %vm1502_vm0 = vmor %vm6399_vm7, %vm5639_vm12  ;;  %vm6402_vm13 = vcmp.lt.f32.partialorder %v6378_v34, 0.4  ;;  %v1732_v52 = vmul.f32 %v5550_v12, %v1708_v21  ;;  %v1703_v16 = vsub.f32 0.0, %v1683_v28  ;;  %v6435_v12 = vld [vmem:[#allocation77_spill] sm:$0xff] }
 0x425   : > { %1785 = vadd.xlane.f32.xlu0 %v1784_v54  ;;  %v1766_v5 = vsel %vm1502_vm0, %v1730_v1, 0.0  ;;  %vm5668_vm14 = vmand %vm6402_vm13, %vm6401_vm8  ;;  %v1687_v50 = vmul.f32 0.6931472, %v3260_v0  ;;  %v1717_v35 = vmul.f32 %v5588_v18, %v1633_v3  ;;  %vm1611_vm6 = vcmp.eq.f32.partialorder %v5525_v40, 0.0 }
 0x426   : > { %v1612_v31 = vand.u32 2147483648, %v5525_v40  ;;  %vm1623_vm12 = vcmp.eq.f32.partialorder %v5547_v19, inf  ;;  %vm1496_vm13 = vmor %vm4091_vm4, %vm5651_vm1  ;;  %v1635_v34 = vmul.f32 %v1599_v14, %v5494_v24  ;;  %vm6406_vm0 = vcmp.lt.s32.totalorder %v6405_v7, 256  ;;  %v6412_v24 = vld [vmem:[#allocation20_spill] sm:$0xff]  ;;  %v5738_v46 = vpop.permute.xlu0 %2337  ;;  %v6434_v7 = vld [vmem:[#allocation22_spill] sm:$0xff] }
 0x427   : > { %v1760_v37 = vsel %vm1496_vm13, %v1724_v8, 0.0  ;;  %vm6407_vm8 = vcmp.lt.f32.partialorder %v6380_v39, 0.4  ;;  %v1727_v18 = vmul.f32 %v1715_v59, %v1703_v16  ;;  %v1710_v47 = vsub.f32 0.0, %v1697_v53  ;;  %v3264_v39 = vpop.eup %3263  ;;  %v3280_v8 = vld [vmem:[%s3453_s27 + $0x8] sm:$0xff] }
 0x428   : > { %vm5686_vm7 = vmand %vm6407_vm8, %vm6406_vm0  ;;  %v1613_v13 = vsel %vm1611_vm6, %v1612_v31, %v1610_v61  ;;  %v1624_v20 = vsel %vm1623_vm12, %v5547_v19, %v1622_v26  ;;  %vm6410_vm11 = vcmask 64512   ;;  %vm6411_vm1 = vnez %v6314_v6  ;;  %v6429_v31 = vld [vmem:[#allocation39_spill] sm:$0xff] }
 0x429   : > { %v1790_v2 = vsel %vm6410_vm11, %v1766_v5, 0.0  ;;  %vm1504_vm13 = vmor %vm6411_vm1, %vm5668_vm14  ;;  %vm1400_vm3 = vcmp.lt.f32.partialorder %v6412_v24, 0.4  ;;  %vm6414_vm0 = vcmp.lt.s32.totalorder %v6413_v51, 256  ;;  %vm6415_vm6 = vcmp.lt.f32.partialorder %v6386_v57, 0.4 }
 0x42a   : > { %1791 = vadd.xlane.f32.xlu0 %v1790_v2  ;;  %v1768_v49 = vsel %vm1504_vm13, %v1732_v52, 0.0  ;;  %vm5703_vm8 = vmand %vm6415_vm6, %vm6414_vm0  ;;  %v1734_v56 = vmul.f32 %v5553_v27, %v1710_v47  ;;  %v1705_v28 = vsub.f32 0.0, %v1687_v50  ;;  %v1691_v0 = vmul.f32 0.6931472, %v3262_v10  ;;  %v5755_v47 = vpop.permute.xlu1 %2333  ;;  %v5760_v2 = vpop.permute.xlu0 %2341  ;;  %v6438_v51 = vld [vmem:[#allocation45_spill] sm:$0xff] }
 0x42b   : > { %vm6418_vm11 = vnez %v6352_v38  ;;  %vm1625_vm14 = vcmp.eq.f32.partialorder %v5547_v19, 0.0  ;;  %v1626_v3 = vand.u32 2147483648, %v5547_v19  ;;  %vm6419_vm12 = vcmask 64512   ;;  %v6421_v38 = vld [vmem:[#allocation36_spill] sm:$0xff] }
 0x42c   : > { %v1647_v59 = vsel %vm6418_vm11, 0.25, %v6340_v58  ;;  %v1772_v14 = vsel %vm6419_vm12, %v1760_v37, 0.0  ;;  %vm6420_vm13 = vnez %v6335_v25  ;;  %v1637_v27 = vmul.f32 %v1613_v13, %v5525_v40  ;;  %v6426_v40 = vld [vmem:[#allocation21_spill] sm:$0xff] }
 0x42d   : > { %vm1499_vm0 = vmor %vm6420_vm13, %vm5686_vm7  ;;  %v1719_v57 = vmul.f32 %v1647_v59, %v1635_v34  ;;  %1773 = vadd.xlane.f32.xlu1 %v1772_v14  ;;  %vm6422_vm6 = vcmp.lt.s32.totalorder %v6421_v38, 256  ;;  %v1729_v21 = vmul.f32 %v1717_v35, %v1705_v28  ;;  %v1627_v53 = vsel %vm1625_vm14, %v1626_v3, %v1624_v20  ;;  %v3266_v5 = vpop.eup %3265  ;;  %v6443_v14 = vld [vmem:[#allocation85_spill] sm:$0xff]  ;;  %v6451_v34 = vld [vmem:[#allocation78_spill] sm:$0xff] }
 0x42e   : > { %v1763_v11 = vsel %vm1499_vm0, %v1727_v18, 0.0  ;;  %vm5725_vm11 = vmand %vm1400_vm3, %vm6422_vm6  ;;  %v1796_v61 = vsel %vm6419_vm12, %v1768_v49, 0.0  ;;  %vm6425_vm7 = vnez %v6317_v44  ;;  %vm1402_vm13 = vcmp.lt.f32.partialorder %v6426_v40, 0.4  ;;  %v5771_v28 = vpop.permute.xlu1 %2339  ;;  %v5773_v59 = vpop.permute.xlu0 %2345 }
 0x42f   : > { %vm1506_vm1 = vmor %vm6425_vm7, %vm5703_vm8  ;;  %1797 = vadd.xlane.f32.xlu0 %v1796_v61  ;;  %v1707_v54 = vsub.f32 0.0, %v1691_v0  ;;  %v1695_v10 = vmul.f32 0.6931472, %v3264_v39  ;;  %v1649_v36 = vsel %vm5478_vm10, 0.25, %v6340_v58  ;;  %vm6428_vm14 = vnez %v6342_v17 }
 0x430   : > { %v1770_v26 = vsel %vm1506_vm1, %v1734_v56, 0.0  ;;  %vm6427_vm3 = vmmov %vm6419_vm12  ;;  %v1721_v16 = vmul.f32 %v1649_v36, %v1637_v27  ;;  %v1639_v50 = vmul.f32 %v1627_v53, %v5547_v19  ;;  %vm6430_vm1 = vcmp.lt.s32.totalorder %v6429_v31, 256  ;;  %v6440_v56 = vld [vmem:[#allocation33_spill] sm:$0xff]  ;;  %v6446_v53 = vld [vmem:[#allocation82_spill] sm:$0xff] }
 0x431   : > { %v1781_v52 = vsel %vm6427_vm3, %v1763_v11, 0.0  ;;  %vm1501_vm8 = vmor %vm6428_vm14, %vm5725_vm11  ;;  %v1731_v32 = vmul.f32 %v1719_v57, %v1707_v54  ;;  %vm1404_vm6 = vcmp.lt.f32.partialorder %v6434_v7, 0.4  ;;  %v1850_v18 = vmul.f32 0.5, %v6435_v12  ;;  %v6444_v11 = vld [vmem:[#allocation49_spill] sm:$0xff]  ;;  %v6447_v54 = vld [vmem:[#allocation68_spill] sm:$0xff] }
 0x432   : > { %1782 = vadd.xlane.f32.xlu1 %v1781_v52  ;;  %v1765_v35 = vsel %vm1501_vm8, %v1729_v21, 0.0  ;;  %vm5748_vm0 = vmand %vm1402_vm13, %vm6430_vm1  ;;  %v1709_v13 = vsub.f32 0.0, %v1695_v10  ;;  %v1699_v19 = vmul.f32 0.6931472, %v3266_v5  ;;  %v1651_v20 = vsel %vm5513_vm15, 0.25, %v6340_v58  ;;  %v6441_v58 = vld [vmem:[#allocation70_spill] sm:$0xff]  ;;  %v5789_v5 = vpop.permute.xlu1 %2343 }
 0x433   : > { %vm6433_vm10 = vmmov %vm6427_vm3  ;;  %vm6437_vm11 = vnez %v6349_v23  ;;  %v1723_v39 = vmul.f32 %v1651_v20, %v1639_v50  ;;  %vm1406_vm1 = vcmp.lt.f32.partialorder %v6440_v56, 0.4  ;;  %v1862_v29 = vadd.f32 %v1850_v18, %v6441_v58  ;;  %v6448_v52 = vld [vmem:[#allocation86_spill] sm:$0xff]  ;;  %v6449_v50 = vld [vmem:[#allocation71_spill] sm:$0xff] }
 0x434   : > { %v1802_v37 = vsel %vm6433_vm10, %v1770_v26, 0.0  ;;  %vm6436_vm13 = vmmov %vm6427_vm3  ;;  %vm6439_vm3 = vcmp.lt.s32.totalorder %v6438_v51, 256  ;;  %v1733_v1 = vmul.f32 %v1721_v16, %v1709_v13  ;;  %v1711_v0 = vsub.f32 0.0, %v1699_v19  ;;  %v5786_v26 = vpop.permute.xlu0 %2349  ;;  %v6450_v31 = vld [vmem:[#allocation26_spill] sm:$0xff]  ;;  %v6453_v18 = vld [vmem:[#allocation92_spill] sm:$0xff] }
 0x435   : > { %1803 = vadd.xlane.f32.xlu0 %v1802_v37  ;;  %v1787_v24 = vsel %vm6436_vm13, %v1765_v35, 0.0  ;;  %vm1503_vm12 = vmor %vm6437_vm11, %vm5748_vm0  ;;  %v1853_v57 = vmul.f32 0.5, %v6443_v14  ;;  %v1922_v21 = vsub.f32 %v1862_v29, %v3280_v8  ;;  %v1852_v61 = vmul.f32 0.5, %v6446_v53  ;;  %v3281_v7 = vld [vmem:[%s3453_s27 + $0x20] sm:$0xff]  ;;  %v6454_v19 = vld [vmem:[#allocation24_spill] sm:$0xff] }
 0x436   : > { %1788 = vadd.xlane.f32.xlu1 %v1787_v24  ;;  %v1767_v49 = vsel %vm1503_vm12, %v1731_v32, 0.0  ;;  %vm1416_vm8 = vmand %vm1404_vm6, %vm6439_vm3  ;;  %v1735_v38 = vmul.f32 %v1723_v39, %v1711_v0  ;;  %v2149_v32 = vsub.f32 %v6451_v34, %v6450_v31  ;;  %v1855_v13 = vmul.f32 0.5, %v6453_v18  ;;  %v6455_v20 = vld [vmem:[#allocation83_spill] sm:$0xff]  ;;  %v3282_v58 = vld [vmem:[%s3453_s27 + $0x18] sm:$0xff] }
 0x437   : > { %vm6442_vm15 = vmmov %vm6433_vm10  ;;  %vm6445_vm10 = vcmp.lt.s32.totalorder %v6444_v11, 256  ;;  %v1865_v10 = vadd.f32 %v1853_v57, %v6447_v54  ;;  %v1972_v16 = vmul.f32 %v6448_v52, %v1922_v21  ;;  %v1864_v35 = vadd.f32 %v1852_v61, %v6449_v50  ;;  %v6458_v57 = vld [vmem:[#allocation69_spill] sm:$0xff]  ;;  %v6460_v61 = vld [vmem:[#allocation90_spill] sm:$0xff] }
 0x438   : > { %v1793_v3 = vsel %vm6442_vm15, %v1767_v49, 0.0  ;;  %vm1505_vm0 = vmor %vm4225_vm2, %vm1416_vm8  ;;  %v2151_v24 = vsub.f32 %v6455_v20, %v6454_v19  ;;  %v2510_v39 = vpop.permute.xlu0 %2509  ;;  %v6456_v49 = vld [vmem:[#allocation89_spill] sm:$0xff]  ;;  %v2161_v0 = vand.u32 2147483647, %v2149_v32  ;;  %v3283_v52 = vld [vmem:[%s3453_s27 + $0x30] sm:$0xff] }
 0x439   : > { %v1769_v27 = vsel %vm1505_vm0, %v1733_v1, 0.0  ;;  %vm1418_vm6 = vmand %vm1406_vm1, %vm6445_vm10  ;;  %v1925_v12 = vsub.f32 %v1865_v10, %v3281_v7  ;;  %v1854_v51 = vmul.f32 0.5, %v6456_v49  ;;  %v6457_v1 = vld [vmem:[#allocation23_spill] sm:$0xff]  ;;  %v1924_v29 = vsub.f32 %v1864_v35, %v3282_v58 }
 0x43a   : > { %1794 = vadd.xlane.f32.xlu1 %v1793_v3  ;;  %v1799_v40 = vsel %vm6436_vm13, %v1769_v27, 0.0  ;;  %vm1507_vm12 = vmor %vm4245_vm9, %vm1418_vm6  ;;  %v2150_v56 = vsub.f32 %v1972_v16, %v6457_v1  ;;  %v5803_v3 = vpop.permute.xlu1 %2347  ;;  %v1867_v27 = vadd.f32 %v1855_v13, %v6458_v57  ;;  %v2163_v11 = vand.u32 2147483647, %v2151_v24  ;;  %v3284_v35 = vld [vmem:[%s3453_s27 + $0x28] sm:$0xff] }
 0x43b   : > { %v1771_v36 = vsel %vm1507_vm12, %v1735_v38, 0.0  ;;  %vm6452_vm3 = vmmov %vm6436_vm13  ;;  %v1978_v14 = vmul.f32 %v4694_v41, %v1925_v12  ;;  %v6459_v38 = vld [vmem:[#allocation72_spill] sm:$0xff]  ;;  %v2185_v54 = vmul.f32 4.5, %v2161_v0  ;;  %v2968_v18 = vadd.f32 -0.055555556, %v2161_v0 }
 0x43c   : > { %v1805_v37 = vsel %vm6452_vm3, %v1771_v36, 0.0  ;;  %v1866_v8 = vadd.f32 %v1854_v51, %v6459_v38  ;;  %v2654_v21 = vpop.permute.xlu0 %2653  ;;  %v2162_v53 = vand.u32 2147483647, %v2150_v56  ;;  %v1927_v16 = vsub.f32 %v1867_v27, %v3283_v52  ;;  %v6461_v56 = vld [vmem:[#allocation46_spill] sm:$0xff] }
 0x43d   : > { %v2153_v36 = vsub.f32 %v1978_v14, %v4269_v63  ;;  %v2187_v50 = vmul.f32 4.5, %v2163_v11  ;;  %v2197_v34 = vmul.f32 %v2185_v54, %v2161_v0  ;;  %vm2173_vm8 = vcmp.le.f32.partialorder %v2161_v0, 0.11111111  ;;  %v6463_v0 = vld [vmem:[#allocation79_spill] sm:$0xff] }
 0x43e   : > { %1800 = vadd.xlane.f32.xlu1 %v1799_v40  ;;  %v1976_v40 = vmul.f32 %v6460_v61, %v1924_v29  ;;  %v5809_v10 = vpop.permute.xlu1 %2351  ;;  %v1926_v31 = vsub.f32 %v1866_v8, %v3284_v35  ;;  %v2186_v32 = vmul.f32 4.5, %v2162_v53  ;;  %v1982_v12 = vmul.f32 %v4730_v48, %v1927_v16  ;;  %v6462_v48 = vld [vmem:[#allocation40_spill] sm:$0xff] }
 0x43f   : > { %v2165_v7 = vand.u32 2147483647, %v2153_v36  ;;  %v2199_v13 = vmul.f32 %v2187_v50, %v2163_v11  ;;  %v2221_v24 = vsel %vm2173_vm8, %v2197_v34, %v2968_v18  ;;  %v2970_v51 = vadd.f32 -0.055555556, %v2163_v11  ;;  %v6464_v34 = vld [vmem:[#allocation51_spill] sm:$0xff] }
 0x440   : > { %v2152_v41 = vsub.f32 %v1976_v40, %v4055_v60  ;;  %v1980_v20 = vmul.f32 %v4746_v45, %v1926_v31  ;;  %v2198_v49 = vmul.f32 %v2186_v32, %v2162_v53  ;;  %v2365_v1 = vadd.f32 %v5657_v43, %v2221_v24  ;;  %v6468_v24 = vld [vmem:[#allocation107_spill] sm:$0xff] }
 0x441   : > { %vm2175_vm1 = vcmp.le.f32.partialorder %v2163_v11, 0.11111111  ;;  %v2155_v58 = vsub.f32 %v1982_v12, %v6461_v56  ;;  %v2969_v29 = vadd.f32 -0.055555556, %v2162_v53  ;;  %v2189_v57 = vmul.f32 4.5, %v2165_v7 }
 0x442   : > { %1806 = vadd.xlane.f32.xlu1 %v1805_v37  ;;  %v2658_v37 = vpop.permute.xlu0 %2657  ;;  %v2512_v19 = vpop.permute.xlu1 %2511  ;;  %v2164_v63 = vand.u32 2147483647, %v2152_v41  ;;  %v2223_v14 = vsel %vm2175_vm1, %v2199_v13, %v2970_v51  ;;  %v2154_v27 = vsub.f32 %v1980_v20, %v6462_v48  ;;  %vm2174_vm15 = vcmp.le.f32.partialorder %v2162_v53, 0.11111111  ;;  %v6465_v53 = vld [vmem:[#allocation73_spill] sm:$0xff]  ;;  %v6467_v20 = vld [vmem:[#allocation55_spill] sm:$0xff] }
 0x443   : > { %v2367_v38 = vadd.f32 %v5755_v47, %v2223_v14  ;;  %v2545_v45 = vadd.f32 %v2510_v39, %v2365_v1  ;;  %v1860_v8 = vmul.f32 0.5, %v6463_v0  ;;  %v2222_v61 = vsel %vm2174_vm15, %v2198_v49, %v2969_v29  ;;  %v6466_v47 = vld [vmem:[#allocation74_spill] sm:$0xff] }
 0x444   : > { %v2188_v40 = vmul.f32 4.5, %v2164_v63  ;;  %v2366_v43 = vadd.f32 %v5719_v22, %v2222_v61  ;;  %v2167_v52 = vand.u32 2147483647, %v2155_v58  ;;  %v2201_v16 = vmul.f32 %v2189_v57, %v2165_v7 }
 0x445   : > { %v2689_v11 = vadd.f32 %v2654_v21, %v2545_v45  ;;  %v2166_v50 = vand.u32 2147483647, %v2154_v27  ;;  %v2156_v32 = vsub.f32 %v6465_v53, %v6464_v34  ;;  %v1872_v39 = vadd.f32 %v1860_v8, %v6466_v47  ;;  %v3285_v45 = vld [vmem:[%s3453_s27 + $0x58] sm:$0xff] }
 0x446   : > { %v2518_v60 = vpop.permute.xlu0 %2517  ;;  %v2546_v35 = vadd.f32 %v2512_v19, %v2366_v43  ;;  %v2200_v12 = vmul.f32 %v2188_v40, %v2164_v63  ;;  %v2972_v18 = vadd.f32 -0.055555556, %v2165_v7  ;;  %vm2177_vm0 = vcmp.le.f32.partialorder %v2165_v7, 0.11111111 }
 0x447   : > { %v2514_v54 = vpop.permute.xlu1 %2513  ;;  %vm2713_vm10 = vcmask 56368   ;;  %v2701_v22 = vsel %vm4091_vm4, %v2689_v11, 0.0  ;;  %v2157_v49 = vsub.f32 %v6468_v24, %v6467_v20  ;;  %v2971_v19 = vadd.f32 -0.055555556, %v2164_v63 }
 0x448   : > { %v2547_v36 = vadd.f32 %v2514_v54, %v2367_v38  ;;  %v2191_v51 = vmul.f32 4.5, %v2167_v52  ;;  %vm2176_vm6 = vcmp.le.f32.partialorder %v2164_v63, 0.11111111  ;;  %vm6469_vm13 = vnez %v6288_v62 }
 0x449   : > { %v2224_v4 = vsel %vm2176_vm6, %v2200_v12, %v2971_v19  ;;  %v2190_v29 = vmul.f32 4.5, %v2166_v50  ;;  %v2714_v14 = vsel %vm2713_vm10, %v2701_v22, 0.0  ;;  %v2169_v0 = vand.u32 2147483647, %v2157_v49  ;;  %v6473_v12 = vld [vmem:[#allocation57_spill] sm:$0xff] }
 0x44a   : > { %v2691_v31 = vadd.f32 %v2658_v37, %v2547_v36  ;;  %v2225_v37 = vsel %vm2177_vm0, %v2201_v16, %v2972_v18  ;;  %v2368_v27 = vadd.f32 %v5691_v55, %v2224_v4  ;;  %v2203_v15 = vmul.f32 %v2191_v51, %v2167_v52  ;;  %v6474_v18 = vld [vmem:[#allocation76_spill] sm:$0xff]  ;;  %v6476_v4 = vld [vmem:[#allocation58_spill] sm:$0xff] }
 0x44b   : > { %v2662_v41 = vpop.permute.xlu0 %2661  ;;  %v2369_v1 = vadd.f32 %v5738_v46, %v2225_v37  ;;  %v1932_v46 = vsub.f32 %v1872_v39, %v3285_v45  ;;  %v2168_v43 = vand.u32 2147483647, %v2156_v32  ;;  %v2202_v11 = vmul.f32 %v2190_v29, %v2166_v50  ;;  %v6477_v29 = vld [vmem:[#allocation93_spill] sm:$0xff] }
 0x44c   : > { %v2656_v13 = vpop.permute.xlu1 %2655  ;;  %v2703_v56 = vsel %vm4099_vm5, %v2691_v31, 0.0  ;;  %v2974_v36 = vadd.f32 -0.055555556, %v2167_v52  ;;  %vm2179_vm4 = vcmp.le.f32.partialorder %v2167_v52, 0.11111111  ;;  %v6470_v31 = vld [vmem:[#allocation105_spill] sm:$0xff]  ;;  %vm6471_vm12 = vnez %v6302_v9 }
 0x44d   : > { %v2690_v21 = vadd.f32 %v2656_v13, %v2546_v35  ;;  %v2549_v38 = vadd.f32 %v2518_v60, %v2369_v1  ;;  %v2717_v8 = vsel %vm2713_vm10, %v2703_v56, 0.0  ;;  %v1992_v55 = vmul.f32 %v6470_v31, %v1932_v46 }
 0x44e   : > { %v2973_v60 = vadd.f32 -0.055555556, %v2166_v50  ;;  %v2227_v34 = vsel %vm2179_vm4, %v2203_v15, %v2974_v36  ;;  %v2193_v53 = vmul.f32 4.5, %v2169_v0  ;;  %vm2178_vm5 = vcmp.le.f32.partialorder %v2166_v50, 0.11111111 }
 0x44f   : > { %v2702_v7 = vsel %vm6469_vm13, %v2690_v21, 0.0  ;;  %v2522_v58 = vpop.permute.xlu0 %2521  ;;  %v2693_v62 = vadd.f32 %v2662_v41, %v2549_v38  ;;  %v2371_v47 = vadd.f32 %v5760_v2, %v2227_v34  ;;  %vm6472_vm3 = vnez %v6335_v25  ;;  %v6475_v2 = vld [vmem:[#allocation60_spill] sm:$0xff] }
 0x450   : > { %v2715_v57 = vsel %vm2713_vm10, %v2702_v7, 0.0  ;;  %v2516_v48 = vpop.permute.xlu1 %2515  ;;  %v2158_v13 = vsub.f32 %v6474_v18, %v6473_v12  ;;  %v2226_v52 = vsel %vm2178_vm5, %v2202_v11, %v2973_v60  ;;  %v2192_v22 = vmul.f32 4.5, %v2168_v43 }
 0x451   : > { %v2716_v63 = vadd.f32 %v2715_v57, %v2714_v14  ;;  %v2548_v61 = vadd.f32 %v2516_v48, %v2368_v27  ;;  %v2705_v41 = vsel %vm6471_vm12, %v2693_v62, 0.0  ;;  %v2370_v24 = vadd.f32 %v5771_v28, %v2226_v52 }
 0x452   : > { %v2551_v50 = vadd.f32 %v2522_v58, %v2371_v47  ;;  %v2160_v19 = vsub.f32 %v1992_v55, %v6475_v2  ;;  %v2205_v9 = vmul.f32 %v2193_v53, %v2169_v0  ;;  %v2721_v37 = vsel %vm2713_vm10, %v2705_v41, 0.0 }
 0x453   : > { %v2666_v40 = vpop.permute.xlu0 %2665  ;;  %v2718_v54 = vadd.f32 %v2717_v8, %v2716_v63  ;;  %v2170_v7 = vand.u32 2147483647, %v2158_v13  ;;  %v2159_v14 = vsub.f32 %v6477_v29, %v6476_v4  ;;  %v2204_v57 = vmul.f32 %v2192_v22, %v2168_v43 }
 0x454   : > { %v2660_v16 = vpop.permute.xlu1 %2659  ;;  %v2695_v25 = vadd.f32 %v2666_v40, %v2551_v50  ;;  %v2976_v48 = vadd.f32 -0.055555556, %v2169_v0  ;;  %vm2181_vm8 = vcmp.le.f32.partialorder %v2169_v0, 0.11111111  ;;  %v2172_v58 = vand.u32 2147483647, %v2160_v19 }
 0x455   : > { %v2692_v35 = vadd.f32 %v2660_v16, %v2548_v61  ;;  %v2975_v38 = vadd.f32 -0.055555556, %v2168_v43  ;;  %vm2180_vm1 = vcmp.le.f32.partialorder %v2168_v43, 0.11111111  ;;  %vm6478_vm15 = vnez %v6308_v42 }
 0x456   : > { %v2229_v63 = vsel %vm2181_vm8, %v2205_v9, %v2976_v48  ;;  %v2707_v46 = vsel %vm6478_vm15, %v2695_v25, 0.0  ;;  %v2171_v8 = vand.u32 2147483647, %v2159_v14  ;;  %v2194_v61 = vmul.f32 4.5, %v2170_v7 }
 0x457   : > { %v2704_v39 = vsel %vm6472_vm3, %v2692_v35, 0.0  ;;  %v2526_v32 = vpop.permute.xlu0 %2525  ;;  %v2373_v45 = vadd.f32 %v5773_v59, %v2229_v63  ;;  %v2228_v62 = vsel %vm2180_vm1, %v2204_v57, %v2975_v38  ;;  %v2196_v43 = vmul.f32 4.5, %v2172_v58 }
 0x458   : > { %v2719_v21 = vsel %vm2713_vm10, %v2704_v39, 0.0  ;;  %v2520_v20 = vpop.permute.xlu1 %2519  ;;  %v2372_v11 = vadd.f32 %v5789_v5, %v2228_v62  ;;  %v2725_v59 = vsel %vm2713_vm10, %v2707_v46, 0.0  ;;  %v2206_v55 = vmul.f32 %v2194_v61, %v2170_v7  ;;  %v6480_v62 = vld [vmem:[#allocation11_spill] sm:$0xff] }
 0x459   : > { %v2720_v49 = vadd.f32 %v2719_v21, %v2718_v54  ;;  %v2550_v51 = vadd.f32 %v2520_v20, %v2370_v24  ;;  %v2553_v36 = vadd.f32 %v2526_v32, %v2373_v45  ;;  %v2195_v17 = vmul.f32 4.5, %v2171_v8 }
 0x45a   : > { %v2977_v53 = vadd.f32 -0.055555556, %v2170_v7  ;;  %v2208_v47 = vmul.f32 %v2196_v43, %v2172_v58  ;;  %vm6479_vm0 = vnez %v6314_v6  ;;  %v2979_v18 = vadd.f32 -0.055555556, %v2172_v58 }
 0x45b   : > { %v2670_v1 = vpop.permute.xlu0 %2669  ;;  %v2722_v56 = vadd.f32 %v2721_v37, %v2720_v49  ;;  %v2207_v12 = vmul.f32 %v2195_v17, %v2171_v8  ;;  %vm2184_vm6 = vcmp.le.f32.partialorder %v2172_v58, 0.11111111  ;;  %v2978_v20 = vadd.f32 -0.055555556, %v2171_v8 }
 0x45c   : > { %v2697_v35 = vadd.f32 %v2670_v1, %v2553_v36  ;;  %v2232_v24 = vsel %vm2184_vm6, %v2208_v47, %v2979_v18  ;;  %vm2183_vm13 = vcmp.le.f32.partialorder %v2171_v8, 0.11111111  ;;  %v3357_v30 = vmov 1966171168  }
 0x45d   : > { %v2664_v27 = vpop.permute.xlu1 %2663  ;;  %v2376_v6 = vadd.f32 %v5809_v10, %v2232_v24  ;;  %v2231_v2 = vsel %vm2183_vm13, %v2207_v12, %v2978_v20  ;;  %v2750_v38 = vunpack.c.l.s4 %v3357_v30 }
 0x45e   : > { %v2694_v28 = vadd.f32 %v2664_v27, %v2550_v51  ;;  %v2709_v39 = vsel %vm6479_vm0, %v2697_v35, 0.0  ;;  %v2375_v37 = vadd.f32 %v5786_v26, %v2231_v2 }
 0x45f   : > { %v2729_v50 = vsel %vm2713_vm10, %v2709_v39, 0.0  ;;  %v2751_v46 = vunpack.c.0.s8 %v2750_v38 }
 0x460   : > { %v2706_v15 = vsel %vm6428_vm14, %v2694_v28, 0.0  ;;  %v2530_v54 = vpop.permute.xlu0 %2529  ;;  %vm2182_vm14 = vcmp.le.f32.partialorder %v2170_v7, 0.11111111 }
 0x461   : > { %v2723_v40 = vsel %vm2713_vm10, %v2706_v15, 0.0  ;;  %v2524_v0 = vpop.permute.xlu1 %2523  ;;  %v2230_v32 = vsel %vm2182_vm14, %v2206_v55, %v2977_v53  ;;  %v2555_v1 = vadd.f32 %v2530_v54, %v2375_v37  ;;  %v2754_v33 = vsub.s32 %v2751_v46, %v6480_v62 }
 0x462   : > { %v2724_v16 = vadd.f32 %v2723_v40, %v2722_v56  ;;  %v2552_v42 = vadd.f32 %v2524_v0, %v2372_v11  ;;  %v2374_v22 = vadd.f32 %v5803_v3, %v2230_v32 }
 0x464   : > { %v2726_v31 = vadd.f32 %v2725_v59, %v2724_v16  ;;  %v2532_v41 = vpop.permute.xlu0 %2531 }
 0x465   : > { %v2668_v60 = vpop.permute.xlu1 %2667  ;;  %v2556_v25 = vadd.f32 %v2532_v41, %v2376_v6 }
 0x466   : > { %v2696_v34 = vadd.f32 %v2668_v60, %v2552_v42 }
 0x468   : > { %v2708_v5 = vsel %vm6437_vm11, %v2696_v34, 0.0 }
 0x469   : > { %v2727_v13 = vsel %vm2713_vm10, %v2708_v5, 0.0 }
 0x46a   : > { %v2528_v52 = vpop.permute.xlu1 %2527  ;;  %v2728_v21 = vadd.f32 %v2727_v13, %v2726_v31  ;;  %v2676_v19 = vpop.permute.xlu0 %2675 }
 0x46b   : > { %v2554_v49 = vadd.f32 %v2528_v52, %v2374_v22  ;;  %v2700_v3 = vadd.f32 %v2676_v19, %v2556_v25 }
 0x46c   : > { %v2730_v23 = vadd.f32 %v2729_v50, %v2728_v21  ;;  %v2743_v50 = vld [vmem:[#allocation2] sm:$0x1] }
 0x46d   : > { %v2712_v10 = vsel %vm4245_vm9, %v2700_v3, 0.0 }
 0x46e   : > { %v2735_v27 = vsel %vm2713_vm10, %v2712_v10, 0.0 }
 0x46f   : > { %v2672_v9 = vpop.permute.xlu1 %2671 }
 0x470   : > { %v2698_v51 = vadd.f32 %v2672_v9, %v2554_v49  ;;  %v2775_v9 = vld [vmem:[#allocation4] sm:$0x1] (!%p3016_p13) }
 0x471   : > { %v2778_v37 = vmax.f32 (!%p3016_p13), %v2775_v9, 1.0  ;;  %v2787_v25 = vmul.f32 (!%p3016_p13), 4.0, %v2775_v9  ;;  %vm2785_vm11 = vcmp.gt.f32.partialorder (!%p3016_p13), %v2775_v9, 0.0 }
 0x472   : > { %v2710_v56 = vsel %vm4225_vm2, %v2698_v51, 0.0  ;;  %vm6481_vm2 = vcmask 0  }
 0x473   : > { %v2731_v7 = vsel %vm2713_vm10, %v2710_v56, 0.0  ;;  %vm6482_vm9 = vmmov %vm6481_vm2  ;;  %3286 = vrcp.f32 (!%p3016_p13), %v2778_v37 }
 0x474   : > { %v2674_v4 = vpop.permute.xlu1 %2673  ;;  %v2732_v29 = vadd.f32 %v2731_v7, %v2730_v23  ;;  %v2747_v23 = vld [vmem:[#allocation3] sm:$0x1]  ;;  %3288 = vrcp.f32 (!%p3016_p13), %v2787_v25 }
 0x475   : > { %v2699_v14 = vadd.f32 %v2674_v4, %v2555_v1 }
 0x477   : > { %v2711_v57 = vsel %vm6425_vm7, %v2699_v14, 0.0 }
 0x478   : > { %v2733_v26 = vsel %vm2713_vm10, %v2711_v57, 0.0  ;;  %vm6483_vm10 = vcmask (!%p3016_p13), 0  }
 0x479   : > { %v2734_v48 = vadd.f32 %v2733_v26, %v2732_v29  ;;  %vm6484_vm4 = vmmov (!%p3016_p13), %vm6483_vm10 }
 0x47b   : > { %v2736_v28 = vadd.f32 %v2735_v27, %v2734_v48 }
 0x47d   : > { %v2737_v58 = vrot.slane %v2736_v28, 4  ;;  %v3287_v56 = vpop.eup (!%p3016_p13), %3286 }
 0x47e   : > { %v3289_v7 = vpop.eup (!%p3016_p13), %3288 }
 0x47f   : > { %v2738_v63 = vadd.f32 %v2737_v58, %v2736_v28 }
 0x481   : > { %v2739_v45 = vrot.slane %v2738_v63, 2 }
 0x483   : > { %v2740_v15 = vadd.f32 %v2739_v45, %v2738_v63 }
 0x485   : > { %v2741_v8 = vrot.slane %v2740_v15, 1 }
 0x487   : > { %v2742_v61 = vadd.f32 %v2741_v8, %v2740_v15 }
 0x489   : > { %v2755_v40 = vrot.slane %v2742_v61, %v2754_v33 }
 0x48b   : > { %v2762_v44 = vrot.slane %v2755_v40, %v2754_v33 }
 0x48d   : > { %2763 = vrot.lane.b32.xlu0 %v2762_v44, %s3358_s10 }
 0x4a8   : > { %v1777_v54 = vpop.xlane.xlu0 %1776 }
 0x4ac   : > { %v1780_v0 = vpop.xlane.xlu0 %1779 }
 0x4b2   : > { %v1786_v11 = vpop.xlane.xlu0 %1785 }
 0x4b7   : > { %v1792_v42 = vpop.xlane.xlu0 %1791 }
 0x4ba   : > { %v1774_v36 = vpop.xlane.xlu1 %1773 }
 0x4bb   : > { %v1808_v16 = vadd.f32 %v1777_v54, %v1774_v36 }
 0x4bc   : > { %v1798_v34 = vpop.xlane.xlu0 %1797 }
 0x4bd   : > { %v1809_v43 = vadd.f32 %v1808_v16, %v1780_v0 }
 0x4bf   : > { %v1783_v59 = vpop.xlane.xlu1 %1782 }
 0x4c0   : > { %v1810_v35 = vadd.f32 %v1809_v43, %v1783_v59 }
 0x4c2   : > { %v1811_v31 = vadd.f32 %v1810_v35, %v1786_v11  ;;  %v1804_v32 = vpop.xlane.xlu0 %1803 }
 0x4c3   : > { %v1789_v55 = vpop.xlane.xlu1 %1788 }
 0x4c4   : > { %v1812_v17 = vadd.f32 %v1811_v31, %v1789_v55 }
 0x4c6   : > { %v1813_v60 = vadd.f32 %v1812_v17, %v1792_v42 }
 0x4c7   : > { %v1795_v53 = vpop.xlane.xlu1 %1794 }
 0x4c8   : > { %v1814_v47 = vadd.f32 %v1813_v60, %v1795_v53 }
 0x4ca   : > { %v1815_v41 = vadd.f32 %v1814_v47, %v1798_v34 }
 0x4cb   : > { %v1801_v39 = vpop.xlane.xlu1 %1800 }
 0x4cc   : > { %v1816_v5 = vadd.f32 %v1815_v41, %v1801_v39 }
 0x4ce   : > { %v1817_v12 = vadd.f32 %v1816_v5, %v1804_v32 }
 0x4cf   : > { %v1807_v18 = vpop.xlane.xlu1 %1806 }
 0x4d0   : > { %v1818_v13 = vadd.f32 %v1817_v12, %v1807_v18 }
 0x4d2   : > { %v1819_v52 = vrot.slane %v1818_v13, 4 }
 0x4d4   : > { %v1820_v22 = vadd.f32 %v1819_v52, %v1818_v13 }
 0x4d6   : > { %v1821_v21 = vrot.slane %v1820_v22, 2 }
 0x4d8   : > { %v1822_v20 = vadd.f32 %v1821_v21, %v1820_v22 }
 0x4da   : > { %v1823_v24 = vrot.slane %v1822_v20, 1 }
 0x4dc   : > { %v1824_v6 = vadd.f32 %v1823_v24, %v1822_v20 }
 0x4de   : > { %v2744_v49 = vadd.f32 %v2743_v50, %v1824_v6 }
 0x4e0   : > { %2746 = vst.msk [vmem:[#allocation2] sm:$0x1] %vm6481_vm2, %v2744_v49 }
 0x4e7   : > { %v2777_v1 = vld [vmem:[#allocation2] sm:$0x1] (!%p3016_p13) }
 0x4e8   : > { %v2780_v4 = vmul.f32 (!%p3016_p13), %v3287_v56, %v2777_v1 }
 0x4fc   : > { %2774 = sbr.rel (%p3016_p13) target bundleno = 1294 (0x50e), region = 48 }
 0x4ff   : > { %v2764_v2 = vpop.permute.xlu0 %2763 }
 0x500   : > { %v2766_v19 = vadd.f32 %v2764_v2, %v2747_v23 }
 0x502   : > { %2767 = vst.msk [vmem:[#allocation3] sm:$0x1] %vm6482_vm9, %v2766_v19 }
 0x503   : > { %s2781_s27 = scalar_select %p2776_p0, 1, 0 }
 0x505   : > { %v2782_v51 = vstv %s2781_s27 }
 0x506   : > { %vm2783_vm7 = vcmp.eq.s32.totalorder %v2782_v51, 1 }
 0x507   : > { %v2784_v14 = vsel %vm2783_vm7, %v2780_v4, 0.0 }
 0x508   : > { %2791 = vst.msk [vmem:[%s377_s12] sm:$0x1] %vm6483_vm10, %v2784_v14 }
 0x509   : > { %v2786_v3 = vld [vmem:[#allocation3] sm:$0x1] }
 0x50a   : > { %v2789_v29 = vmul.f32 %v3289_v7, %v2786_v3 }
 0x50c   : > { %v2790_v10 = vsel %vm2785_vm11, %v2789_v29, 0.0 }
 0x50d   : > { %2792 = vst.msk [vmem:[%s380_s25] sm:$0x1] %vm6484_vm4, %v2790_v10 }
 0x50e PF: > { %s24_s9 = sadd.s32 1, %s3342_s9   ;;  %s6485_s17 = sld [smem:[#allocation8_spill]] }
 0x50f   : > { %p21_p1 = scmp.ge.s32.totalorder %s24_s9, 8   ;;  %s6486_s19 = sld [smem:[#allocation9_spill]] }
 0x510   : > { %s6487_s29 = smov %s3334_s8  ;;  %s6488_s30 = smov %s3338_s0 }
 0x511   :  { %23 = sbr.rel (!%p21_p1) target bundleno = 18 (0x12), region = 102 }
 0x514   : > { %s6489_s8 = smov %s6485_s17 }
 0x515   : > { %s6490_s0 = smov %s6486_s19 }

</bundles_post_ra>
